<compile_context>
chip_gen: v5e
topology: v5e:2x2
jax: 0.10.0
libtpu: 0.0.40
codegen_flags: <defaults>
</compile_context>

<pallas_src>
import functools

import numpy as np
import jax
import jax.numpy as jnp
from jax import lax
from jax.experimental import pallas as pl
from jax.experimental.pallas import tpu as pltpu


ROT_GROUP = 8                       # rotations per inner-loop group (one sublane group)
_INT32_MAX = np.iinfo(np.int32).max


# ----------------------------------------------------------------------------
# Pallas kernel
# ----------------------------------------------------------------------------
def hv_kernel(blk_min_ref, blk_max_ref,          # scalar prefetch (SMEM)
              flat_ref, vals_ref,                # (num_groups, TN, 8) i32, (4, TN) f32
              gobj_ref, grot_ref, gscl_ref,      # (1,TG), (r_pad,TG), (3,TG) f32
              *, num_groups):
    tg = gobj_ref.shape[-1]
    j = pl.program_id(0)            # voxel tile index  ("parallel")
    i = pl.program_id(1)            # point block index ("arbitrary" reduction)

    # Zero resident accumulators on the first point block of this voxel tile.
    @pl.when(i == 0)
    def _init():
        grot_ref[...] = jnp.zeros_like(grot_ref)
        gscl_ref[...] = jnp.zeros_like(gscl_ref)

    tile_start = j * tg
    tile_end = tile_start + tg
    # Block-level cull: skip the whole point block if none of its voted voxel
    # ids can fall inside this voxel tile (exact: ids precomputed in XLA).
    blk_overlaps = jnp.logical_and(blk_max_ref[i] >= tile_start,
                                   blk_min_ref[i] < tile_end)

    @pl.when(blk_overlaps)
    def _compute():
        col = lax.broadcasted_iota(jnp.int32, (1, tg), 1) + tile_start
        vals = vals_ref[...].astype(jnp.bfloat16)            # (4, TN), bf16 MXU LHS

        @pl.loop(0, num_groups)
        def _per_group(g):
            flat_g = flat_ref[g]                              # (TN, 8) int32
            # Group-level cull (cheap XLU reduce): adjacent thetas vote nearby.
            g_max = jnp.max(flat_g)
            g_min = jnp.min(jnp.where(flat_g >= 0, flat_g,
                                      jnp.int32(_INT32_MAX)))

            @pl.when(jnp.logical_and(g_max >= tile_start, g_min < tile_end))
            def _group():
                rows = []
                scl = jnp.zeros((3, tg), jnp.float32)
                for jr in range(ROT_GROUP):                   # bounded unroll (8)
                    # Weighted one-hot scatter as an MXU matmul; one-hot is
                    # exact in bf16, accumulation stays f32.
                    onehot = (flat_g[:, jr:jr + 1] == col).astype(jnp.bfloat16)
                    res = jnp.dot(vals, onehot,
                                  preferred_element_type=jnp.float32)  # (4, TG)
                    rows.append(res[0:1, :])
                    scl = scl + res[1:4, :]
                r0 = pl.multiple_of(g * ROT_GROUP, ROT_GROUP)
                grot_ref[pl.ds(r0, ROT_GROUP), :] += jnp.concatenate(rows, 0)
                gscl_ref[...] += scl

    # grid_obj is the rotation marginal; compute once after the last point block.
    @pl.when(i == pl.num_programs(1) - 1)
    def _finalize():
        gobj_ref[...] = jnp.sum(grot_ref[...], axis=0, keepdims=True)


# ----------------------------------------------------------------------------
# Host-side glue
# ----------------------------------------------------------------------------
def _round_up(x, m):
    return ((x + m - 1) // m) * m


def _grid_geometry(points, res):
    pts_np = np.asarray(points, dtype=np.float32)
    corner = pts_np.min(axis=0)
    dims = np.floor((pts_np.max(axis=0) - corner) / np.float32(res)).astype(np.int64) + 1
    return corner.astype(np.float32), (int(dims[0]), int(dims[1]), int(dims[2]))


def _theta_table(count, num_rots):
    return (np.arange(count, dtype=np.float32)
            * np.float32(np.pi / num_rots)).astype(np.float32)


def _tpu_defaults():
    """Generation-aware (tn, tg, vmem_cap) defaults."""
    kind = ""
    try:
        kind = jax.devices()[0].device_kind.lower()
    except Exception:
        pass
    vmem_hw = 128 << 20
    try:
        vmem_hw = int(pltpu.get_tpu_info().vmem_capacity_bytes)
    except Exception:
        pass
    is_v5e = ("v5 lite" in kind) or ("v5e" in kind) or ("v5litepod" in kind)
    small_vmem = (vmem_hw <= (64 << 20)) or ("v7" in kind)    # v7x-class: 64 MiB/core
    tn = 128 if is_v5e else 256          # matmul K: v5e MXU depth 128, v6e/v7x 256
    if small_vmem:
        tg, cap = 2048, min(44 << 20, (vmem_hw * 3) // 4)
    else:
        tg, cap = 4096, min(96 << 20, (vmem_hw * 3) // 4)     # 128 MiB chips
    return tn, tg, cap


def hough_voting_forward(points, xyz, scale, obj, res, num_rots,
                         tn=None, tg=None, vmem_cap=None):
    corner, (GX, GY, GZ) = _grid_geometry(points, res)
    G = GX * GY * GZ
    inv_res = np.float32(1.0 / res)

    auto_tn, auto_tg, auto_cap = _tpu_defaults()
    tn = auto_tn if tn is None else int(tn)
    tg = auto_tg if tg is None else int(tg)
    vmem_cap = auto_cap if vmem_cap is None else int(vmem_cap)

    # Voxel-axis tiling: lane-dense tiles of tg voxels.  Ensure >=2 tiles when
    # possible so both v7x TensorCores get work along the "parallel" axis.
    tg = max(128, _round_up(min(tg, _round_up(G, 128)), 128))
    if _round_up(G, tg) // tg == 1 and G > 128:
        tg = max(128, _round_up((G + 1) // 2, 128))
    g_pad = _round_up(G, tg)
    num_g_tiles = g_pad // tg

    # Point-axis tiling: tn is the matmul K (lanes of `vals`), multiple of 128.
    tn = max(128, _round_up(tn, 128))
    n = int(points.shape[0])
    n_pad = _round_up(max(n, tn), tn)
    num_n_blocks = n_pad // tn

    # Rotation padding to sublane groups of 8 (padded rotations never vote).
    r_pad = _round_up(int(num_rots), ROT_GROUP)
    num_groups = r_pad // ROT_GROUP
    theta = _theta_table(r_pad, num_rots)
    cos_t = jnp.asarray(np.cos(theta)[None, :])               # (1, r_pad)
    sin_t = jnp.asarray(np.sin(theta)[None, :])

    pts = jnp.asarray(points, jnp.float32) - jnp.asarray(corner)[None, :]
    scl = jnp.asarray(scale, jnp.float32)
    off = jnp.asarray(xyz, jnp.float32) * scl
    w = jnp.asarray(obj, jnp.float32).reshape(n, 1)

    # Precompute per-(point, rotation) flat voxel ids once in plain XLA, so the
    # kernel does no trig/rounding and tile culling is exact.
    ox, oy, oz = off[:, 0:1], off[:, 1:2], off[:, 2:3]
    cx = pts[:, 0:1] - (ox * cos_t + oz * sin_t)               # R_y(theta)
    cz = pts[:, 2:3] - (oz * cos_t - ox * sin_t)
    cy = pts[:, 1:2] - oy
    gx = jnp.round(cx * inv_res).astype(jnp.int32)
    gz = jnp.round(cz * inv_res).astype(jnp.int32)
    gy = jnp.broadcast_to(jnp.round(cy * inv_res).astype(jnp.int32), gx.shape)
    rot_ok = jnp.arange(r_pad, dtype=jnp.int32)[None, :] < num_rots
    valid = ((gx >= 0) & (gx < GX) & (gy >= 0) & (gy < GY)
             & (gz >= 0) & (gz < GZ) & rot_ok)
    flat = jnp.where(valid, gx * (GY * GZ) + gy * GZ + gz, -1)  # (n, r_pad) int32

    # Spatial sort: order points by their smallest voted voxel id so each
    # tn-point block spans few voxel tiles and most (tile, block) pairs cull.
    big = jnp.int32(_INT32_MAX)
    key = jnp.min(jnp.where(flat >= 0, flat, big), axis=1)
    order = jnp.argsort(key)
    flat = flat[order]
    w = w[order]
    scl = scl[order]

    vals = jnp.concatenate([w, w * scl], axis=1).T              # (4, n) f32
    flat = jnp.pad(flat, ((0, n_pad - n), (0, 0)), constant_values=-1)
    vals = jnp.pad(vals, ((0, 0), (0, n_pad - n)))              # padded points: w = 0

    # Per-block [min, max] voted voxel id -> SMEM scalars for tile culling.
    flat_blk = flat.reshape(num_n_blocks, tn, r_pad)
    blk_max = jnp.max(flat_blk, axis=(1, 2)).astype(jnp.int32)  # -1 if block has no vote
    blk_min = jnp.min(jnp.where(flat_blk >= 0, flat_blk, big),
                      axis=(1, 2)).astype(jnp.int32)

    # Group-major layout so the kernel's rotation-group loop indexes the leading
    # (untiled) axis: (num_groups, n_pad, ROT_GROUP).
    flat3 = jnp.transpose(flat.reshape(n_pad, num_groups, ROT_GROUP), (1, 0, 2))

    kernel = functools.partial(hv_kernel, num_groups=num_groups)

    # VMEM budget: double-buffered resident outputs + flat blocks (lane-padded)
    # + live bf16 one-hots of one rotation group + f32 dot-result temps.
    est = (2 * (r_pad + 4) * tg * 4
           + 2 * num_groups * tn * 128 * 4
           + 10 * tn * tg * 2
           + 4 * tn * tg * 4)
    vmem_limit = int(min(vmem_cap, max(32 * 2**20, est)))

    gobj, grot, gscl_out = pl.pallas_call(
        kernel,
        out_shape=(jax.ShapeDtypeStruct((1, g_pad), jnp.float32),
                   jax.ShapeDtypeStruct((r_pad, g_pad), jnp.float32),
                   jax.ShapeDtypeStruct((3, g_pad), jnp.float32)),
        grid_spec=pltpu.PrefetchScalarGridSpec(
            num_scalar_prefetch=2,                  # blk_min, blk_max -> SMEM
            grid=(num_g_tiles, num_n_blocks),       # (voxel tiles, point blocks)
            in_specs=[pl.BlockSpec((num_groups, tn, ROT_GROUP),
                                   lambda j, i, bmin, bmax: (0, i, 0)),
                      pl.BlockSpec((4, tn), lambda j, i, bmin, bmax: (0, i))],
            out_specs=[pl.BlockSpec((1, tg), lambda j, i, bmin, bmax: (0, j)),
                       pl.BlockSpec((r_pad, tg), lambda j, i, bmin, bmax: (0, j)),
                       pl.BlockSpec((3, tg), lambda j, i, bmin, bmax: (0, j))]),
        compiler_params=pltpu.CompilerParams(
            dimension_semantics=("parallel", "arbitrary"),
            vmem_limit_bytes=vmem_limit),
    )(blk_min, blk_max, flat3, vals)

    grid_obj = gobj[0, :G].reshape(GX, GY, GZ)
    grid_rot = jnp.transpose(grot[:num_rots, :G]).reshape(GX, GY, GZ, num_rots)
    grid_scale = jnp.transpose(gscl_out[:, :G]).reshape(GX, GY, GZ, 3)
    return grid_obj, grid_rot, grid_scale


class HoughVoting:
    """JAX/Pallas counterpart of the torch HoughVoting module (no learned params)."""

    def __init__(self, res=0.03, num_rots=120, tn=None, tg=None, vmem_cap=None):
        self.res = float(res)
        self.num_rots = int(num_rots)
        self.tn = tn            # None -> generation-aware default
        self.tg = tg
        self.vmem_cap = vmem_cap

    def __call__(self, points, xyz, scale, obj):
        return hough_voting_forward(points, xyz, scale, obj, self.res,
                                    self.num_rots, tn=self.tn, tg=self.tg,
                                    vmem_cap=self.vmem_cap)


# ----------------------------------------------------------------------------
# Pure-JAX reference (scatter-add) for correctness checking
# ----------------------------------------------------------------------------
def hough_voting_reference(points, xyz, scale, obj, res, num_rots):
    corner, (GX, GY, GZ) = _grid_geometry(points, res)
    inv_res = float(1.0 / res)
    theta = _theta_table(num_rots, num_rots)
    cos_t = jnp.asarray(np.cos(theta).astype(np.float32).reshape(1, num_rots))
    sin_t = jnp.asarray(np.sin(theta).astype(np.float32).reshape(1, num_rots))

    p = jnp.asarray(points, jnp.float32) - jnp.asarray(corner)[None, :]
    off = jnp.asarray(xyz, jnp.float32) * jnp.asarray(scale, jnp.float32)
    ox, oy, oz = off[:, 0:1], off[:, 1:2], off[:, 2:3]
    cx = p[:, 0:1] - (ox * cos_t + oz * sin_t)
    cz = p[:, 2:3] - (oz * cos_t - ox * sin_t)
    cy = jnp.broadcast_to(p[:, 1:2] - oy, cx.shape)

    gx = jnp.round(cx * inv_res).astype(jnp.int32)
    gy = jnp.round(cy * inv_res).astype(jnp.int32)
    gz = jnp.round(cz * inv_res).astype(jnp.int32)
    valid = ((gx >= 0) & (gx < GX) & (gy >= 0) & (gy < GY) & (gz >= 0) & (gz < GZ))
    G = GX * GY * GZ
    flat = jnp.where(valid, gx * (GY * GZ) + gy * GZ + gz, G)      # invalid -> bin G

    w = jnp.broadcast_to(jnp.asarray(obj, jnp.float32)[:, None], flat.shape)
    flat_f, w_f = flat.reshape(-1), w.reshape(-1)

    grid_obj = jnp.zeros((G + 1,), jnp.float32).at[flat_f].add(w_f)[:G]
    rot_ids = jnp.broadcast_to(jnp.arange(num_rots)[None, :], flat.shape).reshape(-1)
    grid_rot = jnp.zeros((G + 1, num_rots), jnp.float32).at[flat_f, rot_ids].add(w_f)[:G]
    sv = (w[:, :, None] * jnp.asarray(scale, jnp.float32)[:, None, :]).reshape(-1, 3)
    grid_scale = jnp.zeros((G + 1, 3), jnp.float32).at[flat_f].add(sv)[:G]

    return (grid_obj.reshape(GX, GY, GZ),
            grid_rot.reshape(GX, GY, GZ, num_rots),
            grid_scale.reshape(GX, GY, GZ, 3))


# ----------------------------------------------------------------------------
# Demo
# ----------------------------------------------------------------------------
if __name__ == "__main__":
    key = jax.random.PRNGKey(0)
    k1, k2, k3, k4 = jax.random.split(key, 4)
    N = 200
    points = jax.random.uniform(k1, (N, 3), jnp.float32, 0.0, 1.0)   # world points
    xyz = jax.random.uniform(k2, (N, 3), jnp.float32, -1.0, 1.0)     # local canonical coords
    scale = jax.random.uniform(k3, (N, 3), jnp.float32, 0.05, 0.3)   # per-point scale
    obj = jax.random.uniform(k4, (N,), jnp.float32, 0.0, 1.0)        # objectness

    # Small, test-friendly settings; tg=512 exercises multi-voxel-tile culling,
    # num_rots=20 exercises padded rotations, tn=128 + N=200 exercises point
    # padding and multiple point blocks.
    hv = HoughVoting(res=0.1, num_rots=20, tn=128, tg=512)
    grid_obj, grid_rot, grid_scale = hv(points, xyz, scale, obj)
    jax.block_until_ready((grid_obj, grid_rot, grid_scale))

    # Correctness check against a pure-JAX scatter reference (tolerances account
    # for the bf16 vals cast; accumulation stays f32).
    ref_obj, ref_rot, ref_scale = hough_voting_reference(
        points, xyz, scale, obj, hv.res, hv.num_rots)
    np.testing.assert_allclose(np.asarray(grid_obj), np.asarray(ref_obj),
                               rtol=1e-2, atol=1e-3)
    np.testing.assert_allclose(np.asarray(grid_rot), np.asarray(ref_rot),
                               rtol=1e-2, atol=1e-3)
    np.testing.assert_allclose(np.asarray(grid_scale), np.asarray(ref_scale),
                               rtol=1e-2, atol=1e-3)

    print("KERNEL_OK")
</pallas_src>

<mosaic_0001>
module attributes {stable_mosaic.version = 11 : i64} {
  func.func @hv_kernel(%arg0: i32, %arg1: i32, %arg2: memref<2xi32, #tpu.memory_space<smem>>, %arg3: memref<2xi32, #tpu.memory_space<smem>>, %arg4: memref<3x128x8xi32, #tpu.memory_space<vmem>>, %arg5: memref<4x128xf32, #tpu.memory_space<vmem>>, %arg6: memref<1x512xf32, #tpu.memory_space<vmem>>, %arg7: memref<24x512xf32, #tpu.memory_space<vmem>>, %arg8: memref<3x512xf32, #tpu.memory_space<vmem>>) attributes {dimension_semantics = [#tpu.dimension_semantics<parallel>, #tpu.dimension_semantics<arbitrary>], iteration_bounds = array<i64: 2, 2>, scalar_prefetch = 2 : i64, scratch_operands = 0 : i64, tpu.core_type = #tpu.core_type<tc>, window_params = [{transform_indices = @transform_0, window_bounds = array<i64: 3, 128, 8>}, {transform_indices = @transform_1, window_bounds = array<i64: 4, 128>}, {transform_indices = @transform_2, window_bounds = array<i64: 1, 512>}, {transform_indices = @transform_3, window_bounds = array<i64: 24, 512>}, {transform_indices = @transform_4, window_bounds = array<i64: 3, 512>}]} {
    %c0_i32 = arith.constant 0 : i32
    %0 = arith.cmpi eq, %arg1, %c0_i32 : i32
    %1 = arith.extui %0 : i1 to i32
    %c0_i32_0 = arith.constant 0 : i32
    %2 = arith.cmpi ne, %1, %c0_i32_0 : i32
    scf.if %2 {
      %cst = arith.constant 0.000000e+00 : f32
      %17 = vector.broadcast %cst : f32 to vector<24x512xf32>
      %c0 = arith.constant 0 : index
      %c0_4 = arith.constant 0 : index
      %18 = vector.load %arg7[%c0, %c0_4] : memref<24x512xf32, #tpu.memory_space<vmem>>, vector<24x512xf32>
      tpu.vector_store %arg7[%c0, %c0_4], %17 {strides = array<i32>} : memref<24x512xf32, #tpu.memory_space<vmem>>, vector<24x512xf32>,
      %cst_5 = arith.constant 0.000000e+00 : f32
      %19 = vector.broadcast %cst_5 : f32 to vector<3x512xf32>
      %c0_6 = arith.constant 0 : index
      %c0_7 = arith.constant 0 : index
      %20 = vector.load %arg8[%c0_6, %c0_7] : memref<3x512xf32, #tpu.memory_space<vmem>>, vector<3x512xf32>
      tpu.vector_store %arg8[%c0_6, %c0_7], %19 {strides = array<i32>} : memref<3x512xf32, #tpu.memory_space<vmem>>, vector<3x512xf32>,
    } else {
    }
    %c512_i32 = arith.constant 512 : i32
    %3 = arith.muli %arg0, %c512_i32 : i32
    %c512_i32_1 = arith.constant 512 : i32
    %4 = arith.addi %3, %c512_i32_1 : i32
    %5 = arith.index_cast %arg1 : i32 to index
    %6 = memref.load %arg3[%5] : memref<2xi32, #tpu.memory_space<smem>>
    %7 = arith.cmpi sge, %6, %3 : i32
    %8 = arith.index_cast %arg1 : i32 to index
    %9 = memref.load %arg2[%8] : memref<2xi32, #tpu.memory_space<smem>>
    %10 = arith.cmpi slt, %9, %4 : i32
    %11 = arith.andi %7, %10 : i1
    %12 = arith.extui %11 : i1 to i32
    %c0_i32_2 = arith.constant 0 : i32
    %13 = arith.cmpi ne, %12, %c0_i32_2 : i32
    scf.if %13 {
      %17 = tpu.iota {dimensions = array<i32: 1>} : vector<1x512xi32>
      %18 = vector.broadcast %3 : i32 to vector<1x512xi32>
      %19 = arith.addi %17, %18 : vector<1x512xi32>
      %c0 = arith.constant 0 : index
      %c0_4 = arith.constant 0 : index
      %20 = vector.load %arg5[%c0, %c0_4] : memref<4x128xf32, #tpu.memory_space<vmem>>, vector<4x128xf32>
      %21 = arith.truncf %20 : vector<4x128xf32> to vector<4x128xbf16>
      %c0_i32_5 = arith.constant 0 : i32
      %c3_i32 = arith.constant 3 : i32
      %22 = arith.addi %c0_i32_5, %c3_i32 : i32
      %c1_i32_6 = arith.constant 1 : i32
      scf.for %arg9 = %c0_i32_5 to %22 step %c1_i32_6  : i32 {
        %c1_i32_8 = arith.constant 1 : i32
        %23 = arith.muli %arg9, %c1_i32_8 : i32
        %c0_i32_9 = arith.constant 0 : i32
        %24 = arith.addi %c0_i32_9, %23 : i32
        %25 = arith.index_cast %24 : i32 to index
        %c0_10 = arith.constant 0 : index
        %c0_11 = arith.constant 0 : index
        %26 = vector.load %arg4[%25, %c0_10, %c0_11] : memref<3x128x8xi32, #tpu.memory_space<vmem>>, vector<1x128x8xi32>
        %27 = vector.shape_cast %26 : vector<1x128x8xi32> to vector<128x8xi32>
        %28 = vector.shape_cast %27 : vector<128x8xi32> to vector<1x128x8xi32>
        %cst = arith.constant dense<-2147483648> : vector<1xi32>
        %29 = vector.multi_reduction <maxsi>, %28, %cst [1, 2] : vector<1x128x8xi32> to vector<1xi32>
        %30 = vector.shape_cast %29 : vector<1xi32> to vector<1x1x1xi32>
        %31 = vector.extract %30[0, 0, 0] : i32 from vector<1x1x1xi32>
        %c0_i32_12 = arith.constant 0 : i32
        %32 = vector.broadcast %c0_i32_12 : i32 to vector<128x8xi32>
        %33 = arith.cmpi sge, %27, %32 : vector<128x8xi32>
        %c2147483647_i32 = arith.constant 2147483647 : i32
        %34 = vector.broadcast %c2147483647_i32 : i32 to vector<128x8xi32>
        %35 = arith.select %33, %27, %34 : vector<128x8xi1>, vector<128x8xi32>
        %36 = vector.shape_cast %35 : vector<128x8xi32> to vector<1x128x8xi32>
        %cst_13 = arith.constant dense<2147483647> : vector<1xi32>
        %37 = vector.multi_reduction <minsi>, %36, %cst_13 [1, 2] : vector<1x128x8xi32> to vector<1xi32>
        %38 = vector.shape_cast %37 : vector<1xi32> to vector<1x1x1xi32>
        %39 = vector.extract %38[0, 0, 0] : i32 from vector<1x1x1xi32>
        %40 = arith.cmpi sge, %31, %3 : i32
        %41 = arith.cmpi slt, %39, %4 : i32
        %42 = arith.andi %40, %41 : i1
        %43 = arith.extui %42 : i1 to i32
        %c0_i32_14 = arith.constant 0 : i32
        %44 = arith.cmpi ne, %43, %c0_i32_14 : i32
        scf.if %44 {
          %cst_15 = arith.constant 0.000000e+00 : f32
          %45 = vector.broadcast %cst_15 : f32 to vector<3x512xf32>
          %46 = vector.extract_strided_slice %27 {offsets = [0, 0], sizes = [128, 1], strides = [1, 1]} : vector<128x8xi32> to vector<128x1xi32>
          %47 = vector.broadcast %46 : vector<128x1xi32> to vector<128x512xi32>
          %48 = vector.broadcast %19 : vector<1x512xi32> to vector<128x512xi32>
          %49 = arith.cmpi eq, %47, %48 : vector<128x512xi32>
          %50 = arith.extui %49 : vector<128x512xi1> to vector<128x512xi32>
          %51 = arith.sitofp %50 : vector<128x512xi32> to vector<128x512xf32>
          %52 = arith.truncf %51 : vector<128x512xf32> to vector<128x512xbf16>
          %cst_16 = arith.constant dense<0.000000e+00> : vector<4x512xf32>
          %53 = tpu.matmul %21, %52, %cst_16 {dimension_numbers = #tpu.dot_dimension_numbers<[1], [0], [0], [1], [0, 0, 1, 1], [], []>} : vector<4x128xbf16>, vector<128x512xbf16>, vector<4x512xf32> -> vector<4x512xf32>
          %54 = vector.extract_strided_slice %53 {offsets = [0, 0], sizes = [1, 512], strides = [1, 1]} : vector<4x512xf32> to vector<1x512xf32>
          %55 = vector.extract_strided_slice %53 {offsets = [1, 0], sizes = [3, 512], strides = [1, 1]} : vector<4x512xf32> to vector<3x512xf32>
          %56 = arith.addf %45, %55 : vector<3x512xf32>
          %57 = vector.extract_strided_slice %27 {offsets = [0, 1], sizes = [128, 1], strides = [1, 1]} : vector<128x8xi32> to vector<128x1xi32>
          %58 = vector.broadcast %57 : vector<128x1xi32> to vector<128x512xi32>
          %59 = vector.broadcast %19 : vector<1x512xi32> to vector<128x512xi32>
          %60 = arith.cmpi eq, %58, %59 : vector<128x512xi32>
          %61 = arith.extui %60 : vector<128x512xi1> to vector<128x512xi32>
          %62 = arith.sitofp %61 : vector<128x512xi32> to vector<128x512xf32>
          %63 = arith.truncf %62 : vector<128x512xf32> to vector<128x512xbf16>
          %cst_17 = arith.constant dense<0.000000e+00> : vector<4x512xf32>
          %64 = tpu.matmul %21, %63, %cst_17 {dimension_numbers = #tpu.dot_dimension_numbers<[1], [0], [0], [1], [0, 0, 1, 1], [], []>} : vector<4x128xbf16>, vector<128x512xbf16>, vector<4x512xf32> -> vector<4x512xf32>
          %65 = vector.extract_strided_slice %64 {offsets = [0, 0], sizes = [1, 512], strides = [1, 1]} : vector<4x512xf32> to vector<1x512xf32>
          %66 = vector.extract_strided_slice %64 {offsets = [1, 0], sizes = [3, 512], strides = [1, 1]} : vector<4x512xf32> to vector<3x512xf32>
          %67 = arith.addf %56, %66 : vector<3x512xf32>
          %68 = vector.extract_strided_slice %27 {offsets = [0, 2], sizes = [128, 1], strides = [1, 1]} : vector<128x8xi32> to vector<128x1xi32>
          %69 = vector.broadcast %68 : vector<128x1xi32> to vector<128x512xi32>
          %70 = vector.broadcast %19 : vector<1x512xi32> to vector<128x512xi32>
          %71 = arith.cmpi eq, %69, %70 : vector<128x512xi32>
          %72 = arith.extui %71 : vector<128x512xi1> to vector<128x512xi32>
          %73 = arith.sitofp %72 : vector<128x512xi32> to vector<128x512xf32>
          %74 = arith.truncf %73 : vector<128x512xf32> to vector<128x512xbf16>
          %cst_18 = arith.constant dense<0.000000e+00> : vector<4x512xf32>
          %75 = tpu.matmul %21, %74, %cst_18 {dimension_numbers = #tpu.dot_dimension_numbers<[1], [0], [0], [1], [0, 0, 1, 1], [], []>} : vector<4x128xbf16>, vector<128x512xbf16>, vector<4x512xf32> -> vector<4x512xf32>
          %76 = vector.extract_strided_slice %75 {offsets = [0, 0], sizes = [1, 512], strides = [1, 1]} : vector<4x512xf32> to vector<1x512xf32>
          %77 = vector.extract_strided_slice %75 {offsets = [1, 0], sizes = [3, 512], strides = [1, 1]} : vector<4x512xf32> to vector<3x512xf32>
          %78 = arith.addf %67, %77 : vector<3x512xf32>
          %79 = vector.extract_strided_slice %27 {offsets = [0, 3], sizes = [128, 1], strides = [1, 1]} : vector<128x8xi32> to vector<128x1xi32>
          %80 = vector.broadcast %79 : vector<128x1xi32> to vector<128x512xi32>
          %81 = vector.broadcast %19 : vector<1x512xi32> to vector<128x512xi32>
          %82 = arith.cmpi eq, %80, %81 : vector<128x512xi32>
          %83 = arith.extui %82 : vector<128x512xi1> to vector<128x512xi32>
          %84 = arith.sitofp %83 : vector<128x512xi32> to vector<128x512xf32>
          %85 = arith.truncf %84 : vector<128x512xf32> to vector<128x512xbf16>
          %cst_19 = arith.constant dense<0.000000e+00> : vector<4x512xf32>
          %86 = tpu.matmul %21, %85, %cst_19 {dimension_numbers = #tpu.dot_dimension_numbers<[1], [0], [0], [1], [0, 0, 1, 1], [], []>} : vector<4x128xbf16>, vector<128x512xbf16>, vector<4x512xf32> -> vector<4x512xf32>
          %87 = vector.extract_strided_slice %86 {offsets = [0, 0], sizes = [1, 512], strides = [1, 1]} : vector<4x512xf32> to vector<1x512xf32>
          %88 = vector.extract_strided_slice %86 {offsets = [1, 0], sizes = [3, 512], strides = [1, 1]} : vector<4x512xf32> to vector<3x512xf32>
          %89 = arith.addf %78, %88 : vector<3x512xf32>
          %90 = vector.extract_strided_slice %27 {offsets = [0, 4], sizes = [128, 1], strides = [1, 1]} : vector<128x8xi32> to vector<128x1xi32>
          %91 = vector.broadcast %90 : vector<128x1xi32> to vector<128x512xi32>
          %92 = vector.broadcast %19 : vector<1x512xi32> to vector<128x512xi32>
          %93 = arith.cmpi eq, %91, %92 : vector<128x512xi32>
          %94 = arith.extui %93 : vector<128x512xi1> to vector<128x512xi32>
          %95 = arith.sitofp %94 : vector<128x512xi32> to vector<128x512xf32>
          %96 = arith.truncf %95 : vector<128x512xf32> to vector<128x512xbf16>
          %cst_20 = arith.constant dense<0.000000e+00> : vector<4x512xf32>
          %97 = tpu.matmul %21, %96, %cst_20 {dimension_numbers = #tpu.dot_dimension_numbers<[1], [0], [0], [1], [0, 0, 1, 1], [], []>} : vector<4x128xbf16>, vector<128x512xbf16>, vector<4x512xf32> -> vector<4x512xf32>
          %98 = vector.extract_strided_slice %97 {offsets = [0, 0], sizes = [1, 512], strides = [1, 1]} : vector<4x512xf32> to vector<1x512xf32>
          %99 = vector.extract_strided_slice %97 {offsets = [1, 0], sizes = [3, 512], strides = [1, 1]} : vector<4x512xf32> to vector<3x512xf32>
          %100 = arith.addf %89, %99 : vector<3x512xf32>
          %101 = vector.extract_strided_slice %27 {offsets = [0, 5], sizes = [128, 1], strides = [1, 1]} : vector<128x8xi32> to vector<128x1xi32>
          %102 = vector.broadcast %101 : vector<128x1xi32> to vector<128x512xi32>
          %103 = vector.broadcast %19 : vector<1x512xi32> to vector<128x512xi32>
          %104 = arith.cmpi eq, %102, %103 : vector<128x512xi32>
          %105 = arith.extui %104 : vector<128x512xi1> to vector<128x512xi32>
          %106 = arith.sitofp %105 : vector<128x512xi32> to vector<128x512xf32>
          %107 = arith.truncf %106 : vector<128x512xf32> to vector<128x512xbf16>
          %cst_21 = arith.constant dense<0.000000e+00> : vector<4x512xf32>
          %108 = tpu.matmul %21, %107, %cst_21 {dimension_numbers = #tpu.dot_dimension_numbers<[1], [0], [0], [1], [0, 0, 1, 1], [], []>} : vector<4x128xbf16>, vector<128x512xbf16>, vector<4x512xf32> -> vector<4x512xf32>
          %109 = vector.extract_strided_slice %108 {offsets = [0, 0], sizes = [1, 512], strides = [1, 1]} : vector<4x512xf32> to vector<1x512xf32>
          %110 = vector.extract_strided_slice %108 {offsets = [1, 0], sizes = [3, 512], strides = [1, 1]} : vector<4x512xf32> to vector<3x512xf32>
          %111 = arith.addf %100, %110 : vector<3x512xf32>
          %112 = vector.extract_strided_slice %27 {offsets = [0, 6], sizes = [128, 1], strides = [1, 1]} : vector<128x8xi32> to vector<128x1xi32>
          %113 = vector.broadcast %112 : vector<128x1xi32> to vector<128x512xi32>
          %114 = vector.broadcast %19 : vector<1x512xi32> to vector<128x512xi32>
          %115 = arith.cmpi eq, %113, %114 : vector<128x512xi32>
          %116 = arith.extui %115 : vector<128x512xi1> to vector<128x512xi32>
          %117 = arith.sitofp %116 : vector<128x512xi32> to vector<128x512xf32>
          %118 = arith.truncf %117 : vector<128x512xf32> to vector<128x512xbf16>
          %cst_22 = arith.constant dense<0.000000e+00> : vector<4x512xf32>
          %119 = tpu.matmul %21, %118, %cst_22 {dimension_numbers = #tpu.dot_dimension_numbers<[1], [0], [0], [1], [0, 0, 1, 1], [], []>} : vector<4x128xbf16>, vector<128x512xbf16>, vector<4x512xf32> -> vector<4x512xf32>
          %120 = vector.extract_strided_slice %119 {offsets = [0, 0], sizes = [1, 512], strides = [1, 1]} : vector<4x512xf32> to vector<1x512xf32>
          %121 = vector.extract_strided_slice %119 {offsets = [1, 0], sizes = [3, 512], strides = [1, 1]} : vector<4x512xf32> to vector<3x512xf32>
          %122 = arith.addf %111, %121 : vector<3x512xf32>
          %123 = vector.extract_strided_slice %27 {offsets = [0, 7], sizes = [128, 1], strides = [1, 1]} : vector<128x8xi32> to vector<128x1xi32>
          %124 = vector.broadcast %123 : vector<128x1xi32> to vector<128x512xi32>
          %125 = vector.broadcast %19 : vector<1x512xi32> to vector<128x512xi32>
          %126 = arith.cmpi eq, %124, %125 : vector<128x512xi32>
          %127 = arith.extui %126 : vector<128x512xi1> to vector<128x512xi32>
          %128 = arith.sitofp %127 : vector<128x512xi32> to vector<128x512xf32>
          %129 = arith.truncf %128 : vector<128x512xf32> to vector<128x512xbf16>
          %cst_23 = arith.constant dense<0.000000e+00> : vector<4x512xf32>
          %130 = tpu.matmul %21, %129, %cst_23 {dimension_numbers = #tpu.dot_dimension_numbers<[1], [0], [0], [1], [0, 0, 1, 1], [], []>} : vector<4x128xbf16>, vector<128x512xbf16>, vector<4x512xf32> -> vector<4x512xf32>
          %131 = vector.extract_strided_slice %130 {offsets = [0, 0], sizes = [1, 512], strides = [1, 1]} : vector<4x512xf32> to vector<1x512xf32>
          %132 = vector.extract_strided_slice %130 {offsets = [1, 0], sizes = [3, 512], strides = [1, 1]} : vector<4x512xf32> to vector<3x512xf32>
          %133 = arith.addf %122, %132 : vector<3x512xf32>
          %c8_i32 = arith.constant 8 : i32
          %134 = arith.muli %24, %c8_i32 : i32
          %135 = tpu.assume_multiple %134, 8 : i32
          %136 = arith.index_cast %135 : i32 to index
          %c0_24 = arith.constant 0 : index
          %137 = vector.load %arg7[%136, %c0_24] : memref<24x512xf32, #tpu.memory_space<vmem>>, vector<8x512xf32>
          %138 = tpu.concatenate %54, %65, %76, %87, %98, %109, %120, %131 in 0 : vector<1x512xf32>, vector<1x512xf32>, vector<1x512xf32>, vector<1x512xf32>, vector<1x512xf32>, vector<1x512xf32>, vector<1x512xf32>, vector<1x512xf32> -> vector<8x512xf32>
          %139 = arith.addf %137, %138 : vector<8x512xf32>
          %140 = arith.index_cast %135 : i32 to index
          %c0_25 = arith.constant 0 : index
          %141 = vector.load %arg7[%140, %c0_25] : memref<24x512xf32, #tpu.memory_space<vmem>>, vector<8x512xf32>
          tpu.vector_store %arg7[%140, %c0_25], %139 {strides = array<i32>} : memref<24x512xf32, #tpu.memory_space<vmem>>, vector<8x512xf32>,
          %c0_26 = arith.constant 0 : index
          %c0_27 = arith.constant 0 : index
          %142 = vector.load %arg8[%c0_26, %c0_27] : memref<3x512xf32, #tpu.memory_space<vmem>>, vector<3x512xf32>
          %143 = arith.addf %142, %133 : vector<3x512xf32>
          %c0_28 = arith.constant 0 : index
          %c0_29 = arith.constant 0 : index
          %144 = vector.load %arg8[%c0_28, %c0_29] : memref<3x512xf32, #tpu.memory_space<vmem>>, vector<3x512xf32>
          tpu.vector_store %arg8[%c0_28, %c0_29], %143 {strides = array<i32>} : memref<3x512xf32, #tpu.memory_space<vmem>>, vector<3x512xf32>,
        } else {
        }
      }
      %c3_i32_7 = arith.constant 3 : i32
    } else {
    }
    %c1_i32 = arith.constant 1 : i32
    %14 = arith.cmpi eq, %arg1, %c1_i32 : i32
    %15 = arith.extui %14 : i1 to i32
    %c0_i32_3 = arith.constant 0 : i32
    %16 = arith.cmpi ne, %15, %c0_i32_3 : i32
    scf.if %16 {
      %c0 = arith.constant 0 : index
      %c0_4 = arith.constant 0 : index
      %17 = vector.load %arg7[%c0, %c0_4] : memref<24x512xf32, #tpu.memory_space<vmem>>, vector<24x512xf32>
      %cst = arith.constant dense<0.000000e+00> : vector<512xf32>
      %18 = vector.multi_reduction <add>, %17, %cst [0] : vector<24x512xf32> to vector<512xf32>
      %19 = vector.shape_cast %18 : vector<512xf32> to vector<1x512xf32>
      %c0_5 = arith.constant 0 : index
      %c0_6 = arith.constant 0 : index
      %20 = vector.load %arg6[%c0_5, %c0_6] : memref<1x512xf32, #tpu.memory_space<vmem>>, vector<1x512xf32>
      tpu.vector_store %arg6[%c0_5, %c0_6], %19 {strides = array<i32>} : memref<1x512xf32, #tpu.memory_space<vmem>>, vector<1x512xf32>,
    } else {
    }
    return
  }
  func.func @transform_0(%arg0: i32, %arg1: i32, %arg2: memref<2xi32, #tpu.memory_space<smem>>, %arg3: memref<2xi32, #tpu.memory_space<smem>>) -> (i32, i32, i32) {
    %c0_i32 = arith.constant 0 : i32
    %c0_i32_0 = arith.constant 0 : i32
    %c0_i32_1 = arith.constant 0 : i32
    return %c0_i32, %arg1, %c0_i32_0 : i32, i32, i32
  }
  func.func @transform_1(%arg0: i32, %arg1: i32, %arg2: memref<2xi32, #tpu.memory_space<smem>>, %arg3: memref<2xi32, #tpu.memory_space<smem>>) -> (i32, i32) {
    %c0_i32 = arith.constant 0 : i32
    %c0_i32_0 = arith.constant 0 : i32
    return %c0_i32, %arg1 : i32, i32
  }
  func.func @transform_2(%arg0: i32, %arg1: i32, %arg2: memref<2xi32, #tpu.memory_space<smem>>, %arg3: memref<2xi32, #tpu.memory_space<smem>>) -> (i32, i32) {
    %c0_i32 = arith.constant 0 : i32
    %c0_i32_0 = arith.constant 0 : i32
    return %c0_i32, %arg0 : i32, i32
  }
  func.func @transform_3(%arg0: i32, %arg1: i32, %arg2: memref<2xi32, #tpu.memory_space<smem>>, %arg3: memref<2xi32, #tpu.memory_space<smem>>) -> (i32, i32) {
    %c0_i32 = arith.constant 0 : i32
    %c0_i32_0 = arith.constant 0 : i32
    return %c0_i32, %arg0 : i32, i32
  }
  func.func @transform_4(%arg0: i32, %arg1: i32, %arg2: memref<2xi32, #tpu.memory_space<smem>>, %arg3: memref<2xi32, #tpu.memory_space<smem>>) -> (i32, i32) {
    %c0_i32 = arith.constant 0 : i32
    %c0_i32_0 = arith.constant 0 : i32
    return %c0_i32, %arg0 : i32, i32
  }
}

</mosaic_0001>

<bundles_post_ra>
// kernel: tpu_custom_call.1
= control target key start
LH: loop header
LB: loop body
LE: loop exit
PB: predicated region body
PF: predicated region fallthrough
CT: control target
= control target key end

     0   :  { %s5215_s27 = smov [#allocation3]   ;;  %s5216_s28 = smov [#allocation4]   ;;  %s7987_s0 = inlined_call_operand.vmem [shape: s32[2], index: 0, kind: input, shape index: {}]   ;;  %s7988_s2 = inlined_call_operand.vmem [shape: s32[3,256,8], index: 2, kind: input, shape index: {}]   ;;  %s7989_s3 = inlined_call_operand.vmem [shape: f32[4,256], index: 3, kind: input, shape index: {}]   ;;  %s7990_s4 = inlined_call_operand.hbm [shape: f32[1,1024], index: 4, kind: output, shape index: {0}]   ;;  %s7991_s5 = inlined_call_operand.hbm [shape: f32[24,1024], index: 5, kind: output, shape index: {1}]   ;;  %s7992_s6 = inlined_call_operand.hbm [shape: f32[3,1024], index: 6, kind: output, shape index: {2}]   ;;  %s7993_s1 = inlined_call_operand.vmem [shape: s32[2], index: 1, kind: input, shape index: {}]  }
   0x1   :  { %8003 = sst [smem:[#allocation22_spill]] %s7988_s2  ;;  %s13_s23 = sshll.u32 %s7987_s0, 4  ;;  %s14_s23 = int_to_ptr.vmem [resolvable:$true] %s13_s23 }
   0x2   :  { %8004 = sst [smem:[#allocation23_spill]] %s7989_s3  ;;  %s18_s26 = sshll.u32 %s7993_s1, 4  ;;  %s19_s26 = int_to_ptr.vmem [resolvable:$true] %s18_s26 }
   0x3   :  { %8005 = sst [smem:[#allocation24_spill]] %s7991_s5 }
   0x4   :  { %16 = dma.vmem_to_smem %s14_s23, 16, %s5215_s27, [#allocation2] }
   0x5   :  { %21 = dma.vmem_to_smem %s19_s26, 16, %s5216_s28, [#allocation2] }
   0x6   :  { %5161 = dma.done.wait [#allocation2], 32 }
   0x7   :  { %5162 = vsyncadd [#allocation2], 4294967264 }
   0x8   :  { %24 = sfence }
   0x9   :  { %25 = vsyncpa [#allocation7], 0 }
   0xa   :  { %27 = vsyncpa [#allocation7 + $0x1], 0 }
   0xb   :  { %28 = vsyncpa [#allocation9], 0 }
   0xc   :  { %30 = vsyncpa [#allocation9 + $0x1], 0  ;;  %s5271_s29 = smov 0   ;;  %s5273_s0 = smov 0  }
   0xd   :  { %s5275_s30 = smov 0   ;;  %s5277_s1 = smov 0  }
   0xe   :  { %s5279_s7 = smov 0   ;;  %s5281_s8 = smov 0  }
   0xf   :  { %s5283_s9 = smov 0   ;;  %s5285_s10 = smov 0  }
  0x10   :  { %s5287_s11 = smov 0   ;;  %s5289_s12 = smov 0  }
  0x11 LB: > { %8006 = sst [smem:[#allocation14_spill]] %s5181_s30  ;;  %s7995_s13 = sadd.s32 4294967295, %s5209_s12   ;;  %s5209_s12 = sphi %s5289_s12, %s36_s12   ;;  %s5205_s11 = sphi %s5287_s11, %s8148_s11   ;;  %s5201_s10 = sphi %s5285_s10, %s8147_s10   ;;  %s5197_s9 = sphi %s5283_s9, %s8146_s9   ;;  %s5193_s8 = sphi %s5281_s8, %s8145_s8   ;;  %s5189_s7 = sphi %s5279_s7, %s8144_s7   ;;  %s5185_s1 = sphi %s5277_s1, %s8143_s1   ;;  %s5181_s30 = sphi %s5275_s30, %s8142_s30   ;;  %s5177_s0 = sphi %s5273_s0, %s8150_s0   ;;  %s5173_s29 = sphi %s5271_s29, %s8149_s29  }
  0x12   : > { %8007 = sst [smem:[#allocation15_spill]] %s5189_s7  ;;  %s7994_s14 = sadd.s32 4294967294, %s5209_s12  }
  0x13   : > { %8008 = sst [smem:[#allocation16_spill]] %s5201_s10  ;;  %s45_s15 = sadd.s32 1, %s5201_s10 }
  0x14   : > { %8009 = sst [smem:[#allocation17_spill]] %s5205_s11  ;;  %s48_s16 = sadd.s32 1, %s5205_s11 }
  0x15   : > { %p46_p0 = scmp.ge.s32.totalorder %s45_s15, 2  ;;  %s55_s17 = sadd.s32 1, %s5189_s7 }
  0x16   : > { %p62_p1 = scmp.ne.s32.totalorder %s5189_s7, %s5185_s1  ;;  %p63_p2 = scmp.eq.s32.totalorder %s5209_s12, 0 }
  0x17   : > { %s8152_s15 = smov (%p46_p0, %s45_s15), 0  ;;  %s8154_s16 = smov (!%p46_p0, %s48_s16), %s5205_s11 }
  0x18   : > { %8010 = sst [smem:[#allocation18_spill]] %s8152_s15  ;;  %s52_s18 = ssub.s32 %s5201_s10, %s8152_s15 }
  0x19   : > { %p5334_p3 = por %p63_p2, %p62_p1  ;;  %p50_p4 = scmp.ge.s32.totalorder %s8154_s16, 2 }
  0x1a   : > { %p53_p5 = scmp.eq.s32.totalorder %s52_s18, 0  ;;  %s107_s20 = sadd.s32 1, %s5181_s30 }
  0x1b   : > { %p117_p6 = scmp.ne.s32.totalorder %s5181_s30, %s5177_s0  ;;  %s8156_s16 = smov (%p50_p4, %s8154_s16), 0 }
  0x1c   : > { %8012 = sst [smem:[#allocation19_spill]] %s8156_s16  ;;  %s104_s22 = ssub.s32 %s5205_s11, %s8156_s16 }
  0x1d   : > { %s5344_s21 = scalar_select %p53_p5, %s5189_s7, %s55_s17  }
  0x1e   : > { %p118_p7 = scmp.eq.s32.totalorder %s7995_s13, 3  ;;  %p105_p8 = scmp.eq.s32.totalorder %s104_s22, 0 }
  0x1f   : > { %8013 = sst [smem:[#allocation20_spill]] %s5344_s21  ;;  %p123_p9 = scmp.ne.s32.totalorder %s5177_s0, %s5173_s29 }
  0x20   : > { %p5352_p10 = por %p118_p7, %p117_p6  ;;  %p124_p11 = scmp.eq.s32.totalorder %s7994_s14, 3 }
  0x21   : > { %s5359_s24 = scalar_select %p105_p8, %s5181_s30, %s107_s20  }
  0x22   : > { %p5361_p12 = por %p124_p11, %p123_p9  ;;  %p3798_p13 = scmp.ge.s32.totalorder %s5209_s12, 4 }
  0x23   : > { %8015 = sst [smem:[#allocation21_spill]] %s5359_s24 }
  0x24   : > { %192 = sbr.rel (%p3798_p13) target bundleno = 99 (0x63), region = 16 }
  0x29   : > { %195 = sbr.rel (!%p5334_p3) target bundleno = 99 (0x63), region = 20  ;;  %s197_s26 = sand.u32 (%p5334_p3), 1, %s5189_s7  }
  0x2a   : > { %s4847_s27 = sshll.u32 (%p5334_p3), %s5201_s10, 7  ;;  %s4851_s28 = smul.u32 (%p5334_p3), 384, %s197_s26 }
  0x2b   : > { %s8017_s2 = sld [smem:[#allocation22_spill]] (%p5334_p3) }
  0x2c   : > { %s5378_s19 = scalar_lea.vmem (%p5334_p3), [#allocation5], %s4851_s28 }
  0x31   : > { %s5373_s20 = scalar_lea.vmem %s8017_s2, %s4847_s27 }
  0x32   : > { %v325_v0 = vld [vmem:[%s5373_s20] sm:$0xff]  ;;  %v327_v1 = vld [vmem:[%s5373_s20 + $0x8] sm:$0xff]  ;;  %v329_v2 = vld [vmem:[%s5373_s20 + $0x10] sm:$0xff] }
  0x33   : > { %326 = vst [vmem:[%s5378_s19] sm:$0xff] %v325_v0  ;;  %v331_v3 = vld [vmem:[%s5373_s20 + $0x18] sm:$0xff]  ;;  %v333_v4 = vld [vmem:[%s5373_s20 + $0x20] sm:$0xff]  ;;  %v335_v5 = vld [vmem:[%s5373_s20 + $0x28] sm:$0xff] }
  0x34   : > { %328 = vst [vmem:[%s5378_s19 + $0x8] sm:$0xff] %v327_v1  ;;  %v337_v6 = vld [vmem:[%s5373_s20 + $0x30] sm:$0xff]  ;;  %v339_v7 = vld [vmem:[%s5373_s20 + $0x38] sm:$0xff]  ;;  %v341_v8 = vld [vmem:[%s5373_s20 + $0x40] sm:$0xff] }
  0x35   : > { %330 = vst [vmem:[%s5378_s19 + $0x10] sm:$0xff] %v329_v2  ;;  %v343_v9 = vld [vmem:[%s5373_s20 + $0x48] sm:$0xff]  ;;  %v345_v10 = vld [vmem:[%s5373_s20 + $0x50] sm:$0xff]  ;;  %v347_v11 = vld [vmem:[%s5373_s20 + $0x58] sm:$0xff] }
  0x36   : > { %332 = vst [vmem:[%s5378_s19 + $0x18] sm:$0xff] %v331_v3  ;;  %v349_v12 = vld [vmem:[%s5373_s20 + $0x60] sm:$0xff]  ;;  %v351_v13 = vld [vmem:[%s5373_s20 + $0x68] sm:$0xff]  ;;  %v353_v14 = vld [vmem:[%s5373_s20 + $0x70] sm:$0xff] }
  0x37   : > { %334 = vst [vmem:[%s5378_s19 + $0x20] sm:$0xff] %v333_v4  ;;  %v355_v15 = vld [vmem:[%s5373_s20 + $0x78] sm:$0xff]  ;;  %v357_v16 = vld [vmem:[%s5373_s20 + $0x100] sm:$0xff]  ;;  %v359_v17 = vld [vmem:[%s5373_s20 + $0x108] sm:$0xff] }
  0x38   : > { %336 = vst [vmem:[%s5378_s19 + $0x28] sm:$0xff] %v335_v5  ;;  %v361_v18 = vld [vmem:[%s5373_s20 + $0x110] sm:$0xff]  ;;  %v363_v19 = vld [vmem:[%s5373_s20 + $0x118] sm:$0xff]  ;;  %v365_v20 = vld [vmem:[%s5373_s20 + $0x120] sm:$0xff] }
  0x39   : > { %338 = vst [vmem:[%s5378_s19 + $0x30] sm:$0xff] %v337_v6  ;;  %v367_v21 = vld [vmem:[%s5373_s20 + $0x128] sm:$0xff]  ;;  %v369_v22 = vld [vmem:[%s5373_s20 + $0x130] sm:$0xff]  ;;  %v371_v23 = vld [vmem:[%s5373_s20 + $0x138] sm:$0xff] }
  0x3a   : > { %340 = vst [vmem:[%s5378_s19 + $0x38] sm:$0xff] %v339_v7  ;;  %v373_v24 = vld [vmem:[%s5373_s20 + $0x140] sm:$0xff]  ;;  %v375_v25 = vld [vmem:[%s5373_s20 + $0x148] sm:$0xff]  ;;  %v377_v26 = vld [vmem:[%s5373_s20 + $0x150] sm:$0xff] }
  0x3b   : > { %342 = vst [vmem:[%s5378_s19 + $0x40] sm:$0xff] %v341_v8  ;;  %v379_v27 = vld [vmem:[%s5373_s20 + $0x158] sm:$0xff]  ;;  %v381_v28 = vld [vmem:[%s5373_s20 + $0x160] sm:$0xff]  ;;  %v383_v29 = vld [vmem:[%s5373_s20 + $0x168] sm:$0xff] }
  0x3c   : > { %344 = vst [vmem:[%s5378_s19 + $0x48] sm:$0xff] %v343_v9  ;;  %v385_v30 = vld [vmem:[%s5373_s20 + $0x170] sm:$0xff]  ;;  %v387_v31 = vld [vmem:[%s5373_s20 + $0x178] sm:$0xff]  ;;  %v389_v32 = vld [vmem:[%s5373_s20 + $0x200] sm:$0xff] }
  0x3d   : > { %346 = vst [vmem:[%s5378_s19 + $0x50] sm:$0xff] %v345_v10  ;;  %v391_v33 = vld [vmem:[%s5373_s20 + $0x208] sm:$0xff]  ;;  %v393_v34 = vld [vmem:[%s5373_s20 + $0x210] sm:$0xff]  ;;  %v395_v35 = vld [vmem:[%s5373_s20 + $0x218] sm:$0xff] }
  0x3e   : > { %348 = vst [vmem:[%s5378_s19 + $0x58] sm:$0xff] %v347_v11  ;;  %v397_v36 = vld [vmem:[%s5373_s20 + $0x220] sm:$0xff]  ;;  %v399_v37 = vld [vmem:[%s5373_s20 + $0x228] sm:$0xff]  ;;  %v401_v38 = vld [vmem:[%s5373_s20 + $0x230] sm:$0xff] }
  0x3f   : > { %350 = vst [vmem:[%s5378_s19 + $0x60] sm:$0xff] %v349_v12  ;;  %v403_v39 = vld [vmem:[%s5373_s20 + $0x238] sm:$0xff]  ;;  %v405_v40 = vld [vmem:[%s5373_s20 + $0x240] sm:$0xff]  ;;  %v407_v41 = vld [vmem:[%s5373_s20 + $0x248] sm:$0xff] }
  0x40   : > { %352 = vst [vmem:[%s5378_s19 + $0x68] sm:$0xff] %v351_v13  ;;  %v409_v42 = vld [vmem:[%s5373_s20 + $0x250] sm:$0xff]  ;;  %v411_v43 = vld [vmem:[%s5373_s20 + $0x258] sm:$0xff]  ;;  %v413_v44 = vld [vmem:[%s5373_s20 + $0x260] sm:$0xff] }
  0x41   : > { %354 = vst [vmem:[%s5378_s19 + $0x70] sm:$0xff] %v353_v14  ;;  %v415_v45 = vld [vmem:[%s5373_s20 + $0x268] sm:$0xff]  ;;  %v417_v46 = vld [vmem:[%s5373_s20 + $0x270] sm:$0xff]  ;;  %v419_v47 = vld [vmem:[%s5373_s20 + $0x278] sm:$0xff] }
  0x42   : > { %356 = vst [vmem:[%s5378_s19 + $0x78] sm:$0xff] %v355_v15 }
  0x43   : > { %358 = vst [vmem:[%s5378_s19 + $0x80] sm:$0xff] %v357_v16 }
  0x44   : > { %360 = vst [vmem:[%s5378_s19 + $0x88] sm:$0xff] %v359_v17 }
  0x45   : > { %362 = vst [vmem:[%s5378_s19 + $0x90] sm:$0xff] %v361_v18 }
  0x46   : > { %364 = vst [vmem:[%s5378_s19 + $0x98] sm:$0xff] %v363_v19 }
  0x47   : > { %366 = vst [vmem:[%s5378_s19 + $0xa0] sm:$0xff] %v365_v20 }
  0x48   : > { %368 = vst [vmem:[%s5378_s19 + $0xa8] sm:$0xff] %v367_v21 }
  0x49   : > { %370 = vst [vmem:[%s5378_s19 + $0xb0] sm:$0xff] %v369_v22 }
  0x4a   : > { %372 = vst [vmem:[%s5378_s19 + $0xb8] sm:$0xff] %v371_v23 }
  0x4b   : > { %374 = vst [vmem:[%s5378_s19 + $0xc0] sm:$0xff] %v373_v24 }
  0x4c   : > { %376 = vst [vmem:[%s5378_s19 + $0xc8] sm:$0xff] %v375_v25 }
  0x4d   : > { %378 = vst [vmem:[%s5378_s19 + $0xd0] sm:$0xff] %v377_v26 }
  0x4e   : > { %380 = vst [vmem:[%s5378_s19 + $0xd8] sm:$0xff] %v379_v27 }
  0x4f   : > { %382 = vst [vmem:[%s5378_s19 + $0xe0] sm:$0xff] %v381_v28 }
  0x50   : > { %384 = vst [vmem:[%s5378_s19 + $0xe8] sm:$0xff] %v383_v29 }
  0x51   : > { %386 = vst [vmem:[%s5378_s19 + $0xf0] sm:$0xff] %v385_v30 }
  0x52   : > { %388 = vst [vmem:[%s5378_s19 + $0xf8] sm:$0xff] %v387_v31 }
  0x53   : > { %390 = vst [vmem:[%s5378_s19 + $0x100] sm:$0xff] %v389_v32 }
  0x54   : > { %392 = vst [vmem:[%s5378_s19 + $0x108] sm:$0xff] %v391_v33 }
  0x55   : > { %394 = vst [vmem:[%s5378_s19 + $0x110] sm:$0xff] %v393_v34 }
  0x56   : > { %396 = vst [vmem:[%s5378_s19 + $0x118] sm:$0xff] %v395_v35 }
  0x57   : > { %398 = vst [vmem:[%s5378_s19 + $0x120] sm:$0xff] %v397_v36 }
  0x58   : > { %400 = vst [vmem:[%s5378_s19 + $0x128] sm:$0xff] %v399_v37 }
  0x59   : > { %402 = vst [vmem:[%s5378_s19 + $0x130] sm:$0xff] %v401_v38 }
  0x5a   : > { %404 = vst [vmem:[%s5378_s19 + $0x138] sm:$0xff] %v403_v39 }
  0x5b   : > { %406 = vst [vmem:[%s5378_s19 + $0x140] sm:$0xff] %v405_v40 }
  0x5c   : > { %408 = vst [vmem:[%s5378_s19 + $0x148] sm:$0xff] %v407_v41 }
  0x5d   : > { %410 = vst [vmem:[%s5378_s19 + $0x150] sm:$0xff] %v409_v42 }
  0x5e   : > { %412 = vst [vmem:[%s5378_s19 + $0x158] sm:$0xff] %v411_v43 }
  0x5f   : > { %414 = vst [vmem:[%s5378_s19 + $0x160] sm:$0xff] %v413_v44 }
  0x60   : > { %416 = vst [vmem:[%s5378_s19 + $0x168] sm:$0xff] %v415_v45 }
  0x61   : > { %418 = vst [vmem:[%s5378_s19 + $0x170] sm:$0xff] %v417_v46 }
  0x62   : > { %420 = vst [vmem:[%s5378_s19 + $0x178] sm:$0xff] %v419_v47 }
  0x63 PF: > { %p3801_p0 = scmp.ge.s32.totalorder %s5209_s12, 1  ;;  %p432_p1 = scmp.lt.s32.totalorder %s5209_s12, 5 }
  0x65   : > { %p433_p2 = pnand %p3801_p0, %p432_p1 }
  0x66   : > { %s439_s22 = sand.u32 (!%p433_p2), 1, %s5185_s1   ;;  %s5477_s26 = sand.u32 (!%p433_p2), 1, %s5177_s0  }
  0x67   : > { %436 = sbr.rel (%p433_p2) target bundleno = 1243 (0x4db), region = 62  ;;  %s3802_s28 = sshll.u32 (!%p433_p2), %s5477_s26, 2 }
  0x68   : > { %s5479_s27 = smul.u32 (!%p433_p2), 384, %s439_s22  ;;  %s3803_s18 = sshll.u32 (!%p433_p2), %s5477_s26, 4 }
  0x69   : > { %s4853_s17 = smul.u32 (!%p433_p2), 96, %s5477_s26  ;;  %p479_p3 = scmp.lt.s32.totalorder (!%p433_p2), %s5193_s8, 1 }
  0x6a   : > { %s8018_s3 = sld [smem:[#allocation23_spill]] (!%p433_p2)  ;;  %s441_s1 = scalar_lea.vmem (!%p433_p2), [#allocation5], %s5479_s27 }
  0x6b   : > { %s5492_s16 = scalar_lea.vmem (!%p433_p2), [#allocation6], %s3802_s28  ;;  %s5494_s15 = scalar_lea.vmem (!%p433_p2), [#allocation8], %s4853_s17 }
  0x6c   : > { %s480_s20 = scalar_select %p479_p3, %s5193_s8, 1 }
  0x6d   : > { %s5496_s11 = scalar_lea.vmem [#allocation10], %s3803_s18  ;;  %p3805_p4 = scmp.ne.s32.totalorder %s5193_s8, 0 }
  0x6e   : > { %s3804_s19 = sshll.u32 %s480_s20, 2 }
  0x6f   : > { %489 = sbr.rel (%p3805_p4) target bundleno = 131 (0x83), region = 70 }
  0x70   : > { %s5489_s2 = scalar_lea.vmem %s8018_s3, %s3804_s19 }
  0x74   : > { %v5217_v48 = vmov 0.0  }
  0x75   : > { %490 = vst [vmem:[%s5494_s15] sm:$0xff] %v5217_v48 }
  0x76   : > { %491 = vst [vmem:[%s5494_s15 + $0x8] sm:$0xff] %v5217_v48 }
  0x77   : > { %492 = vst [vmem:[%s5494_s15 + $0x10] sm:$0xff] %v5217_v48 }
  0x78   : > { %493 = vst [vmem:[%s5494_s15 + $0x18] sm:$0xff] %v5217_v48 }
  0x79   : > { %494 = vst [vmem:[%s5494_s15 + $0x20] sm:$0xff] %v5217_v48 }
  0x7a   : > { %495 = vst [vmem:[%s5494_s15 + $0x28] sm:$0xff] %v5217_v48 }
  0x7b   : > { %496 = vst [vmem:[%s5494_s15 + $0x30] sm:$0xff] %v5217_v48 }
  0x7c   : > { %497 = vst [vmem:[%s5494_s15 + $0x38] sm:$0xff] %v5217_v48 }
  0x7d   : > { %498 = vst [vmem:[%s5494_s15 + $0x40] sm:$0xff] %v5217_v48 }
  0x7e   : > { %499 = vst [vmem:[%s5494_s15 + $0x48] sm:$0xff] %v5217_v48 }
  0x7f   : > { %500 = vst [vmem:[%s5494_s15 + $0x50] sm:$0xff] %v5217_v48 }
  0x80   : > { %501 = vst [vmem:[%s5494_s15 + $0x58] sm:$0xff] %v5217_v48 }
  0x81   : > { %502 = vst [vmem:[%s5496_s11] sm:$0x77] %v5217_v48 }
  0x82   : > { %503 = vst [vmem:[%s5496_s11 + $0x8] sm:$0x77] %v5217_v48 }
  0x83 PF: > { %s506_s13 = sld [smem:[#allocation4 + %s5193_s8]]  ;;  %s5515_s14 = sshll.u32 %s5197_s9, 9 }
  0x84   : > { %s508_s22 = sld [smem:[#allocation3 + %s5193_s8]]  ;;  %s505_s28 = sadd.s32 512, %s5515_s14 }
  0x89   : > { %p507_p5 = scmp.ge.s32.totalorder %s506_s13, %s5515_s14 }
  0x8a   : > { %p509_p6 = scmp.lt.s32.totalorder %s508_s22, %s505_s28 }
  0x8c   : > { %p510_p7 = pnand %p509_p6, %p507_p5 }
  0x8d   : > { %s5534_s17 = smov (!%p510_p7), 0  }
  0x8e   : > { %513 = sbr.rel (%p510_p7) target bundleno = 1161 (0x489), region = 74 }
  0x93   : > { %v514_v49 = vlaneseq  ;;  %v524_v50 = vld [vmem:[%s5489_s2] sm:$0xf]  ;;  %v519_v51 = vstv %s5515_s14 }
  0x94   : > { %v5524_v52 = vpack.c.bf16 %v524_v50, %v524_v50 }
  0x95   : > { %v515_v53 = vand.u32 127, %v514_v49 }
  0x97   : > { %v516_v54 = vadd.s32 128, %v515_v53  ;;  %v517_v55 = vadd.s32 256, %v515_v53  ;;  %v518_v56 = vadd.s32 384, %v515_v53  ;;  %v5526_v57 = vadd.s32 %v519_v51, %v515_v53 }
  0x99   : > { %v5528_v58 = vadd.s32 %v519_v51, %v516_v54  ;;  %v5530_v59 = vadd.s32 %v519_v51, %v517_v55  ;;  %v5532_v60 = vadd.s32 %v519_v51, %v518_v56 }
  0x9a LB: >> { %s3807_s2 = sshll.u32 %s5213_s17, 7  ;;  %vm7999_vm0 = vcmask 64512   ;;  %s5213_s17 = sphi %s5534_s17, %s531_s17  }
  0x9b   : >> { %s5542_s18 = scalar_lea.vmem %s441_s1, %s3807_s2 [#allocation5] }
  0x9c   : >> { %v5545_v61 = vld [vmem:[%s5542_s18] sm:$0xff]  ;;  %v5548_v62 = vld [vmem:[%s5542_s18 + $0x8] sm:$0xff]  ;;  %v5551_v63 = vld [vmem:[%s5542_s18 + $0x10] sm:$0xff] }
  0x9d   : >> { %v5554_v0 = vld [vmem:[%s5542_s18 + $0x18] sm:$0xff]  ;;  %v5557_v1 = vld [vmem:[%s5542_s18 + $0x20] sm:$0xff]  ;;  %v5560_v2 = vld [vmem:[%s5542_s18 + $0x28] sm:$0xff]  ;;  %v551_v3 = vsel %vm7999_vm0, %v5545_v61, 2147483648  ;;  %v552_v4 = vsel %vm7999_vm0, %v5548_v62, 2147483648  ;;  %v553_v5 = vsel %vm7999_vm0, %v5551_v63, 2147483648 }
  0x9e   : >> { %v5569_v6 = vld [vmem:[%s5542_s18 + $0x30] sm:$0xff]  ;;  %v5572_v7 = vld [vmem:[%s5542_s18 + $0x38] sm:$0xff]  ;;  %v5575_v8 = vld [vmem:[%s5542_s18 + $0x40] sm:$0xff]  ;;  %v554_v9 = vsel %vm7999_vm0, %v5554_v0, 2147483648  ;;  %v555_v10 = vsel %vm7999_vm0, %v5557_v1, 2147483648  ;;  %v558_v11 = vsel %vm7999_vm0, %v5560_v2, 2147483648 }
  0x9f   : >> { %v5584_v12 = vld [vmem:[%s5542_s18 + $0x48] sm:$0xff]  ;;  %v5587_v13 = vld [vmem:[%s5542_s18 + $0x50] sm:$0xff]  ;;  %v5590_v14 = vld [vmem:[%s5542_s18 + $0x58] sm:$0xff]  ;;  %vm556_vm1 = vcmp.gt.s32.totalorder %v551_v3, %v555_v10  ;;  %vm559_vm2 = vcmp.gt.s32.totalorder %v552_v4, %v558_v11  ;;  %v561_v15 = vsel %vm7999_vm0, %v5569_v6, 2147483648  ;;  %v564_v16 = vsel %vm7999_vm0, %v5572_v7, 2147483648 }
  0xa0   : >> { %v557_v17 = vsel %vm556_vm1, %v551_v3, %v555_v10  ;;  %v560_v18 = vsel %vm559_vm2, %v552_v4, %v558_v11  ;;  %vm562_vm3 = vcmp.gt.s32.totalorder %v553_v5, %v561_v15  ;;  %vm565_vm4 = vcmp.gt.s32.totalorder %v554_v9, %v564_v16  ;;  %v5597_v19 = vld [vmem:[%s5542_s18 + $0x60] sm:$0xff]  ;;  %v5600_v20 = vld [vmem:[%s5542_s18 + $0x68] sm:$0xff]  ;;  %v5607_v25 = vld [vmem:[%s5542_s18 + $0x70] sm:$0xff] }
  0xa1   : >> { %v563_v21 = vsel %vm562_vm3, %v553_v5, %v561_v15  ;;  %v566_v22 = vsel %vm565_vm4, %v554_v9, %v564_v16  ;;  %v567_v23 = vsel %vm7999_vm0, %v5575_v8, 2147483648  ;;  %v570_v24 = vsel %vm7999_vm0, %v5584_v12, 2147483648  ;;  %v5610_v26 = vld [vmem:[%s5542_s18 + $0x78] sm:$0xff] }
  0xa2   : >> { %vm568_vm5 = vcmp.gt.s32.totalorder %v557_v17, %v567_v23  ;;  %vm571_vm6 = vcmp.gt.s32.totalorder %v560_v18, %v570_v24  ;;  %v573_v27 = vsel %vm7999_vm0, %v5587_v13, 2147483648  ;;  %v576_v28 = vsel %vm7999_vm0, %v5590_v14, 2147483648 }
  0xa3   : >> { %v569_v29 = vsel %vm568_vm5, %v557_v17, %v567_v23  ;;  %v572_v30 = vsel %vm571_vm6, %v560_v18, %v570_v24  ;;  %vm574_vm7 = vcmp.gt.s32.totalorder %v563_v21, %v573_v27  ;;  %vm577_vm8 = vcmp.gt.s32.totalorder %v566_v22, %v576_v28 }
  0xa4   : >> { %v575_v31 = vsel %vm574_vm7, %v563_v21, %v573_v27  ;;  %v578_v32 = vsel %vm577_vm8, %v566_v22, %v576_v28  ;;  %v579_v33 = vsel %vm7999_vm0, %v5597_v19, 2147483648  ;;  %v582_v34 = vsel %vm7999_vm0, %v5600_v20, 2147483648 }
  0xa5   : >> { %vm580_vm9 = vcmp.gt.s32.totalorder %v569_v29, %v579_v33  ;;  %vm583_vm10 = vcmp.gt.s32.totalorder %v572_v30, %v582_v34  ;;  %v585_v35 = vsel %vm7999_vm0, %v5607_v25, 2147483648  ;;  %v588_v36 = vsel %vm7999_vm0, %v5610_v26, 2147483648 }
  0xa6   : >> { %v581_v37 = vsel %vm580_vm9, %v569_v29, %v579_v33  ;;  %v584_v38 = vsel %vm583_vm10, %v572_v30, %v582_v34  ;;  %vm586_vm11 = vcmp.gt.s32.totalorder %v575_v31, %v585_v35  ;;  %vm589_vm12 = vcmp.gt.s32.totalorder %v578_v32, %v588_v36 }
  0xa7   : >> { %v587_v39 = vsel %vm586_vm11, %v575_v31, %v585_v35  ;;  %v590_v40 = vsel %vm589_vm12, %v578_v32, %v588_v36  ;;  %vm591_vm13 = vcmp.gt.s32.totalorder %v581_v37, %v584_v38  ;;  %vm621_vm15 = vcmp.ge.s32.totalorder %v5545_v61, 0 }
  0xa8   : >> { %v592_v41 = vsel %vm591_vm13, %v581_v37, %v584_v38  ;;  %vm593_vm14 = vcmp.gt.s32.totalorder %v587_v39, %v590_v40  ;;  %vm622_vm1 = vcmp.ge.s32.totalorder %v5548_v62, 0  ;;  %vm623_vm2 = vcmp.ge.s32.totalorder %v5551_v63, 0 }
  0xa9   : >> { %v594_v42 = vsel %vm593_vm14, %v587_v39, %v590_v40  ;;  %vm624_vm3 = vcmp.ge.s32.totalorder %v5554_v0, 0  ;;  %vm625_vm4 = vcmp.ge.s32.totalorder %v5557_v1, 0  ;;  %vm626_vm6 = vcmp.ge.s32.totalorder %v5560_v2, 0 }
  0xaa   : >> { %vm595_vm5 = vcmp.gt.s32.totalorder %v592_v41, %v594_v42  ;;  %vm627_vm7 = vcmp.ge.s32.totalorder %v5569_v6, 0  ;;  %vm629_vm9 = vcmp.ge.s32.totalorder %v5575_v8, 0  ;;  %vm630_vm10 = vcmp.ge.s32.totalorder %v5584_v12, 0 }
  0xab   : >> { %v5632_v43 = vsel %vm595_vm5, %v592_v41, %v594_v42  ;;  %vm631_vm11 = vcmp.ge.s32.totalorder %v5587_v13, 0  ;;  %vm632_vm12 = vcmp.ge.s32.totalorder %v5590_v14, 0  ;;  %vm633_vm13 = vcmp.ge.s32.totalorder %v5597_v19, 0 }
  0xac   : >> { %v598_v44 = vshra.s32 %v5632_v43, 16  ;;  %vm634_vm14 = vcmp.ge.s32.totalorder %v5600_v20, 0  ;;  %vm635_vm0 = vcmp.ge.s32.totalorder %v5607_v25, 0  ;;  %vm636_vm8 = vcmp.ge.s32.totalorder %v5610_v26, 0 }
  0xad   : >> { %v637_v45 = vsel %vm621_vm15, %v5545_v61, 2147483647  ;;  %v638_v46 = vsel %vm622_vm1, %v5548_v62, 2147483647  ;;  %v639_v48 = vsel %vm623_vm2, %v5551_v63, 2147483647 }
  0xae   : >> { %v5649_v47 = vcvt.s32.f32 %v598_v44  ;;  %v640_v49 = vsel %vm624_vm3, %v5554_v0, 2147483647  ;;  %v641_v50 = vsel %vm625_vm4, %v5557_v1, 2147483647  ;;  %v642_v51 = vsel %vm626_vm6, %v5560_v2, 2147483647 }
  0xaf   : >> { %v643_v53 = vsel %vm627_vm7, %v5569_v6, 2147483647  ;;  %vm8019_vm15 = vcmp.ge.s32.totalorder %v5572_v7, 0  ;;  %v645_v55 = vsel %vm629_vm9, %v5575_v8, 2147483647  ;;  %vm8020_vm1 = vcmask 64512  }
  0xb0   : >> { %v644_v54 = vsel %vm8019_vm15, %v5572_v7, 2147483647  ;;  %601 = vmax.xlane.f32.xlu0 %v5649_v47  ;;  %v646_v56 = vsel %vm630_vm10, %v5584_v12, 2147483647  ;;  %v647_v3 = vsel %vm631_vm11, %v5587_v13, 2147483647  ;;  %vm8021_vm2 = vmmov %vm8020_vm1 }
  0xb1   : >> { %v648_v4 = vsel %vm632_vm12, %v5590_v14, 2147483647  ;;  %v649_v5 = vsel %vm633_vm13, %v5597_v19, 2147483647  ;;  %v650_v9 = vsel %vm634_vm14, %v5600_v20, 2147483647  ;;  %vm8022_vm3 = vmmov %vm8020_vm1 }
  0xb2   : >> { %v651_v10 = vsel %vm635_vm0, %v5607_v25, 2147483647  ;;  %v652_v11 = vsel %vm636_vm8, %v5610_v26, 2147483647  ;;  %v653_v15 = vsel %vm8020_vm1, %v637_v45, 2147483647  ;;  %vm8023_vm4 = vmmov %vm8020_vm1 }
  0xb3   : >> { %v654_v16 = vsel %vm8021_vm2, %v638_v46, 2147483647  ;;  %v655_v17 = vsel %vm8022_vm3, %v639_v48, 2147483647  ;;  %v656_v18 = vsel %vm8023_vm4, %v640_v49, 2147483647  ;;  %vm8024_vm5 = vmmov %vm8020_vm1 }
  0xb4   : >> { %v657_v21 = vsel %vm8024_vm5, %v641_v50, 2147483647  ;;  %vm8025_vm6 = vmmov %vm8020_vm1  ;;  %v678_v34 = vsel %vm8022_vm3, %v648_v4, 2147483647 }
  0xb5   : >> { %v660_v22 = vsel %vm8025_vm6, %v642_v51, 2147483647  ;;  %vm8026_vm7 = vmmov %vm8020_vm1  ;;  %vm658_vm9 = vcmp.lt.s32.totalorder %v653_v15, %v657_v21 }
  0xb6   : >> { %v663_v23 = vsel %vm8026_vm7, %v643_v53, 2147483647  ;;  %vm661_vm0 = vcmp.lt.s32.totalorder %v654_v16, %v660_v22  ;;  %vm8027_vm11 = vmmov %vm8020_vm1  ;;  %v659_v27 = vsel %vm658_vm9, %v653_v15, %v657_v21 }
  0xb7   : >> { %vm664_vm10 = vcmp.lt.s32.totalorder %v655_v17, %v663_v23  ;;  %v666_v24 = vsel %vm8027_vm11, %v644_v54, 2147483647  ;;  %v662_v28 = vsel %vm661_vm0, %v654_v16, %v660_v22  ;;  %vm8028_vm12 = vmmov %vm8020_vm1 }
  0xb8   : >> { %v665_v29 = vsel %vm664_vm10, %v655_v17, %v663_v23  ;;  %vm667_vm8 = vcmp.lt.s32.totalorder %v656_v18, %v666_v24  ;;  %v669_v31 = vsel %vm8028_vm12, %v645_v55, 2147483647  ;;  %vm8029_vm13 = vmmov %vm8020_vm1  ;;  %v597_v55 = vand.u32 65535, %v5632_v43 }
  0xb9   : >> { %v668_v30 = vsel %vm667_vm8, %v656_v18, %v666_v24  ;;  %v672_v32 = vsel %vm8029_vm13, %v646_v56, 2147483647  ;;  %vm8030_vm14 = vmmov %vm8020_vm1  ;;  %vm670_vm15 = vcmp.lt.s32.totalorder %v659_v27, %v669_v31 }
  0xba   : >> { %v675_v33 = vsel %vm8030_vm14, %v647_v3, 2147483647  ;;  %vm673_vm1 = vcmp.lt.s32.totalorder %v662_v28, %v672_v32  ;;  %v671_v35 = vsel %vm670_vm15, %v659_v27, %v669_v31  ;;  %vm679_vm4 = vcmp.lt.s32.totalorder %v668_v30, %v678_v34  ;;  %vm8031_vm5 = vmmov %vm8022_vm3 }
  0xbb   : >> { %vm676_vm2 = vcmp.lt.s32.totalorder %v665_v29, %v675_v33  ;;  %v674_v36 = vsel %vm673_vm1, %v662_v28, %v672_v32  ;;  %v680_v38 = vsel %vm679_vm4, %v668_v30, %v678_v34  ;;  %v681_v39 = vsel %vm8031_vm5, %v649_v5, 2147483647  ;;  %vm8032_vm6 = vmmov %vm8022_vm3 }
  0xbc   : >> { %v677_v37 = vsel %vm676_vm2, %v665_v29, %v675_v33  ;;  %v684_v40 = vsel %vm8032_vm6, %v650_v9, 2147483647  ;;  %vm8033_vm7 = vmmov %vm8022_vm3  ;;  %vm682_vm9 = vcmp.lt.s32.totalorder %v671_v35, %v681_v39  ;;  %v599_v56 = vcvt.s32.f32 %v597_v55 }
  0xbd   : >> { %v687_v41 = vsel %vm8033_vm7, %v651_v10, 2147483647  ;;  %vm685_vm0 = vcmp.lt.s32.totalorder %v674_v36, %v684_v40  ;;  %vm8034_vm11 = vmmov %vm8022_vm3  ;;  %v683_v44 = vsel %vm682_vm9, %v671_v35, %v681_v39 }
  0xbe   : >> { %vm688_vm10 = vcmp.lt.s32.totalorder %v677_v37, %v687_v41  ;;  %v690_v42 = vsel %vm8034_vm11, %v652_v11, 2147483647  ;;  %v686_v45 = vsel %vm685_vm0, %v674_v36, %v684_v40 }
  0xbf   : >> { %v689_v46 = vsel %vm688_vm10, %v677_v37, %v687_v41  ;;  %vm691_vm8 = vcmp.lt.s32.totalorder %v680_v38, %v690_v42  ;;  %vm693_vm12 = vcmp.lt.s32.totalorder %v683_v44, %v686_v45 }
  0xc0   : >> { %v692_v48 = vsel %vm691_vm8, %v680_v38, %v690_v42  ;;  %v694_v49 = vsel %vm693_vm12, %v683_v44, %v686_v45 }
  0xc1   : >> { %vm695_vm13 = vcmp.lt.s32.totalorder %v689_v46, %v692_v48 }
  0xc2   : >> { %v696_v50 = vsel %vm695_vm13, %v689_v46, %v692_v48 }
  0xc3   : >> { %vm697_vm14 = vcmp.lt.s32.totalorder %v694_v49, %v696_v50 }
  0xc4   : >> { %v698_v51 = vsel %vm697_vm14, %v694_v49, %v696_v50 }
  0xc5   : >> { %v700_v53 = vshra.s32 %v698_v51, 16  ;;  %v699_v5 = vand.u32 65535, %v698_v51 }
  0xc7   : >> { %v702_v54 = vcvt.s32.f32 %v700_v53  ;;  %v701_v9 = vcvt.s32.f32 %v699_v5 }
  0xc9   : >> { %703 = vmin.xlane.f32.xlu0 %v702_v54 }
 0x123   : >> { %v602_v3 = vpop.xlane.xlu0 %601 }
 0x124   : >> { %vm603_vm15 = vcmp.eq.f32.partialorder %v5649_v47, %v602_v3  ;;  %v608_v15 = vcvt.f32.s32 %v602_v3 }
 0x125   : >> { %v604_v4 = vsel %vm603_vm15, %v599_v56, -inf }
 0x126   : >> { %605 = vmax.xlane.f32.xlu1 %v604_v4  ;;  %v609_v17 = vshll.u32 %v608_v15, 16 }
 0x13c   : >> { %v704_v10 = vpop.xlane.xlu0 %703 }
 0x13d   : >> { %vm705_vm1 = vcmp.eq.f32.partialorder %v702_v54, %v704_v10  ;;  %v710_v28 = vcvt.f32.s32 %v704_v10 }
 0x13e   : >> { %v706_v11 = vsel %vm705_vm1, %v701_v9, inf }
 0x13f   : >> { %707 = vmin.xlane.f32.xlu1 %v706_v11  ;;  %v711_v30 = vshll.u32 %v710_v28, 16 }
 0x199   : >> { %v606_v16 = vpop.xlane.xlu1 %605 }
 0x19a   : >> { %v607_v18 = vcvt.f32.s32 %v606_v16 }
 0x19c   : >> { %v610_v21 = vadd.s32 %v609_v17, %v607_v18 }
 0x19e   : >> { %v611_v22 = vrot.slane %v610_v21, 4 }
 0x1a0   : >> { %vm612_vm2 = vcmp.gt.s32.totalorder %v610_v21, %v611_v22 }
 0x1a1   : >> { %v613_v43 = vsel %vm612_vm2, %v610_v21, %v611_v22 }
 0x1a2   : >> { %v614_v23 = vrot.slane %v613_v43, 2 }
 0x1a4   : >> { %vm615_vm3 = vcmp.gt.s32.totalorder %v613_v43, %v614_v23 }
 0x1a5   : >> { %v616_v24 = vsel %vm615_vm3, %v613_v43, %v614_v23 }
 0x1a6   : >> { %v617_v47 = vrot.slane %v616_v24, 1 }
 0x1a8   : >> { %vm618_vm4 = vcmp.gt.s32.totalorder %v616_v24, %v617_v47 }
 0x1a9   : >> { %v619_v27 = vsel %vm618_vm4, %v616_v24, %v617_v47 }
 0x1aa   : >> { %4854 = vpush %v619_v27 }
 0x1b2   : >> { %v708_v29 = vpop.xlane.xlu1 %707 }
 0x1b3   : >> { %v709_v31 = vcvt.f32.s32 %v708_v29 }
 0x1b5   : >> { %v712_v32 = vadd.s32 %v711_v30, %v709_v31 }
 0x1b7   : >> { %v713_v33 = vrot.slane %v712_v32, 4 }
 0x1b9   : >> { %vm714_vm5 = vcmp.lt.s32.totalorder %v712_v32, %v713_v33 }
 0x1ba   : >> { %v715_v34 = vsel %vm714_vm5, %v712_v32, %v713_v33 }
 0x1bb   : >> { %v716_v35 = vrot.slane %v715_v34, 2 }
 0x1bd   : >> { %vm717_vm6 = vcmp.lt.s32.totalorder %v715_v34, %v716_v35 }
 0x1be   : >> { %v718_v36 = vsel %vm717_vm6, %v715_v34, %v716_v35 }
 0x1bf   : >> { %v719_v37 = vrot.slane %v718_v36, 1 }
 0x1c1   : >> { %vm720_vm7 = vcmp.lt.s32.totalorder %v718_v36, %v719_v37 }
 0x1c2   : >> { %v721_v38 = vsel %vm720_vm7, %v718_v36, %v719_v37 }
 0x1c3   : >> { %4856 = vpush %v721_v38 }
 0x1db   : >> { %s4855_s20 = spop %4854 }
 0x1dc   : >> { %p723_p8 = scmp.ge.s32.totalorder %s4855_s20, %s5515_s14 }
 0x1f4   : >> { %s4857_s19 = spop %4856 }
 0x1f5   : >> { %p724_p9 = scmp.lt.s32.totalorder %s4857_s19, %s505_s28 }
 0x1f7   : >> { %p725_p11 = pnand %p724_p9, %p723_p8 }
 0x1f8   : >> { %s4832_s13 = sshll.u32 (!%p725_p11), %s5213_s17, 3 }
 0x1f9   : >> { %728 = sbr.rel (%p725_p11) target bundleno = 1153 (0x481), region = 85  ;;  %s3354_s22 = sshra.s32 (!%p725_p11), %s4832_s13, 3 }
 0x1fa   : >> { %s4848_s2 = sshll.u32 (!%p725_p11), %s3354_s22, 5 }
 0x1fb   : >> { %s7855_s18 = scalar_lea.vmem (!%p725_p11), %s5494_s15, %s4848_s2 [#allocation8] }
 0x1fe   : >> { %v5218_v39 = vmov 0   ;;  %v5219_v40 = vmov 1   ;;  %v5220_v41 = vmov 2   ;;  %v5221_v54 = vmov 3  }
 0x1ff   : >> { %4980 = vset.pattern.permute.xlu2 %v5218_v39  ;;  %4979 = vset.pattern.permute.xlu1 %v5218_v39  ;;  %v8041_v23 = vmov 0  ;;  %v5222_v24 = vmov 1.0|1.0   ;;  %v8045_v27 = vmov 0  ;;  %v8047_v28 = vmov 0 }
 0x200   : >> { %4978 = vset.pattern.permute.xlu0 %v5218_v39  ;;  %742 = vperm.xlu2 %4980, %v5557_v1   ;;  %v8049_v31 = vmov 0  ;;  %v8051_v33 = vmov 0  ;;  %v5223_v34 = vmov 4   ;;  %v8070_v18 = vmov 0 }
 0x201   : >> { %736 = vperm.xlu1 %4979, %v5551_v63   ;;  %730 = vperm.xlu0 %4978, %v5545_v61  }
 0x208   : >> { %745 = vperm.xlu2 %4980, %v5560_v2  }
 0x209   : >> { %739 = vperm.xlu1 %4979, %v5554_v0   ;;  %733 = vperm.xlu0 %4978, %v5548_v62  }
 0x210   : >> { %754 = vperm.xlu2 %4980, %v5575_v8  }
 0x211   : >> { %751 = vperm.xlu1 %4979, %v5572_v7   ;;  %748 = vperm.xlu0 %4978, %v5569_v6  }
 0x218   : >> { %763 = vperm.xlu2 %4980, %v5590_v14  }
 0x219   : >> { %760 = vperm.xlu1 %4979, %v5587_v13   ;;  %757 = vperm.xlu0 %4978, %v5584_v12  }
 0x220   : >> { %772 = vperm.xlu2 %4980, %v5607_v25  }
 0x221   : >> { %769 = vperm.xlu1 %4979, %v5600_v20   ;;  %766 = vperm.xlu0 %4978, %v5597_v19  }
 0x228   : >> { %4982 = vset.pattern.permute.xlu2 %v5219_v40 }
 0x229   : >> { %4981 = vset.pattern.permute.xlu1 %v5219_v40  ;;  %775 = vperm.xlu0 %4978, %v5610_v26  }
 0x22a   : >> { %1061 = vperm.xlu2 %4982, %v5548_v62   ;;  %1058 = vperm.xlu1 %4981, %v5545_v61  }
 0x231   : >> { %4983 = vset.pattern.permute.xlu0 %v5219_v40 }
 0x232   : >> { %1070 = vperm.xlu2 %4982, %v5557_v1   ;;  %1067 = vperm.xlu1 %4981, %v5554_v0  }
 0x233   : >> { %1064 = vperm.xlu0 %4983, %v5551_v63  }
 0x23a   : >> { %1076 = vperm.xlu2 %4982, %v5569_v6   ;;  %1073 = vperm.xlu1 %4981, %v5560_v2  }
 0x23b   : >> { %1079 = vperm.xlu0 %4983, %v5572_v7  }
 0x242   : >> { %1085 = vperm.xlu2 %4982, %v5584_v12   ;;  %1082 = vperm.xlu1 %4981, %v5575_v8  }
 0x243   : >> { %1088 = vperm.xlu0 %4983, %v5587_v13  }
 0x24a   : >> { %1094 = vperm.xlu2 %4982, %v5597_v19   ;;  %1091 = vperm.xlu1 %4981, %v5590_v14  }
 0x24b   : >> { %1097 = vperm.xlu0 %4983, %v5600_v20  }
 0x252   : >> { %1103 = vperm.xlu2 %4982, %v5610_v26   ;;  %1100 = vperm.xlu1 %4981, %v5607_v25  }
 0x253   : >> { %4984 = vset.pattern.permute.xlu0 %v5220_v41 }
 0x254   : >> { %1386 = vperm.xlu0 %4984, %v5545_v61  }
 0x25a   : >> { %4986 = vset.pattern.permute.xlu2 %v5220_v41  ;;  %4985 = vset.pattern.permute.xlu1 %v5220_v41  ;;  %v5748_v42 = vpop.permute.xlu2 %742 }
 0x25b   : >> { %1392 = vperm.xlu2 %4986, %v5551_v63   ;;  %1389 = vperm.xlu1 %4985, %v5548_v62  }
 0x25c   : >> { %1401 = vperm.xlu0 %4984, %v5560_v2  }
 0x262   : >> { %v5753_v44 = vpop.permute.xlu2 %745 }
 0x263   : >> { %1398 = vperm.xlu2 %4986, %v5557_v1   ;;  %1395 = vperm.xlu1 %4985, %v5554_v0  }
 0x264   : >> { %1410 = vperm.xlu0 %4984, %v5575_v8  }
 0x26a   : >> { %v5758_v45 = vpop.permute.xlu2 %754 }
 0x26b   : >> { %1407 = vperm.xlu2 %4986, %v5572_v7   ;;  %1404 = vperm.xlu1 %4985, %v5569_v6  }
 0x26c   : >> { %1419 = vperm.xlu0 %4984, %v5590_v14  }
 0x272   : >> { %v5763_v46 = vpop.permute.xlu2 %763 }
 0x273   : >> { %1416 = vperm.xlu2 %4986, %v5587_v13   ;;  %1413 = vperm.xlu1 %4985, %v5584_v12   ;;  %v5767_v48 = vpop.permute.xlu1 %736  ;;  %v5769_v49 = vpop.permute.xlu0 %730  ;;  %vm821_vm2 = vcmp.eq.s32.totalorder %v5763_v46, %v5526_v57 }
 0x274   : >> { %1428 = vperm.xlu0 %4984, %v5607_v25  }
 0x27a   : >> { %v5772_v50 = vpop.permute.xlu2 %772 }
 0x27b   : >> { %1425 = vperm.xlu2 %4986, %v5600_v20   ;;  %1422 = vperm.xlu1 %4985, %v5597_v19   ;;  %v5776_v51 = vpop.permute.xlu1 %739  ;;  %v5778_v53 = vpop.permute.xlu0 %733  ;;  %vm833_vm15 = vcmp.eq.s32.totalorder %v5772_v50, %v5526_v57 }
 0x27c   : >> { %4988 = vset.pattern.permute.xlu0 %v5221_v54 }
 0x27d   : >> { %1717 = vperm.xlu0 %4988, %v5548_v62  }
 0x283   : >> { %4987 = vset.pattern.permute.xlu2 %v5221_v54  ;;  %1431 = vperm.xlu1 %4985, %v5610_v26   ;;  %v5782_v55 = vpop.permute.xlu1 %751  ;;  %v5784_v56 = vpop.permute.xlu0 %748 }
 0x284   : >> { %1714 = vperm.xlu2 %4987, %v5545_v61   ;;  %v5787_v3 = vpop.permute.xlu2 %1061 }
 0x285   : >> { %1732 = vperm.xlu0 %4988, %v5569_v6  }
 0x28b   : >> { %4989 = vset.pattern.permute.xlu1 %v5221_v54  ;;  %v5790_v4 = vpop.permute.xlu1 %760  ;;  %v5792_v5 = vpop.permute.xlu0 %757 }
 0x28c   : >> { %1723 = vperm.xlu2 %4987, %v5554_v0   ;;  %v5795_v9 = vpop.permute.xlu2 %1070  ;;  %1720 = vperm.xlu1 %4989, %v5551_v63   ;;  %vm817_vm14 = vcmp.eq.s32.totalorder %v5790_v4, %v5526_v57 }
 0x28d   : >> { %1741 = vperm.xlu0 %4988, %v5584_v12  }
 0x293   : >> { %v770_v10 = vpop.permute.xlu1 %769  ;;  %v767_v11 = vpop.permute.xlu0 %766 }
 0x294   : >> { %1729 = vperm.xlu2 %4987, %v5560_v2   ;;  %v5800_v15 = vpop.permute.xlu2 %1076  ;;  %1726 = vperm.xlu1 %4989, %v5557_v1   ;;  %vm825_vm9 = vcmp.eq.s32.totalorder %v767_v11, %v5526_v57  ;;  %vm829_vm0 = vcmp.eq.s32.totalorder %v770_v10, %v5526_v57  ;;  %vm826_vm10 = vcmp.eq.s32.totalorder %v767_v11, %v5528_v58 }
 0x295   : >> { %1750 = vperm.xlu0 %4988, %v5597_v19   ;;  %vm830_vm11 = vcmp.eq.s32.totalorder %v770_v10, %v5528_v58  ;;  %vm827_vm8 = vcmp.eq.s32.totalorder %v767_v11, %v5530_v59  ;;  %vm831_vm12 = vcmp.eq.s32.totalorder %v770_v10, %v5530_v59  ;;  %vm5810_vm13 = vmpackc.low %vm829_vm0, %vm825_vm9  ;;  %vm834_vm9 = vcmp.eq.s32.totalorder %v5772_v50, %v5528_v58 }
 0x296   : >> { %vm5818_vm1 = vmpackc.low %vm830_vm11, %vm826_vm10 }
 0x297   : >> { %vm5833_vm6 = vmpackc.low %vm831_vm12, %vm827_vm8  ;;  %vm835_vm8 = vcmp.eq.s32.totalorder %v5772_v50, %v5530_v59  ;;  %vm828_vm12 = vcmp.eq.s32.totalorder %v767_v11, %v5532_v60 }
 0x298   : >> { %vm5844_vm10 = vmpackc.low %vm821_vm2, %vm817_vm14  ;;  %vm836_vm14 = vcmp.eq.s32.totalorder %v5772_v50, %v5532_v60 }
 0x299   : >> { %v8042_v23 = vsel %vm5844_vm10, 4294967295, %v8041_v23  ;;  %vm1109_vm10 = vcmp.eq.s32.totalorder %v5787_v3, %v5526_v57 }
 0x29b   : >> { %v776_v17 = vpop.permute.xlu0 %775 }
 0x29c   : >> { %1738 = vperm.xlu2 %4987, %v5575_v8   ;;  %v5825_v21 = vpop.permute.xlu2 %1085  ;;  %1735 = vperm.xlu1 %4989, %v5572_v7   ;;  %v1059_v22 = vpop.permute.xlu1 %1058  ;;  %vm837_vm3 = vcmp.eq.s32.totalorder %v776_v17, %v5526_v57  ;;  %vm838_vm4 = vcmp.eq.s32.totalorder %v776_v17, %v5528_v58  ;;  %vm839_vm5 = vcmp.eq.s32.totalorder %v776_v17, %v5530_v59 }
 0x29d   : >> { %1759 = vperm.xlu0 %4988, %v5610_v26   ;;  %vm3872_vm7 = vmpackc.low %vm837_vm3, %vm833_vm15  ;;  %vm840_vm0 = vcmp.eq.s32.totalorder %v776_v17, %v5532_v60  ;;  %vm832_vm15 = vcmp.eq.s32.totalorder %v770_v10, %v5532_v60  ;;  %vm1105_vm2 = vcmp.eq.s32.totalorder %v1059_v22, %v5526_v57  ;;  %v8068_v17 = vmov 0 }
 0x29e   : >> { %3873 = vmatpush.bf16.msk.msra.mxu0 %vm3872_vm7, %v5222_v24  ;;  %vm3888_vm11 = vmpackc.low %vm838_vm4, %vm834_vm9  ;;  %vm1106_vm7 = vcmp.eq.s32.totalorder %v1059_v22, %v5528_v58  ;;  %vm1110_vm9 = vcmp.eq.s32.totalorder %v5787_v3, %v5528_v58 }
 0x29f   : >> { %3889 = vmatpush.bf16.msk.msra.mxu1 %vm3888_vm11, %v5222_v24  ;;  %vm3904_vm3 = vmpackc.low %vm839_vm5, %vm835_vm8  ;;  %vm1107_vm5 = vcmp.eq.s32.totalorder %v1059_v22, %v5530_v59  ;;  %vm1111_vm8 = vcmp.eq.s32.totalorder %v5787_v3, %v5530_v59 }
 0x2a0   : >> { %3905 = vmatpush.bf16.msk.msra.mxu2 %vm3904_vm3, %v5222_v24  ;;  %vm3920_vm4 = vmpackc.low %vm840_vm0, %vm836_vm14  ;;  %vm1108_vm3 = vcmp.eq.s32.totalorder %v1059_v22, %v5532_v60 }
 0x2a1   : >> { %3921 = vmatpush.bf16.msk.msra.mxu3 %vm3920_vm4, %v5222_v24  ;;  %vm5864_vm11 = vmpackc.low %vm832_vm15, %vm828_vm12  ;;  %vm1112_vm12 = vcmp.eq.s32.totalorder %v5787_v3, %v5532_v60  ;;  %vm818_vm15 = vcmp.eq.s32.totalorder %v5790_v4, %v5528_v58  ;;  %vm8053_vm4 = vnez %v8042_v23  ;;  %v8061_v3 = vmov 0 }
 0x2a2   : >> { %3875 = vmatpush.bf16.msk.msra.mxu0 %vm5810_vm13, %v5222_v24  ;;  %vm5874_vm0 = vmpackc.low %vm1109_vm10, %vm1105_vm2  ;;  %vm819_vm13 = vcmp.eq.s32.totalorder %v5790_v4, %v5530_v59  ;;  %vm820_vm10 = vcmp.eq.s32.totalorder %v5790_v4, %v5532_v60 }
 0x2a3   : >> { %v8046_v27 = vsel %vm5874_vm0, 4294967295, %v8045_v27  ;;  %3891 = vmatpush.bf16.msk.msra.mxu1 %vm5818_vm1, %v5222_v24  ;;  %vm5886_vm14 = vmpackc.low %vm1110_vm9, %vm1106_vm7  ;;  %vm823_vm9 = vcmp.eq.s32.totalorder %v5763_v46, %v5530_v59 }
 0x2a4   : >> { %v8048_v28 = vsel %vm5886_vm14, 4294967295, %v8047_v28  ;;  %3907 = vmatpush.bf16.msk.msra.mxu2 %vm5833_vm6, %v5222_v24  ;;  %1747 = vperm.xlu2 %4987, %v5590_v14   ;;  %v5894_v29 = vpop.permute.xlu2 %1094  ;;  %v5896_v30 = vpop.permute.xlu1 %1067  ;;  %vm5900_vm1 = vmpackc.low %vm1111_vm8, %vm1107_vm5  ;;  %vm822_vm6 = vcmp.eq.s32.totalorder %v5763_v46, %v5528_v58  ;;  %vm824_vm8 = vcmp.eq.s32.totalorder %v5763_v46, %v5532_v60 }
 0x2a5   : >> { %v8050_v31 = vsel %vm5900_vm1, 4294967295, %v8049_v31  ;;  %3923 = vmatpush.bf16.msk.msra.mxu3 %vm5864_vm11, %v5222_v24  ;;  %1744 = vperm.xlu1 %4989, %v5587_v13   ;;  %v5908_v32 = vpop.permute.xlu0 %1064  ;;  %vm5919_vm2 = vmpackc.low %vm1112_vm12, %vm1108_vm3  ;;  %vm813_vm11 = vcmp.eq.s32.totalorder %v5792_v5, %v5526_v57  ;;  %vm814_vm3 = vcmp.eq.s32.totalorder %v5792_v5, %v5528_v58 }
 0x2a6   : >> { %v8052_v33 = vsel %vm5919_vm2, 4294967295, %v8051_v33  ;;  %4992 = vset.pattern.permute.xlu0 %v5223_v34  ;;  %3877 = vmatpush.bf16.msk.msra.mxu0 %vm8053_vm4, %v5222_v24  ;;  %vm3892_vm7 = vmpackc.low %vm822_vm6, %vm818_vm15  ;;  %vm809_vm15 = vcmp.eq.s32.totalorder %v5758_v45, %v5526_v57  ;;  %vm815_vm6 = vcmp.eq.s32.totalorder %v5792_v5, %v5530_v59  ;;  %vm799_vm2 = vcmp.eq.s32.totalorder %v5753_v44, %v5530_v59 }
 0x2a7   : >> { %2048 = vperm.xlu0 %4992, %v5551_v63   ;;  %3893 = vmatpush.bf16.msk.msra.mxu1 %vm3892_vm7, %v5222_v24  ;;  %vm3908_vm5 = vmpackc.low %vm823_vm9, %vm819_vm13  ;;  %vm810_vm13 = vcmp.eq.s32.totalorder %v5758_v45, %v5528_v58  ;;  %vm816_vm7 = vcmp.eq.s32.totalorder %v5792_v5, %v5532_v60 }
 0x2a8   : >> { %3909 = vmatpush.bf16.msk.msra.mxu2 %vm3908_vm5, %v5222_v24  ;;  %vm3924_vm12 = vmpackc.low %vm824_vm8, %vm820_vm10  ;;  %vm811_vm10 = vcmp.eq.s32.totalorder %v5758_v45, %v5530_v59  ;;  %vm801_vm5 = vcmp.eq.s32.totalorder %v5784_v56, %v5526_v57  ;;  %vm805_vm8 = vcmp.eq.s32.totalorder %v5782_v55, %v5526_v57 }
 0x2a9   : >> { %3925 = vmatpush.bf16.msk.msra.mxu3 %vm3924_vm12, %v5222_v24  ;;  %vm3878_vm4 = vmpackc.low %vm813_vm11, %vm809_vm15  ;;  %vm812_vm12 = vcmp.eq.s32.totalorder %v5758_v45, %v5532_v60  ;;  %vm802_vm15 = vcmp.eq.s32.totalorder %v5784_v56, %v5528_v58 }
 0x2aa   : >> { %3879 = vmatpush.bf16.msk.msra.mxu0 %vm3878_vm4, %v5222_v24  ;;  %vm3894_vm9 = vmpackc.low %vm814_vm3, %vm810_vm13  ;;  %vm806_vm3 = vcmp.eq.s32.totalorder %v5782_v55, %v5528_v58  ;;  %vm807_vm13 = vcmp.eq.s32.totalorder %v5782_v55, %v5530_v59 }
 0x2ab   : >> { %3895 = vmatpush.bf16.msk.msra.mxu1 %vm3894_vm9, %v5222_v24  ;;  %vm3910_vm11 = vmpackc.low %vm815_vm6, %vm811_vm10  ;;  %vm803_vm6 = vcmp.eq.s32.totalorder %v5784_v56, %v5530_v59  ;;  %vm804_vm9 = vcmp.eq.s32.totalorder %v5784_v56, %v5532_v60  ;;  %vm808_vm10 = vcmp.eq.s32.totalorder %v5782_v55, %v5532_v60 }
 0x2ac   : >> { %3911 = vmatpush.bf16.msk.msra.mxu2 %vm3910_vm11, %v5222_v24  ;;  %vm3926_vm4 = vmpackc.low %vm816_vm7, %vm812_vm12  ;;  %1756 = vperm.xlu2 %4987, %v5607_v25   ;;  %v5969_v35 = vpop.permute.xlu2 %1103  ;;  %v5971_v36 = vpop.permute.xlu1 %1073  ;;  %vm793_vm12 = vcmp.eq.s32.totalorder %v5748_v42, %v5526_v57 }
 0x2ad   : >> { %3927 = vmatpush.bf16.msk.msra.mxu3 %vm3926_vm4, %v5222_v24  ;;  %1753 = vperm.xlu1 %4989, %v5600_v20   ;;  %v5979_v37 = vpop.permute.xlu0 %1079  ;;  %vm3880_vm7 = vmpackc.low %vm805_vm8, %vm801_vm5  ;;  %vm797_vm5 = vcmp.eq.s32.totalorder %v5753_v44, %v5526_v57  ;;  %vm794_vm4 = vcmp.eq.s32.totalorder %v5748_v42, %v5528_v58 }
 0x2ae   : >> { %3881 = vmatpush.bf16.msk.msra.mxu0 %vm3880_vm7, %v5222_v24  ;;  %vm3896_vm11 = vmpackc.low %vm806_vm3, %vm802_vm15  ;;  %vm798_vm7 = vcmp.eq.s32.totalorder %v5753_v44, %v5528_v58  ;;  %vm795_vm3 = vcmp.eq.s32.totalorder %v5748_v42, %v5530_v59 }
 0x2af   : >> { %2063 = vperm.xlu0 %4992, %v5572_v7   ;;  %3897 = vmatpush.bf16.msk.msra.mxu1 %vm3896_vm11, %v5222_v24  ;;  %vm3912_vm8 = vmpackc.low %vm807_vm13, %vm803_vm6  ;;  %vm796_vm6 = vcmp.eq.s32.totalorder %v5748_v42, %v5532_v60  ;;  %vm800_vm13 = vcmp.eq.s32.totalorder %v5753_v44, %v5532_v60 }
 0x2b0   : >> { %3913 = vmatpush.bf16.msk.msra.mxu2 %vm3912_vm8, %v5222_v24  ;;  %vm3928_vm15 = vmpackc.low %vm808_vm10, %vm804_vm9  ;;  %vm789_vm9 = vcmp.eq.s32.totalorder %v5776_v51, %v5526_v57  ;;  %vm790_vm8 = vcmp.eq.s32.totalorder %v5776_v51, %v5528_v58 }
 0x2b1   : >> { %3929 = vmatpush.bf16.msk.msra.mxu3 %vm3928_vm15, %v5222_v24  ;;  %vm3882_vm1 = vmpackc.low %vm797_vm5, %vm793_vm12  ;;  %vm791_vm5 = vcmp.eq.s32.totalorder %v5776_v51, %v5530_v59 }
 0x2b2   : >> { %3883 = vmatpush.bf16.msk.msra.mxu0 %vm3882_vm1, %v5222_v24  ;;  %vm3898_vm11 = vmpackc.low %vm798_vm7, %vm794_vm4  ;;  %vm785_vm1 = vcmp.eq.s32.totalorder %v5767_v48, %v5526_v57  ;;  %vm786_vm4 = vcmp.eq.s32.totalorder %v5767_v48, %v5528_v58  ;;  %vm792_vm7 = vcmp.eq.s32.totalorder %v5776_v51, %v5532_v60 }
 0x2b3   : >> { %3899 = vmatpush.bf16.msk.msra.mxu1 %vm3898_vm11, %v5222_v24  ;;  %vm3914_vm10 = vmpackc.low %vm799_vm2, %vm795_vm3  ;;  %vm787_vm3 = vcmp.eq.s32.totalorder %v5767_v48, %v5530_v59 }
 0x2b4   : >> { %3915 = vmatpush.bf16.msk.msra.mxu2 %vm3914_vm10, %v5222_v24  ;;  %vm3930_vm12 = vmpackc.low %vm800_vm13, %vm796_vm6  ;;  %4991 = vset.pattern.permute.xlu2 %v5223_v34  ;;  %v6026_v38 = vpop.permute.xlu1 %1082  ;;  %vm777_vm6 = vcmp.eq.s32.totalorder %v5769_v49, %v5526_v57  ;;  %vm781_vm13 = vcmp.eq.s32.totalorder %v5778_v53, %v5526_v57  ;;  %vm778_vm10 = vcmp.eq.s32.totalorder %v5769_v49, %v5528_v58 }
 0x2b5   : >> { %3931 = vmatpush.bf16.msk.msra.mxu3 %vm3930_vm12, %v5222_v24  ;;  %4990 = vset.pattern.permute.xlu1 %v5223_v34  ;;  %v6034_v39 = vpop.permute.xlu0 %1088  ;;  %v6036_v40 = vpop.permute.xlu2 %1392  ;;  %vm3884_vm2 = vmpackc.low %vm789_vm9, %vm785_vm1  ;;  %vm788_vm9 = vcmp.eq.s32.totalorder %v5767_v48, %v5532_v60  ;;  %vm779_vm1 = vcmp.eq.s32.totalorder %v5769_v49, %v5530_v59 }
 0x2b6   : >> { %2045 = vperm.xlu2 %4991, %v5548_v62   ;;  %2042 = vperm.xlu1 %4990, %v5545_v61   ;;  %vm3900_vm15 = vmpackc.low %vm790_vm8, %vm786_vm4  ;;  %vm782_vm8 = vcmp.eq.s32.totalorder %v5778_v53, %v5528_v58  ;;  %vm780_vm4 = vcmp.eq.s32.totalorder %v5769_v49, %v5532_v60  ;;  %v5224_v49 = vmov 5  }
 0x2b7   : >> { %2072 = vperm.xlu0 %4992, %v5587_v13   ;;  %3885 = vmatpush.bf16.msk.msra.mxu0 %vm3884_vm2, %v5222_v24  ;;  %vm3916_vm11 = vmpackc.low %vm791_vm5, %vm787_vm3  ;;  %vm783_vm5 = vcmp.eq.s32.totalorder %v5778_v53, %v5530_v59 }
 0x2b8   : >> { %3901 = vmatpush.bf16.msk.msra.mxu1 %vm3900_vm15, %v5222_v24  ;;  %3917 = vmatpush.bf16.msk.msra.mxu2 %vm3916_vm11, %v5222_v24  ;;  %vm3932_vm12 = vmpackc.low %vm792_vm7, %vm788_vm9  ;;  %vm784_vm15 = vcmp.eq.s32.totalorder %v5778_v53, %v5532_v60 }
 0x2b9   : >> { %3933 = vmatpush.bf16.msk.msra.mxu3 %vm3932_vm12, %v5222_v24  ;;  %vm3886_vm2 = vmpackc.low %vm781_vm13, %vm777_vm6  ;;  %vm1165_vm13 = vcmp.eq.s32.totalorder %v5969_v35, %v5526_v57  ;;  %vm1166_vm12 = vcmp.eq.s32.totalorder %v5969_v35, %v5528_v58 }
 0x2ba   : >> { %vm3902_vm3 = vmpackc.low %vm782_vm8, %vm778_vm10 }
 0x2bb   : >> { %3887 = vmatpush.bf16.msk.msra.mxu0 %vm3886_vm2, %v5222_v24  ;;  %vm3918_vm11 = vmpackc.low %vm783_vm5, %vm779_vm1  ;;  %vm1167_vm2 = vcmp.eq.s32.totalorder %v5969_v35, %v5530_v59 }
 0x2bc   : >> { %3903 = vmatpush.bf16.msk.msra.mxu1 %vm3902_vm3, %v5222_v24  ;;  %3919 = vmatpush.bf16.msk.msra.mxu2 %vm3918_vm11, %v5222_v24  ;;  %vm3934_vm7 = vmpackc.low %vm784_vm15, %vm780_vm4  ;;  %v6081_v41 = vpop.permute.xlu1 %1091  ;;  %vm1137_vm15 = vcmp.eq.s32.totalorder %v6026_v38, %v5526_v57  ;;  %vm1168_vm11 = vcmp.eq.s32.totalorder %v5969_v35, %v5532_v60  ;;  %v8083_v35 = vmov 0 }
 0x2bd   : >> { %3935 = vmatpush.bf16.msk.msra.mxu3 %vm3934_vm7, %v5222_v24  ;;  %v1098_v42 = vpop.permute.xlu0 %1097  ;;  %v6084_v44 = vpop.permute.xlu2 %1398 }
 0x2be   : >> { %2054 = vperm.xlu2 %4991, %v5557_v1   ;;  %2051 = vperm.xlu1 %4990, %v5554_v0   ;;  %vm1157_vm4 = vcmp.eq.s32.totalorder %v1098_v42, %v5526_v57  ;;  %vm1158_vm7 = vcmp.eq.s32.totalorder %v1098_v42, %v5528_v58 }
 0x2bf   : >> { %2081 = vperm.xlu0 %4992, %v5600_v20   ;;  %1009 = vmatmul.bf16.vlgmr.msra.gmra.mxu0 %v5524_v52 }
 0x2c0   : >> { %1022 = vmatmul.bf16.vlgmr.msra.gmra.mxu1 %v5524_v52  ;;  %1035 = vmatmul.bf16.vlgmr.msra.gmra.mxu2 %v5524_v52 }
 0x2c1   : >> { %1048 = vmatmul.bf16.vlgmr.msra.gmra.mxu3 %v5524_v52 }
 0x2c4   : >> { %v1101_v45 = vpop.permute.xlu1 %1100 }
 0x2c5   : >> { %v6093_v46 = vpop.permute.xlu2 %1407  ;;  %vm1161_vm6 = vcmp.eq.s32.totalorder %v1101_v45, %v5526_v57  ;;  %vm1162_vm9 = vcmp.eq.s32.totalorder %v1101_v45, %v5528_v58  ;;  %vm1163_vm10 = vcmp.eq.s32.totalorder %v1101_v45, %v5530_v59  ;;  %vm1164_vm1 = vcmp.eq.s32.totalorder %v1101_v45, %v5532_v60 }
 0x2c6   : >> { %2060 = vperm.xlu2 %4991, %v5569_v6   ;;  %2057 = vperm.xlu1 %4990, %v5560_v2   ;;  %v6102_v48 = vpop.permute.xlu0 %1386  ;;  %vm4000_vm8 = vmpackc.low %vm1165_vm13, %vm1161_vm6  ;;  %vm1138_vm6 = vcmp.eq.s32.totalorder %v6026_v38, %v5528_v58 }
 0x2c7   : >> { %4001 = vmatpush.bf16.msk.msrb.mxu0 %vm4000_vm8, %v5222_v24  ;;  %vm4016_vm5 = vmpackc.low %vm1166_vm12, %vm1162_vm9  ;;  %4993 = vset.pattern.permute.xlu0 %v5224_v49  ;;  %vm1153_vm9 = vcmp.eq.s32.totalorder %v5894_v29, %v5526_v57  ;;  %vm1141_vm8 = vcmp.eq.s32.totalorder %v5825_v21, %v5526_v57 }
 0x2c8   : >> { %4017 = vmatpush.bf16.msk.msrb.mxu1 %vm4016_vm5, %v5222_v24  ;;  %vm4032_vm3 = vmpackc.low %vm1167_vm2, %vm1163_vm10  ;;  %2370 = vperm.xlu0 %4993, %v5545_v61   ;;  %vm1159_vm10 = vcmp.eq.s32.totalorder %v1098_v42, %v5530_v59  ;;  %vm1154_vm5 = vcmp.eq.s32.totalorder %v5894_v29, %v5528_v58  ;;  %vm1160_vm2 = vcmp.eq.s32.totalorder %v1098_v42, %v5532_v60 }
 0x2c9   : >> { %4033 = vmatpush.bf16.msk.msrb.mxu2 %vm4032_vm3, %v5222_v24  ;;  %vm4048_vm13 = vmpackc.low %vm1168_vm11, %vm1164_vm1  ;;  %vm1142_vm3 = vcmp.eq.s32.totalorder %v5825_v21, %v5528_v58  ;;  %vm1155_vm11 = vcmp.eq.s32.totalorder %v5894_v29, %v5530_v59 }
 0x2ca   : >> { %4049 = vmatpush.bf16.msk.msrb.mxu3 %vm4048_vm13, %v5222_v24  ;;  %vm4002_vm12 = vmpackc.low %vm1157_vm4, %vm1153_vm9  ;;  %vm1145_vm13 = vcmp.eq.s32.totalorder %v6034_v39, %v5526_v57 }
 0x2cb   : >> { %vm6140_vm1 = vmpackc.low %vm1141_vm8, %vm1137_vm15  ;;  %4003 = vmatpush.bf16.msk.msrb.mxu0 %vm4002_vm12, %v5222_v24  ;;  %vm1149_vm15 = vcmp.eq.s32.totalorder %v6081_v41, %v5526_v57  ;;  %vm1133_vm8 = vcmp.eq.s32.totalorder %v5979_v37, %v5526_v57  ;;  %vm1156_vm12 = vcmp.eq.s32.totalorder %v5894_v29, %v5532_v60  ;;  %v5225_v29 = vmov 7  }
 0x2cc   : >> { %vm4018_vm4 = vmpackc.low %vm1158_vm7, %vm1154_vm5  ;;  %vm1146_vm5 = vcmp.eq.s32.totalorder %v6034_v39, %v5528_v58 }
 0x2cd   : >> { %vm6158_vm9 = vmpackc.low %vm1142_vm3, %vm1138_vm6  ;;  %4019 = vmatpush.bf16.msk.msrb.mxu1 %vm4018_vm4, %v5222_v24  ;;  %vm1134_vm3 = vcmp.eq.s32.totalorder %v5979_v37, %v5528_v58  ;;  %v6178_v53 = vpop.permute.xlu2 %1416  ;;  %v1390_v54 = vpop.permute.xlu1 %1389  ;;  %vm1129_vm6 = vcmp.eq.s32.totalorder %v5800_v15, %v5526_v57 }
 0x2ce   : >> { %vm4034_vm7 = vmpackc.low %vm1159_vm10, %vm1155_vm11  ;;  %vm1147_vm10 = vcmp.eq.s32.totalorder %v6034_v39, %v5530_v59  ;;  %2069 = vperm.xlu2 %4991, %v5584_v12   ;;  %v6188_v55 = vpop.permute.xlu0 %1401  ;;  %vm1130_vm11 = vcmp.eq.s32.totalorder %v5800_v15, %v5528_v58  ;;  %2066 = vperm.xlu1 %4990, %v5575_v8  }
 0x2cf   : >> { %4035 = vmatpush.bf16.msk.msrb.mxu2 %vm4034_vm7, %v5222_v24  ;;  %vm4050_vm4 = vmpackc.low %vm1160_vm2, %vm1156_vm12  ;;  %vm1148_vm7 = vcmp.eq.s32.totalorder %v6034_v39, %v5532_v60  ;;  %vm1152_vm12 = vcmp.eq.s32.totalorder %v6081_v41, %v5532_v60 }
 0x2d0   : >> { %4051 = vmatpush.bf16.msk.msrb.mxu3 %vm4050_vm4, %v5222_v24  ;;  %vm4004_vm2 = vmpackc.low %vm1149_vm15, %vm1145_vm13  ;;  %vm8060_vm13 = vcmp.eq.s32.totalorder %v6081_v41, %v5528_v58  ;;  %2385 = vperm.xlu0 %4993, %v5560_v2  }
 0x2d1   : >> { %vm6203_vm4 = vmpackc.low %vm1133_vm8, %vm1129_vm6  ;;  %4005 = vmatpush.bf16.msk.msrb.mxu0 %vm4004_vm2, %v5222_v24  ;;  %vm1139_vm8 = vcmp.eq.s32.totalorder %v6026_v38, %v5530_v59  ;;  %vm8063_vm2 = vcmp.eq.s32.totalorder %v6081_v41, %v5530_v59 }
 0x2d2   : >> { %vm4020_vm15 = vmpackc.low %vm8060_vm13, %vm1146_vm5  ;;  %vm1140_vm5 = vcmp.eq.s32.totalorder %v6026_v38, %v5532_v60  ;;  %vm1433_vm13 = vcmp.eq.s32.totalorder %v6102_v48, %v5526_v57 }
 0x2d3   : >> { %vm6222_vm6 = vmpackc.low %vm1134_vm3, %vm1130_vm11  ;;  %4021 = vmatpush.bf16.msk.msrb.mxu1 %vm4020_vm15, %v5222_v24  ;;  %vm1143_vm11 = vcmp.eq.s32.totalorder %v5825_v21, %v5530_v59  ;;  %vm1437_vm15 = vcmp.eq.s32.totalorder %v1390_v54, %v5526_v57 }
 0x2d4   : >> { %v8062_v3 = vsel %vm6222_vm6, 4294967295, %v8061_v3  ;;  %vm4036_vm14 = vmpackc.low %vm8063_vm2, %vm1147_vm10  ;;  %vm1144_vm10 = vcmp.eq.s32.totalorder %v5825_v21, %v5532_v60  ;;  %vm1434_vm2 = vcmp.eq.s32.totalorder %v6102_v48, %v5528_v58  ;;  %vm1439_vm6 = vcmp.eq.s32.totalorder %v1390_v54, %v5530_v59 }
 0x2d5   : >> { %4037 = vmatpush.bf16.msk.msrb.mxu2 %vm4036_vm14, %v5222_v24  ;;  %vm4052_vm3 = vmpackc.low %vm1152_vm12, %vm1148_vm7  ;;  %vm1438_vm14 = vcmp.eq.s32.totalorder %v1390_v54, %v5528_v58  ;;  %4007 = vmatpush.bf16.msk.msrb.mxu0 %vm6140_vm1, %v5222_v24  ;;  %vm1435_vm12 = vcmp.eq.s32.totalorder %v6102_v48, %v5530_v59  ;;  %v6265_v5 = vpop.permute.xlu2 %1425  ;;  %v6267_v10 = vpop.permute.xlu1 %1395  ;;  %vm1135_vm1 = vcmp.eq.s32.totalorder %v5979_v37, %v5530_v59 }
 0x2d6   : >> { %4053 = vmatpush.bf16.msk.msrb.mxu3 %vm4052_vm3, %v5222_v24  ;;  %vm4038_vm0 = vmpackc.low %vm1143_vm11, %vm1139_vm8  ;;  %vm1436_vm3 = vcmp.eq.s32.totalorder %v6102_v48, %v5532_v60  ;;  %vm1440_vm11 = vcmp.eq.s32.totalorder %v1390_v54, %v5532_v60  ;;  %2078 = vperm.xlu2 %4991, %v5597_v19   ;;  %v6277_v16 = vpop.permute.xlu0 %1410 }
 0x2d7   : >> { %vm4054_vm7 = vmpackc.low %vm1144_vm10, %vm1140_vm5  ;;  %4023 = vmatpush.bf16.msk.msrb.mxu1 %vm6158_vm9, %v5222_v24  ;;  %2075 = vperm.xlu1 %4990, %v5590_v14   ;;  %vm8072_vm10 = vnez %v8062_v3 }
 0x2d8   : >> { %vm6257_vm8 = vmpackc.low %vm1437_vm15, %vm1433_vm13  ;;  %vm1131_vm13 = vcmp.eq.s32.totalorder %v5800_v15, %v5530_v59  ;;  %vm1125_vm15 = vcmp.eq.s32.totalorder %v5971_v36, %v5526_v57  ;;  %2412 = vperm.xlu0 %4993, %v5607_v25  }
 0x2d9   : >> { %4039 = vmatpush.bf16.msk.msrb.mxu2 %vm4038_vm0, %v5222_v24  ;;  %vm6271_vm5 = vmpackc.low %vm1438_vm14, %vm1434_vm2  ;;  %vm1136_vm0 = vcmp.eq.s32.totalorder %v5979_v37, %v5532_v60  ;;  %4009 = vmatpush.bf16.msk.msrb.mxu0 %vm6203_vm4, %v5222_v24  ;;  %vm1132_vm2 = vcmp.eq.s32.totalorder %v5800_v15, %v5532_v60  ;;  %vm1126_vm14 = vcmp.eq.s32.totalorder %v5971_v36, %v5528_v58  ;;  %v5226_v37 = vmov 6  }
 0x2da   : >> { %4055 = vmatpush.bf16.msk.msrb.mxu3 %vm4054_vm7, %v5222_v24  ;;  %vm6284_vm9 = vmpackc.low %vm1439_vm6, %vm1435_vm12  ;;  %vm1121_vm12 = vcmp.eq.s32.totalorder %v5795_v9, %v5526_v57 }
 0x2db   : >> { %v8069_v17 = vsel %vm6284_vm9, 4294967295, %v8068_v17  ;;  %vm6301_vm6 = vmpackc.low %vm1440_vm11, %vm1436_vm3  ;;  %4025 = vmatpush.bf16.msk.msrb.mxu1 %vm8072_vm10, %v5222_v24  ;;  %vm1127_vm3 = vcmp.eq.s32.totalorder %v5971_v36, %v5530_v59 }
 0x2dc   : >> { %v8071_v18 = vsel %vm6301_vm6, 4294967295, %v8070_v18  ;;  %vm4040_vm4 = vmpackc.low %vm1135_vm1, %vm1131_vm13  ;;  %vm1122_vm1 = vcmp.eq.s32.totalorder %v5795_v9, %v5528_v58  ;;  %vm1128_vm13 = vcmp.eq.s32.totalorder %v5971_v36, %v5532_v60 }
 0x2dd   : >> { %4041 = vmatpush.bf16.msk.msrb.mxu2 %vm4040_vm4, %v5222_v24  ;;  %vm4056_vm7 = vmpackc.low %vm1136_vm0, %vm1132_vm2  ;;  %vm1123_vm0 = vcmp.eq.s32.totalorder %v5795_v9, %v5530_v59  ;;  %vm1113_vm4 = vcmp.eq.s32.totalorder %v5908_v32, %v5526_v57  ;;  %vm1117_vm2 = vcmp.eq.s32.totalorder %v5896_v30, %v5526_v57  ;;  %v6338_v15 = vpop.permute.xlu1 %1404 }
 0x2de   : >> { %4057 = vmatpush.bf16.msk.msrb.mxu3 %vm4056_vm7, %v5222_v24  ;;  %vm4010_vm11 = vmpackc.low %vm1125_vm15, %vm1121_vm12  ;;  %vm1124_vm7 = vcmp.eq.s32.totalorder %v5795_v9, %v5532_v60  ;;  %vm1114_vm12 = vcmp.eq.s32.totalorder %v5908_v32, %v5528_v58  ;;  %2087 = vperm.xlu2 %4991, %v5610_v26   ;;  %v6346_v9 = vpop.permute.xlu0 %1419  ;;  %v1715_v21 = vpop.permute.xlu2 %1714 }
 0x2df   : >> { %4011 = vmatpush.bf16.msk.msrb.mxu0 %vm4010_vm11, %v5222_v24  ;;  %vm4026_vm10 = vmpackc.low %vm1126_vm14, %vm1122_vm1  ;;  %vm1118_vm14 = vcmp.eq.s32.totalorder %v5896_v30, %v5528_v58  ;;  %vm1115_vm1 = vcmp.eq.s32.totalorder %v5908_v32, %v5530_v59  ;;  %2084 = vperm.xlu1 %4990, %v5607_v25  }
 0x2e0   : >> { %4027 = vmatpush.bf16.msk.msrb.mxu1 %vm4026_vm10, %v5222_v24  ;;  %vm4042_vm15 = vmpackc.low %vm1127_vm3, %vm1123_vm0  ;;  %vm1119_vm3 = vcmp.eq.s32.totalorder %v5896_v30, %v5530_v59  ;;  %vm1116_vm10 = vcmp.eq.s32.totalorder %v5908_v32, %v5532_v60  ;;  %vm1120_vm0 = vcmp.eq.s32.totalorder %v5896_v30, %v5532_v60  ;;  %2409 = vperm.xlu0 %4993, %v5600_v20   ;;  %v8077_v30 = vmov 0 }
 0x2e1   : >> { %4043 = vmatpush.bf16.msk.msrb.mxu2 %vm4042_vm15, %v5222_v24  ;;  %vm4058_vm11 = vmpackc.low %vm1128_vm13, %vm1124_vm7  ;;  %vm8073_vm7 = vnez %v8046_v27 }
 0x2e2   : >> { %4059 = vmatpush.bf16.msk.msrb.mxu3 %vm4058_vm11, %v5222_v24  ;;  %vm4012_vm13 = vmpackc.low %vm1117_vm2, %vm1113_vm4  ;;  %vm8074_vm11 = vnez %v8048_v28 }
 0x2e3   : >> { %4013 = vmatpush.bf16.msk.msrb.mxu0 %vm4012_vm13, %v5222_v24  ;;  %vm4028_vm15 = vmpackc.low %vm1118_vm14, %vm1114_vm12  ;;  %vm8075_vm12 = vnez %v8050_v31  ;;  %vm8076_vm14 = vnez %v8052_v33  ;;  %vm1762_vm13 = vcmp.eq.s32.totalorder %v1715_v21, %v5528_v58  ;;  %v8079_v31 = vmov 0 }
 0x2e4   : >> { %4029 = vmatpush.bf16.msk.msrb.mxu1 %vm4028_vm15, %v5222_v24  ;;  %vm4044_vm4 = vmpackc.low %vm1119_vm3, %vm1115_vm1  ;;  %vm1761_vm1 = vcmp.eq.s32.totalorder %v1715_v21, %v5526_v57  ;;  %v8081_v33 = vmov 0 }
 0x2e5   : >> { %4045 = vmatpush.bf16.msk.msrb.mxu2 %vm4044_vm4, %v5222_v24  ;;  %vm4060_vm2 = vmpackc.low %vm1120_vm0, %vm1116_vm10  ;;  %v6379_v22 = vpop.permute.xlu1 %1413  ;;  %vm1763_vm0 = vcmp.eq.s32.totalorder %v1715_v21, %v5530_v59 }
 0x2e6   : >> { %4061 = vmatpush.bf16.msk.msrb.mxu3 %vm4060_vm2, %v5222_v24  ;;  %4995 = vset.pattern.permute.xlu2 %v5224_v49  ;;  %v6385_v43 = vpop.permute.xlu2 %1723  ;;  %v1429_v23 = vpop.permute.xlu0 %1428  ;;  %vm1764_vm2 = vcmp.eq.s32.totalorder %v1715_v21, %v5532_v60 }
 0x2e7   : >> { %4015 = vmatpush.bf16.msk.msrb.mxu0 %vm8073_vm7, %v5222_v24  ;;  %4994 = vset.pattern.permute.xlu1 %v5224_v49 }
 0x2e8   : >> { %4031 = vmatpush.bf16.msk.msrb.mxu1 %vm8074_vm11, %v5222_v24  ;;  %2376 = vperm.xlu2 %4995, %v5551_v63   ;;  %vm1489_vm11 = vcmp.eq.s32.totalorder %v1429_v23, %v5526_v57 }
 0x2e9   : >> { %4047 = vmatpush.bf16.msk.msrb.mxu2 %vm8075_vm12, %v5222_v24  ;;  %2373 = vperm.xlu1 %4994, %v5548_v62  }
 0x2ea   : >> { %4063 = vmatpush.bf16.msk.msrb.mxu3 %vm8076_vm14, %v5222_v24  ;;  %2394 = vperm.xlu0 %4993, %v5575_v8   ;;  %vm1490_vm14 = vcmp.eq.s32.totalorder %v1429_v23, %v5528_v58 }
 0x2eb   : >> { %1337 = vmatmul.bf16.vlgmr.msrb.gmra.mxu0 %v5524_v52  ;;  %1350 = vmatmul.bf16.vlgmr.msrb.gmra.mxu1 %v5524_v52 }
 0x2ec   : >> { %1363 = vmatmul.bf16.vlgmr.msrb.gmra.mxu2 %v5524_v52 }
 0x2ed   : >> { %1376 = vmatmul.bf16.vlgmr.msrb.gmra.mxu3 %v5524_v52  ;;  %v1423_v47 = vpop.permute.xlu1 %1422 }
 0x2ee   : >> { %v6395_v27 = vpop.permute.xlu2 %1729 }
 0x2ef   : >> { %v1718_v28 = vpop.permute.xlu0 %1717 }
 0x2f0   : >> { %2382 = vperm.xlu2 %4995, %v5557_v1   ;;  %vm1765_vm3 = vcmp.eq.s32.totalorder %v1718_v28, %v5526_v57  ;;  %vm1766_vm10 = vcmp.eq.s32.totalorder %v1718_v28, %v5528_v58  ;;  %vm1767_vm15 = vcmp.eq.s32.totalorder %v1718_v28, %v5530_v59  ;;  %vm1768_vm7 = vcmp.eq.s32.totalorder %v1718_v28, %v5532_v60 }
 0x2f1   : >> { %2379 = vperm.xlu1 %4994, %v5554_v0   ;;  %vm6407_vm4 = vmpackc.low %vm1765_vm3, %vm1761_vm1  ;;  %vm1491_vm1 = vcmp.eq.s32.totalorder %v1429_v23, %v5530_v59 }
 0x2f2   : >> { %5001 = vset.pattern.permute.xlu0 %v5225_v29  ;;  %v8078_v30 = vsel %vm6407_vm4, 4294967295, %v8077_v30  ;;  %vm6414_vm12 = vmpackc.low %vm1766_vm10, %vm1762_vm13 }
 0x2f3   : >> { %3065 = vperm.xlu0 %5001, %v5600_v20   ;;  %v8080_v31 = vsel %vm6414_vm12, 4294967295, %v8079_v31  ;;  %vm6419_vm6 = vmpackc.low %vm1767_vm15, %vm1763_vm0  ;;  %vm1458_vm12 = vcmp.eq.s32.totalorder %v6338_v15, %v5528_v58 }
 0x2f4   : >> { %v8082_v33 = vsel %vm6419_vm6, 4294967295, %v8081_v33  ;;  %vm6429_vm13 = vmpackc.low %vm1768_vm7, %vm1764_vm2  ;;  %vm1481_vm7 = vcmp.eq.s32.totalorder %v1423_v47, %v5526_v57  ;;  %vm1471_vm6 = vcmp.eq.s32.totalorder %v6379_v22, %v5530_v59 }
 0x2f5   : >> { %v1432_v32 = vpop.permute.xlu1 %1431  ;;  %v8084_v35 = vsel %vm6429_vm13, 4294967295, %v8083_v35  ;;  %vm1482_vm13 = vcmp.eq.s32.totalorder %v1423_v47, %v5528_v58 }
 0x2f6   : >> { %vm1493_vm3 = vcmp.eq.s32.totalorder %v1432_v32, %v5526_v57  ;;  %vm1494_vm4 = vcmp.eq.s32.totalorder %v1432_v32, %v5528_v58  ;;  %vm1495_vm9 = vcmp.eq.s32.totalorder %v1432_v32, %v5530_v59  ;;  %v6427_v34 = vpop.permute.xlu2 %1738  ;;  %vm1496_vm0 = vcmp.eq.s32.totalorder %v1432_v32, %v5532_v60 }
 0x2f7   : >> { %v6436_v36 = vpop.permute.xlu0 %1732  ;;  %vm4128_vm15 = vmpackc.low %vm1493_vm3, %vm1489_vm11  ;;  %vm8085_vm11 = vcmp.eq.s32.totalorder %v1429_v23, %v5532_v60 }
 0x2f8   : >> { %2391 = vperm.xlu2 %4995, %v5572_v7   ;;  %4129 = vmatpush.bf16.msk.msra.mxu0 %vm4128_vm15, %v5222_v24  ;;  %vm4144_vm2 = vmpackc.low %vm1494_vm4, %vm1490_vm14  ;;  %vm1485_vm4 = vcmp.eq.s32.totalorder %v6265_v5, %v5526_v57  ;;  %vm1483_vm14 = vcmp.eq.s32.totalorder %v1423_v47, %v5530_v59  ;;  %vm1484_vm15 = vcmp.eq.s32.totalorder %v1423_v47, %v5532_v60 }
 0x2f9   : >> { %2388 = vperm.xlu1 %4994, %v5569_v6   ;;  %4145 = vmatpush.bf16.msk.msra.mxu1 %vm4144_vm2, %v5222_v24  ;;  %vm4160_vm10 = vmpackc.low %vm1495_vm9, %vm1491_vm1  ;;  %vm1486_vm1 = vcmp.eq.s32.totalorder %v6265_v5, %v5528_v58  ;;  %vm1477_vm2 = vcmp.eq.s32.totalorder %v6346_v9, %v5526_v57 }
 0x2fa   : >> { %4161 = vmatpush.bf16.msk.msra.mxu2 %vm4160_vm10, %v5222_v24  ;;  %vm4176_vm3 = vmpackc.low %vm1496_vm0, %vm8085_vm11  ;;  %vm1487_vm0 = vcmp.eq.s32.totalorder %v6265_v5, %v5530_v59 }
 0x2fb   : >> { %5002 = vset.pattern.permute.xlu0 %v5226_v37  ;;  %4177 = vmatpush.bf16.msk.msra.mxu3 %vm4176_vm3, %v5222_v24  ;;  %vm4130_vm9 = vmpackc.low %vm1485_vm4, %vm1481_vm7  ;;  %vm1488_vm7 = vcmp.eq.s32.totalorder %v6265_v5, %v5532_v60  ;;  %vm1478_vm3 = vcmp.eq.s32.totalorder %v6346_v9, %v5528_v58 }
 0x2fc   : >> { %2743 = vperm.xlu0 %5002, %v5610_v26   ;;  %4131 = vmatpush.bf16.msk.msra.mxu0 %vm4130_vm9, %v5222_v24  ;;  %vm4146_vm10 = vmpackc.low %vm1486_vm1, %vm1482_vm13  ;;  %vm1473_vm13 = vcmp.eq.s32.totalorder %v6178_v53, %v5526_v57  ;;  %vm1479_vm9 = vcmp.eq.s32.totalorder %v6346_v9, %v5530_v59  ;;  %vm1474_vm1 = vcmp.eq.s32.totalorder %v6178_v53, %v5528_v58 }
 0x2fd   : >> { %4147 = vmatpush.bf16.msk.msra.mxu1 %vm4146_vm10, %v5222_v24  ;;  %vm4162_vm11 = vmpackc.low %vm1487_vm0, %vm1483_vm14  ;;  %vm1475_vm0 = vcmp.eq.s32.totalorder %v6178_v53, %v5530_v59 }
 0x2fe   : >> { %4163 = vmatpush.bf16.msk.msra.mxu2 %vm4162_vm11, %v5222_v24  ;;  %vm4178_vm4 = vmpackc.low %vm1488_vm7, %vm1484_vm15  ;;  %v6472_v38 = vpop.permute.xlu2 %1747  ;;  %v6474_v39 = vpop.permute.xlu1 %1720  ;;  %vm1480_vm15 = vcmp.eq.s32.totalorder %v6346_v9, %v5532_v60  ;;  %vm1469_vm11 = vcmp.eq.s32.totalorder %v6379_v22, %v5526_v57 }
 0x2ff   : >> { %4179 = vmatpush.bf16.msk.msra.mxu3 %vm4178_vm4, %v5222_v24  ;;  %v6482_v41 = vpop.permute.xlu0 %1741  ;;  %vm4132_vm14 = vmpackc.low %vm1477_vm2, %vm1473_vm13  ;;  %vm1465_vm2 = vcmp.eq.s32.totalorder %v6277_v16, %v5526_v57  ;;  %vm1476_vm4 = vcmp.eq.s32.totalorder %v6178_v53, %v5532_v60  ;;  %vm1466_vm13 = vcmp.eq.s32.totalorder %v6277_v16, %v5528_v58 }
 0x300   : >> { %2406 = vperm.xlu2 %4995, %v5597_v19   ;;  %4133 = vmatpush.bf16.msk.msra.mxu0 %vm4132_vm14, %v5222_v24  ;;  %vm4148_vm10 = vmpackc.low %vm1478_vm3, %vm1474_vm1  ;;  %vm1470_vm3 = vcmp.eq.s32.totalorder %v6379_v22, %v5528_v58  ;;  %vm1467_vm1 = vcmp.eq.s32.totalorder %v6277_v16, %v5530_v59 }
 0x301   : >> { %2415 = vperm.xlu1 %4994, %v5610_v26   ;;  %4149 = vmatpush.bf16.msk.msra.mxu1 %vm4148_vm10, %v5222_v24  ;;  %vm4164_vm7 = vmpackc.low %vm1479_vm9, %vm1475_vm0  ;;  %vm1468_vm10 = vcmp.eq.s32.totalorder %v6277_v16, %v5532_v60  ;;  %vm1472_vm0 = vcmp.eq.s32.totalorder %v6379_v22, %v5532_v60 }
 0x302   : >> { %4165 = vmatpush.bf16.msk.msra.mxu2 %vm4164_vm7, %v5222_v24  ;;  %vm4180_vm14 = vmpackc.low %vm1480_vm15, %vm1476_vm4  ;;  %vm1457_vm7 = vcmp.eq.s32.totalorder %v6338_v15, %v5526_v57 }
 0x303   : >> { %4181 = vmatpush.bf16.msk.msra.mxu3 %vm4180_vm14, %v5222_v24  ;;  %vm4134_vm9 = vmpackc.low %vm1469_vm11, %vm1465_vm2  ;;  %vm1461_vm11 = vcmp.eq.s32.totalorder %v6093_v46, %v5526_v57  ;;  %vm1460_vm14 = vcmp.eq.s32.totalorder %v6338_v15, %v5532_v60 }
 0x304   : >> { %2722 = vperm.xlu0 %5002, %v5575_v8   ;;  %4135 = vmatpush.bf16.msk.msra.mxu0 %vm4134_vm9, %v5222_v24  ;;  %vm4150_vm15 = vmpackc.low %vm1470_vm3, %vm1466_vm13  ;;  %vm1459_vm13 = vcmp.eq.s32.totalorder %v6338_v15, %v5530_v59  ;;  %vm1462_vm3 = vcmp.eq.s32.totalorder %v6093_v46, %v5528_v58  ;;  %vm1463_vm9 = vcmp.eq.s32.totalorder %v6093_v46, %v5530_v59 }
 0x305   : >> { %4151 = vmatpush.bf16.msk.msra.mxu1 %vm4150_vm15, %v5222_v24  ;;  %vm4166_vm4 = vmpackc.low %vm1471_vm6, %vm1467_vm1 }
 0x306   : >> { %4167 = vmatpush.bf16.msk.msra.mxu2 %vm4166_vm4, %v5222_v24  ;;  %vm4182_vm2 = vmpackc.low %vm1472_vm0, %vm1468_vm10  ;;  %v6524_v42 = vpop.permute.xlu2 %1756  ;;  %v6526_v45 = vpop.permute.xlu1 %1726  ;;  %vm1449_vm10 = vcmp.eq.s32.totalorder %v6084_v44, %v5526_v57  ;;  %vm1453_vm0 = vcmp.eq.s32.totalorder %v6188_v55, %v5526_v57  ;;  %vm1450_vm4 = vcmp.eq.s32.totalorder %v6084_v44, %v5528_v58 }
 0x307   : >> { %4183 = vmatpush.bf16.msk.msra.mxu3 %vm4182_vm2, %v5222_v24  ;;  %v6534_v48 = vpop.permute.xlu0 %1750  ;;  %vm4136_vm6 = vmpackc.low %vm1461_vm11, %vm1457_vm7  ;;  %vm1464_vm7 = vcmp.eq.s32.totalorder %v6093_v46, %v5532_v60  ;;  %vm1451_vm11 = vcmp.eq.s32.totalorder %v6084_v44, %v5530_v59 }
 0x308   : >> { %2403 = vperm.xlu2 %4995, %v5590_v14   ;;  %4137 = vmatpush.bf16.msk.msra.mxu0 %vm4136_vm6, %v5222_v24  ;;  %vm4152_vm1 = vmpackc.low %vm1462_vm3, %vm1458_vm12  ;;  %vm1454_vm12 = vcmp.eq.s32.totalorder %v6188_v55, %v5528_v58  ;;  %vm1455_vm6 = vcmp.eq.s32.totalorder %v6188_v55, %v5530_v59  ;;  %vm1452_vm3 = vcmp.eq.s32.totalorder %v6084_v44, %v5532_v60 }
 0x309   : >> { %2400 = vperm.xlu1 %4994, %v5587_v13   ;;  %4153 = vmatpush.bf16.msk.msra.mxu1 %vm4152_vm1, %v5222_v24  ;;  %vm4168_vm15 = vmpackc.low %vm1463_vm9, %vm1459_vm13  ;;  %vm1456_vm1 = vcmp.eq.s32.totalorder %v6188_v55, %v5532_v60  ;;  %vm1445_vm9 = vcmp.eq.s32.totalorder %v6267_v10, %v5526_v57 }
 0x30a   : >> { %4169 = vmatpush.bf16.msk.msra.mxu2 %vm4168_vm15, %v5222_v24  ;;  %vm4184_vm2 = vmpackc.low %vm1464_vm7, %vm1460_vm14  ;;  %vm1446_vm7 = vcmp.eq.s32.totalorder %v6267_v10, %v5528_v58 }
 0x30b   : >> { %4185 = vmatpush.bf16.msk.msra.mxu3 %vm4184_vm2, %v5222_v24  ;;  %vm4138_vm13 = vmpackc.low %vm1453_vm0, %vm1449_vm10  ;;  %vm1441_vm0 = vcmp.eq.s32.totalorder %v6036_v40, %v5526_v57  ;;  %vm1442_vm2 = vcmp.eq.s32.totalorder %v6036_v40, %v5528_v58 }
 0x30c   : >> { %2719 = vperm.xlu0 %5002, %v5572_v7   ;;  %4139 = vmatpush.bf16.msk.msra.mxu0 %vm4138_vm13, %v5222_v24  ;;  %vm4154_vm14 = vmpackc.low %vm1454_vm12, %vm1450_vm4  ;;  %vm1447_vm4 = vcmp.eq.s32.totalorder %v6267_v10, %v5530_v59  ;;  %vm1443_vm13 = vcmp.eq.s32.totalorder %v6036_v40, %v5530_v59 }
 0x30d   : >> { %4155 = vmatpush.bf16.msk.msra.mxu1 %vm4154_vm14, %v5222_v24  ;;  %vm4170_vm15 = vmpackc.low %vm1455_vm6, %vm1451_vm11  ;;  %vm1448_vm11 = vcmp.eq.s32.totalorder %v6267_v10, %v5532_v60 }
 0x30e   : >> { %4171 = vmatpush.bf16.msk.msra.mxu2 %vm4170_vm15, %v5222_v24  ;;  %vm4186_vm10 = vmpackc.low %vm1456_vm1, %vm1452_vm3  ;;  %v6576_v46 = vpop.permute.xlu1 %1735  ;;  %vm1444_vm1 = vcmp.eq.s32.totalorder %v6036_v40, %v5532_v60 }
 0x30f   : >> { %4187 = vmatpush.bf16.msk.msra.mxu3 %vm4186_vm10, %v5222_v24  ;;  %v1760_v44 = vpop.permute.xlu0 %1759  ;;  %vm4140_vm12 = vmpackc.low %vm1445_vm9, %vm1441_vm0  ;;  %vm1818_vm0 = vcmp.eq.s32.totalorder %v6524_v42, %v5528_v58 }
 0x310   : >> { %4996 = vset.pattern.permute.xlu2 %v5226_v37  ;;  %v6589_v49 = vpop.permute.xlu2 %2045  ;;  %vm4156_vm6 = vmpackc.low %vm1446_vm7, %vm1442_vm2  ;;  %4141 = vmatpush.bf16.msk.msra.mxu0 %vm4140_vm12, %v5222_v24  ;;  %vm1821_vm14 = vcmp.eq.s32.totalorder %v1760_v44, %v5526_v57  ;;  %vm1822_vm15 = vcmp.eq.s32.totalorder %v1760_v44, %v5528_v58  ;;  %vm1817_vm7 = vcmp.eq.s32.totalorder %v6524_v42, %v5526_v57 }
 0x311   : >> { %2397 = vperm.xlu1 %4994, %v5584_v12   ;;  %2740 = vperm.xlu2 %4996, %v5607_v25   ;;  %vm4172_vm3 = vmpackc.low %vm1447_vm4, %vm1443_vm13  ;;  %vm1823_vm10 = vcmp.eq.s32.totalorder %v1760_v44, %v5530_v59  ;;  %vm1824_vm4 = vcmp.eq.s32.totalorder %v1760_v44, %v5532_v60  ;;  %vm1819_vm2 = vcmp.eq.s32.totalorder %v6524_v42, %v5530_v59 }
 0x312   : >> { %4157 = vmatpush.bf16.msk.msra.mxu1 %vm4156_vm6, %v5222_v24  ;;  %4173 = vmatpush.bf16.msk.msra.mxu2 %vm4172_vm3, %v5222_v24  ;;  %vm4188_vm9 = vmpackc.low %vm1448_vm11, %vm1444_vm1  ;;  %vm8086_vm11 = vnez %v8069_v17  ;;  %vm1820_vm13 = vcmp.eq.s32.totalorder %v6524_v42, %v5532_v60  ;;  %vm8087_vm3 = vnez %v8071_v18  ;;  %vm1809_vm1 = vcmp.eq.s32.totalorder %v6534_v48, %v5526_v57 }
 0x313   : >> { %4189 = vmatpush.bf16.msk.msra.mxu3 %vm4188_vm9, %v5222_v24  ;;  %vm4256_vm12 = vmpackc.low %vm1821_vm14, %vm1817_vm7  ;;  %vm1793_vm14 = vcmp.eq.s32.totalorder %v6427_v34, %v5526_v57  ;;  %vm1810_vm9 = vcmp.eq.s32.totalorder %v6534_v48, %v5528_v58  ;;  %vm1798_vm7 = vcmp.eq.s32.totalorder %v6482_v41, %v5528_v58  ;;  %v8105_v17 = vmov 0 }
 0x314   : >> { %2710 = vperm.xlu0 %5002, %v5557_v1   ;;  %4143 = vmatpush.bf16.msk.msra.mxu0 %vm6257_vm8, %v5222_v24  ;;  %vm4272_vm6 = vmpackc.low %vm1822_vm15, %vm1818_vm0  ;;  %vm1797_vm15 = vcmp.eq.s32.totalorder %v6482_v41, %v5526_v57  ;;  %v8107_v18 = vmov 0 }
 0x315   : >> { %vm4288_vm8 = vmpackc.low %vm1823_vm10, %vm1819_vm2  ;;  %vm1799_vm10 = vcmp.eq.s32.totalorder %v6482_v41, %v5530_v59 }
 0x316   : >> { %4159 = vmatpush.bf16.msk.msra.mxu1 %vm6271_vm5, %v5222_v24  ;;  %4175 = vmatpush.bf16.msk.msra.mxu2 %vm8086_vm11, %v5222_v24  ;;  %vm4304_vm5 = vmpackc.low %vm1824_vm4, %vm1820_vm13 }
 0x317   : >> { %4191 = vmatpush.bf16.msk.msra.mxu3 %vm8087_vm3, %v5222_v24  ;;  %v6626_v40 = vpop.permute.xlu1 %1744  ;;  %1665 = vmatmul.bf16.vlgmr.msra.gmra.mxu0 %v5524_v52  ;;  %vm1794_vm3 = vcmp.eq.s32.totalorder %v6427_v34, %v5528_v58 }
 0x318   : >> { %4257 = vmatpush.bf16.msk.msrb.mxu0 %vm4256_vm12, %v5222_v24  ;;  %v6630_v50 = vpop.permute.xlu2 %2054  ;;  %vm1811_vm12 = vcmp.eq.s32.totalorder %v6534_v48, %v5530_v59 }
 0x319   : >> { %4997 = vset.pattern.permute.xlu1 %v5226_v37  ;;  %2737 = vperm.xlu2 %4996, %v5600_v20   ;;  %v6744_v3 = vpop.permute.xlu0 %2048 }
 0x31a   : >> { %4273 = vmatpush.bf16.msk.msrb.mxu1 %vm4272_vm6, %v5222_v24  ;;  %4289 = vmatpush.bf16.msk.msrb.mxu2 %vm4288_vm8, %v5222_v24  ;;  %vm1812_vm6 = vcmp.eq.s32.totalorder %v6534_v48, %v5532_v60  ;;  %vm6687_vm8 = vmpackc.low %vm1798_vm7, %vm1794_vm3 }
 0x31b   : >> { %4305 = vmatpush.bf16.msk.msrb.mxu3 %vm4304_vm5, %v5222_v24  ;;  %2734 = vperm.xlu1 %4997, %v5597_v19  }
 0x31c   : >> { %1704 = vmatmul.bf16.vlgmr.msra.gmra.mxu3 %v5524_v52  ;;  %1691 = vmatmul.bf16.vlgmr.msra.gmra.mxu2 %v5524_v52 }
 0x31d   : >> { %1678 = vmatmul.bf16.vlgmr.msra.gmra.mxu1 %v5524_v52  ;;  %2698 = vperm.xlu0 %5002, %v5545_v61  }
 0x31f   : >> { %v1754_v51 = vpop.permute.xlu1 %1753 }
 0x320   : >> { %v6653_v20 = vpop.permute.xlu2 %2060  ;;  %vm1813_vm0 = vcmp.eq.s32.totalorder %v1754_v51, %v5526_v57  ;;  %vm1814_vm4 = vcmp.eq.s32.totalorder %v1754_v51, %v5528_v58  ;;  %vm1815_vm2 = vcmp.eq.s32.totalorder %v1754_v51, %v5530_v59  ;;  %vm1816_vm13 = vcmp.eq.s32.totalorder %v1754_v51, %v5532_v60 }
 0x321   : >> { %vm4258_vm11 = vmpackc.low %vm1813_vm0, %vm1809_vm1  ;;  %2731 = vperm.xlu2 %4996, %v5590_v14   ;;  %vm1801_vm1 = vcmp.eq.s32.totalorder %v6626_v40, %v5526_v57  ;;  %v6859_v9 = vpop.permute.xlu0 %2063 }
 0x322   : >> { %vm4274_vm5 = vmpackc.low %vm1814_vm4, %vm1810_vm9  ;;  %vm1795_vm9 = vcmp.eq.s32.totalorder %v6427_v34, %v5530_v59  ;;  %4259 = vmatpush.bf16.msk.msrb.mxu0 %vm4258_vm11, %v5222_v24  ;;  %vm1796_vm4 = vcmp.eq.s32.totalorder %v6427_v34, %v5532_v60  ;;  %vm8094_vm11 = vcmp.eq.s32.totalorder %v6482_v41, %v5532_v60 }
 0x323   : >> { %2728 = vperm.xlu1 %4997, %v5587_v13   ;;  %vm6680_vm0 = vmpackc.low %vm1797_vm15, %vm1793_vm14  ;;  %4275 = vmatpush.bf16.msk.msrb.mxu1 %vm4274_vm5, %v5222_v24  ;;  %vm1802_vm15 = vcmp.eq.s32.totalorder %v6626_v40, %v5528_v58 }
 0x324   : >> { %vm4290_vm14 = vmpackc.low %vm1815_vm2, %vm1811_vm12  ;;  %vm1805_vm2 = vcmp.eq.s32.totalorder %v6472_v38, %v5526_v57 }
 0x325   : >> { %vm6705_vm7 = vmpackc.low %vm1799_vm10, %vm1795_vm9  ;;  %4291 = vmatpush.bf16.msk.msrb.mxu2 %vm4290_vm14, %v5222_v24  ;;  %vm1803_vm10 = vcmp.eq.s32.totalorder %v6626_v40, %v5530_v59  ;;  %5008 = vset.pattern.permute.xlu0 %v5225_v29  ;;  %vm1807_vm14 = vcmp.eq.s32.totalorder %v6472_v38, %v5530_v59 }
 0x326   : >> { %vm4306_vm12 = vmpackc.low %vm1816_vm13, %vm1812_vm6  ;;  %vm1806_vm6 = vcmp.eq.s32.totalorder %v6472_v38, %v5528_v58  ;;  %vm1804_vm13 = vcmp.eq.s32.totalorder %v6626_v40, %v5532_v60  ;;  %3047 = vperm.xlu0 %5008, %v5572_v7  }
 0x327   : >> { %vm6724_vm3 = vmpackc.low %vm8094_vm11, %vm1796_vm4  ;;  %4307 = vmatpush.bf16.msk.msrb.mxu3 %vm4306_vm12, %v5222_v24  ;;  %vm1785_vm4 = vcmp.eq.s32.totalorder %v6436_v36, %v5526_v57  ;;  %vm1789_vm12 = vcmp.eq.s32.totalorder %v6576_v46, %v5526_v57  ;;  %vm1790_vm11 = vcmp.eq.s32.totalorder %v6576_v46, %v5528_v58 }
 0x328   : >> { %vm4260_vm5 = vmpackc.low %vm1805_vm2, %vm1801_vm1  ;;  %vm1786_vm2 = vcmp.eq.s32.totalorder %v6436_v36, %v5528_v58  ;;  %v6761_v7 = vpop.permute.xlu2 %2069  ;;  %v2043_v4 = vpop.permute.xlu1 %2042 }
 0x329   : >> { %vm4276_vm9 = vmpackc.low %vm1806_vm6, %vm1802_vm15  ;;  %4261 = vmatpush.bf16.msk.msrb.mxu0 %vm4260_vm5, %v5222_v24  ;;  %vm1808_vm15 = vcmp.eq.s32.totalorder %v6472_v38, %v5532_v60  ;;  %2716 = vperm.xlu2 %4996, %v5569_v6   ;;  %v6897_v21 = vpop.permute.xlu0 %2072 }
 0x32a   : >> { %4277 = vmatpush.bf16.msk.msrb.mxu1 %vm4276_vm9, %v5222_v24  ;;  %vm4292_vm1 = vmpackc.low %vm1807_vm14, %vm1803_vm10  ;;  %vm2093_vm10 = vcmp.eq.s32.totalorder %v6589_v49, %v5526_v57  ;;  %vm2095_vm9 = vcmp.eq.s32.totalorder %v6589_v49, %v5530_v59 }
 0x32b   : >> { %4293 = vmatpush.bf16.msk.msrb.mxu2 %vm4292_vm1, %v5222_v24  ;;  %vm4308_vm5 = vmpackc.low %vm1808_vm15, %vm1804_vm13  ;;  %vm2094_vm13 = vcmp.eq.s32.totalorder %v6589_v49, %v5528_v58  ;;  %2725 = vperm.xlu1 %4997, %v5584_v12   ;;  %vm2089_vm1 = vcmp.eq.s32.totalorder %v2043_v4, %v5526_v57 }
 0x32c   : >> { %4309 = vmatpush.bf16.msk.msrb.mxu3 %vm4308_vm5, %v5222_v24  ;;  %vm6772_vm6 = vmpackc.low %vm1789_vm12, %vm1785_vm4  ;;  %vm2090_vm4 = vcmp.eq.s32.totalorder %v2043_v4, %v5528_v58  ;;  %vm2091_vm12 = vcmp.eq.s32.totalorder %v2043_v4, %v5530_v59  ;;  %vm1791_vm5 = vcmp.eq.s32.totalorder %v6576_v46, %v5530_v59 }
 0x32d   : >> { %vm6782_vm14 = vmpackc.low %vm1790_vm11, %vm1786_vm2  ;;  %4263 = vmatpush.bf16.msk.msrb.mxu0 %vm6680_vm0, %v5222_v24  ;;  %vm2092_vm2 = vcmp.eq.s32.totalorder %v2043_v4, %v5532_v60  ;;  %vm2096_vm11 = vcmp.eq.s32.totalorder %v6589_v49, %v5532_v60  ;;  %vm1787_vm0 = vcmp.eq.s32.totalorder %v6436_v36, %v5530_v59 }
 0x32e   : >> { %4279 = vmatpush.bf16.msk.msrb.mxu1 %vm6687_vm8, %v5222_v24  ;;  %vm6795_vm15 = vmpackc.low %vm2093_vm10, %vm2089_vm1  ;;  %vm1792_vm10 = vcmp.eq.s32.totalorder %v6576_v46, %v5532_v60  ;;  %3026 = vperm.xlu0 %5008, %v5545_v61  }
 0x32f   : >> { %4295 = vmatpush.bf16.msk.msrb.mxu2 %vm6705_vm7, %v5222_v24  ;;  %vm6812_vm8 = vmpackc.low %vm2094_vm13, %vm2090_vm4  ;;  %vm1788_vm7 = vcmp.eq.s32.totalorder %v6436_v36, %v5532_v60  ;;  %vm1777_vm13 = vcmp.eq.s32.totalorder %v6526_v45, %v5526_v57 }
 0x330   : >> { %4311 = vmatpush.bf16.msk.msrb.mxu3 %vm6724_vm3, %v5222_v24  ;;  %vm6826_vm1 = vmpackc.low %vm2095_vm9, %vm2091_vm12  ;;  %vm1778_vm9 = vcmp.eq.s32.totalorder %v6526_v45, %v5528_v58  ;;  %v6846_v61 = vpop.permute.xlu2 %2078  ;;  %v6848_v15 = vpop.permute.xlu1 %2051 }
 0x331   : >> { %v8106_v17 = vsel %vm6826_vm1, 4294967295, %v8105_v17  ;;  %vm6833_vm4 = vmpackc.low %vm2096_vm11, %vm2092_vm2  ;;  %4265 = vmatpush.bf16.msk.msrb.mxu0 %vm6772_vm6, %v5222_v24  ;;  %vm1781_vm2 = vcmp.eq.s32.totalorder %v6395_v27, %v5526_v57  ;;  %vm1779_vm6 = vcmp.eq.s32.totalorder %v6526_v45, %v5530_v59  ;;  %vm1782_vm11 = vcmp.eq.s32.totalorder %v6395_v27, %v5528_v58  ;;  %4999 = vset.pattern.permute.xlu2 %v5225_v29 }
 0x332   : >> { %v8108_v18 = vsel %vm6833_vm4, 4294967295, %v8107_v18  ;;  %4281 = vmatpush.bf16.msk.msrb.mxu1 %vm6782_vm14, %v5222_v24  ;;  %vm4296_vm3 = vmpackc.low %vm1791_vm5, %vm1787_vm0  ;;  %vm1780_vm0 = vcmp.eq.s32.totalorder %v6526_v45, %v5532_v60  ;;  %3071 = vperm.xlu2 %4999, %v5610_v26  }
 0x333   : >> { %4297 = vmatpush.bf16.msk.msrb.mxu2 %vm4296_vm3, %v5222_v24  ;;  %vm4312_vm12 = vmpackc.low %vm1792_vm10, %vm1788_vm7  ;;  %4998 = vset.pattern.permute.xlu1 %v5225_v29  ;;  %vm1783_vm7 = vcmp.eq.s32.totalorder %v6395_v27, %v5530_v59  ;;  %vm1769_vm10 = vcmp.eq.s32.totalorder %v6474_v39, %v5526_v57  ;;  %vm1784_vm3 = vcmp.eq.s32.totalorder %v6395_v27, %v5532_v60 }
 0x334   : >> { %4313 = vmatpush.bf16.msk.msrb.mxu3 %vm4312_vm12, %v5222_v24  ;;  %vm4266_vm14 = vmpackc.low %vm1781_vm2, %vm1777_vm13  ;;  %3068 = vperm.xlu1 %4998, %v5607_v25   ;;  %vm1770_vm12 = vcmp.eq.s32.totalorder %v6474_v39, %v5528_v58  ;;  %vm1773_vm2 = vcmp.eq.s32.totalorder %v6385_v43, %v5526_v57 }
 0x335   : >> { %vm4282_vm5 = vmpackc.low %vm1782_vm11, %vm1778_vm9  ;;  %4267 = vmatpush.bf16.msk.msrb.mxu0 %vm4266_vm14, %v5222_v24  ;;  %vm1771_vm11 = vcmp.eq.s32.totalorder %v6474_v39, %v5530_v59  ;;  %vm1772_vm14 = vcmp.eq.s32.totalorder %v6474_v39, %v5532_v60 }
 0x336   : >> { %vm4298_vm13 = vmpackc.low %vm1783_vm7, %vm1779_vm6  ;;  %4283 = vmatpush.bf16.msk.msrb.mxu1 %vm4282_vm5, %v5222_v24  ;;  %vm1774_vm7 = vcmp.eq.s32.totalorder %v6385_v43, %v5528_v58 }
 0x337   : >> { %vm4314_vm9 = vmpackc.low %vm1784_vm3, %vm1780_vm0  ;;  %4299 = vmatpush.bf16.msk.msrb.mxu2 %vm4298_vm13, %v5222_v24  ;;  %vm1775_vm0 = vcmp.eq.s32.totalorder %v6385_v43, %v5530_v59  ;;  %vm1776_vm3 = vcmp.eq.s32.totalorder %v6385_v43, %v5532_v60  ;;  %v2082_v43 = vpop.permute.xlu0 %2081 }
 0x338   : >> { %4315 = vmatpush.bf16.msk.msrb.mxu3 %vm4314_vm9, %v5222_v24  ;;  %vm4268_vm6 = vmpackc.low %vm1773_vm2, %vm1769_vm10  ;;  %v2088_v25 = vpop.permute.xlu2 %2087  ;;  %v6891_v26 = vpop.permute.xlu1 %2057  ;;  %vm8109_vm10 = vnez %v8078_v30  ;;  %vm8112_vm9 = vnez %v8084_v35 }
 0x339   : >> { %vm4284_vm4 = vmpackc.low %vm1774_vm7, %vm1770_vm12  ;;  %4269 = vmatpush.bf16.msk.msrb.mxu0 %vm4268_vm6, %v5222_v24  ;;  %vm8111_vm12 = vnez %v8082_v33  ;;  %vm2149_vm2 = vcmp.eq.s32.totalorder %v2088_v25, %v5526_v57 }
 0x33a   : >> { %vm4300_vm5 = vmpackc.low %vm1775_vm0, %vm1771_vm11  ;;  %4285 = vmatpush.bf16.msk.msrb.mxu1 %vm4284_vm4, %v5222_v24  ;;  %3062 = vperm.xlu2 %4999, %v5597_v19   ;;  %vm8110_vm4 = vnez %v8080_v31 }
 0x33b   : >> { %vm4316_vm13 = vmpackc.low %vm1776_vm3, %vm1772_vm14  ;;  %4301 = vmatpush.bf16.msk.msrb.mxu2 %vm4300_vm5, %v5222_v24  ;;  %vm2150_vm14 = vcmp.eq.s32.totalorder %v2088_v25, %v5528_v58  ;;  %vm2151_vm3 = vcmp.eq.s32.totalorder %v2088_v25, %v5530_v59 }
 0x33c   : >> { %4317 = vmatpush.bf16.msk.msrb.mxu3 %vm4316_vm13, %v5222_v24  ;;  %5000 = vset.pattern.permute.xlu1 %v5226_v37 }
 0x33d   : >> { %2713 = vperm.xlu1 %5000, %v5560_v2   ;;  %4271 = vmatpush.bf16.msk.msrb.mxu0 %vm8109_vm10, %v5222_v24  ;;  %vm2137_vm10 = vcmp.eq.s32.totalorder %v6846_v61, %v5526_v57  ;;  %v7097_v32 = vpop.f32.mrf.mxu1 }
 0x33e   : >> { %4287 = vmatpush.bf16.msk.msrb.mxu1 %vm8110_vm4, %v5222_v24  ;;  %vm2141_vm4 = vcmp.eq.s32.totalorder %v2082_v43, %v5526_v57 }
 0x33f   : >> { %4303 = vmatpush.bf16.msk.msrb.mxu2 %vm8111_vm12, %v5222_v24  ;;  %v6931_v27 = vpop.permute.xlu0 %2370  ;;  %vm2152_vm12 = vcmp.eq.s32.totalorder %v2088_v25, %v5532_v60 }
 0x340   : >> { %4319 = vmatpush.bf16.msk.msrb.mxu3 %vm8112_vm9, %v5222_v24  ;;  %1993 = vmatmul.bf16.vlgmr.msrb.gmra.mxu0 %v5524_v52  ;;  %v6916_v19 = vpop.permute.xlu1 %2066 }
 0x341   : >> { %2006 = vmatmul.bf16.vlgmr.msrb.gmra.mxu1 %v5524_v52 }
 0x342   : >> { %2019 = vmatmul.bf16.vlgmr.msrb.gmra.mxu2 %v5524_v52  ;;  %v6918_v22 = vpop.permute.xlu2 %2376  ;;  %5003 = vset.pattern.permute.xlu2 %v5226_v37 }
 0x343   : >> { %2032 = vmatmul.bf16.vlgmr.msrb.gmra.mxu3 %v5524_v52  ;;  %2707 = vperm.xlu2 %5003, %v5554_v0   ;;  %v7133_v34 = vpop.f32.mrf.mxu2 }
 0x344   : >> { %v7099_v33 = vpop.f32.mrf.mxu3 }
 0x345   : >> { %2704 = vperm.xlu1 %5000, %v5551_v63   ;;  %v1025_v36 = vpop.f32.mrf.mxu1 }
 0x349   : >> { %v6923_v23 = vpop.permute.xlu1 %2075 }
 0x34a   : >> { %v6925_v47 = vpop.permute.xlu2 %2382 }
 0x34b   : >> { %5005 = vset.pattern.permute.xlu2 %v5225_v29  ;;  %v1038_v41 = vpop.f32.mrf.mxu2 }
 0x34c   : >> { %3059 = vperm.xlu2 %5005, %v5590_v14  }
 0x34d   : >> { %5004 = vset.pattern.permute.xlu1 %v5225_v29 }
 0x34e   : >> { %3056 = vperm.xlu1 %5004, %v5587_v13  }
 0x351   : >> { %v2085_v28 = vpop.permute.xlu1 %2084 }
 0x352   : >> { %vm2145_vm11 = vcmp.eq.s32.totalorder %v2085_v28, %v5526_v57  ;;  %vm2146_vm6 = vcmp.eq.s32.totalorder %v2085_v28, %v5528_v58  ;;  %vm2147_vm7 = vcmp.eq.s32.totalorder %v2085_v28, %v5530_v59  ;;  %vm2148_vm0 = vcmp.eq.s32.totalorder %v2085_v28, %v5532_v60  ;;  %v6939_v30 = vpop.permute.xlu2 %2391 }
 0x353   : >> { %vm4384_vm5 = vmpackc.low %vm2149_vm2, %vm2145_vm11  ;;  %vm2138_vm2 = vcmp.eq.s32.totalorder %v6846_v61, %v5528_v58  ;;  %vm2142_vm11 = vcmp.eq.s32.totalorder %v2082_v43, %v5528_v58 }
 0x354   : >> { %4385 = vmatpush.bf16.msk.msra.mxu0 %vm4384_vm5, %v5222_v24  ;;  %vm4400_vm13 = vmpackc.low %vm2150_vm14, %vm2146_vm6  ;;  %3050 = vperm.xlu2 %5005, %v5575_v8   ;;  %vm2139_vm14 = vcmp.eq.s32.totalorder %v6846_v61, %v5530_v59  ;;  %vm2143_vm5 = vcmp.eq.s32.totalorder %v2082_v43, %v5530_v59  ;;  %v6967_v8 = vpop.permute.xlu0 %2385 }
 0x355   : >> { %vm4416_vm9 = vmpackc.low %vm2151_vm3, %vm2147_vm7  ;;  %4401 = vmatpush.bf16.msk.msra.mxu1 %vm4400_vm13, %v5222_v24  ;;  %vm2140_vm3 = vcmp.eq.s32.totalorder %v6846_v61, %v5532_v60  ;;  %vm2144_vm13 = vcmp.eq.s32.totalorder %v2082_v43, %v5532_v60 }
 0x356   : >> { %5006 = vset.pattern.permute.xlu1 %v5226_v37  ;;  %4417 = vmatpush.bf16.msk.msra.mxu2 %vm4416_vm9, %v5222_v24  ;;  %vm4432_vm6 = vmpackc.low %vm2152_vm12, %vm2148_vm0  ;;  %vm2129_vm12 = vcmp.eq.s32.totalorder %v6897_v21, %v5526_v57  ;;  %vm2133_vm9 = vcmp.eq.s32.totalorder %v6923_v23, %v5526_v57  ;;  %v1051_v37 = vpop.f32.mrf.mxu3 }
 0x357   : >> { %4433 = vmatpush.bf16.msk.msra.mxu3 %vm4432_vm6, %v5222_v24  ;;  %2701 = vperm.xlu1 %5006, %v5548_v62   ;;  %vm4386_vm7 = vmpackc.low %vm2141_vm4, %vm2137_vm10  ;;  %vm2130_vm10 = vcmp.eq.s32.totalorder %v6897_v21, %v5528_v58  ;;  %vm2134_vm4 = vcmp.eq.s32.totalorder %v6923_v23, %v5528_v58 }
 0x358   : >> { %4387 = vmatpush.bf16.msk.msra.mxu0 %vm4386_vm7, %v5222_v24  ;;  %vm4402_vm0 = vmpackc.low %vm2142_vm11, %vm2138_vm2  ;;  %vm2131_vm2 = vcmp.eq.s32.totalorder %v6897_v21, %v5530_v59  ;;  %vm2135_vm11 = vcmp.eq.s32.totalorder %v6923_v23, %v5530_v59  ;;  %vm2136_vm7 = vcmp.eq.s32.totalorder %v6923_v23, %v5532_v60 }
 0x359   : >> { %vm4418_vm6 = vmpackc.low %vm2143_vm5, %vm2139_vm14  ;;  %4403 = vmatpush.bf16.msk.msra.mxu1 %vm4402_vm0, %v5222_v24  ;;  %vm2132_vm5 = vcmp.eq.s32.totalorder %v6897_v21, %v5532_v60 }
 0x35a   : >> { %4419 = vmatpush.bf16.msk.msra.mxu2 %vm4418_vm6, %v5222_v24  ;;  %vm4434_vm1 = vmpackc.low %vm2144_vm13, %vm2140_vm3  ;;  %vm2121_vm13 = vcmp.eq.s32.totalorder %v6916_v19, %v5526_v57  ;;  %v6994_v14 = vpop.permute.xlu2 %2406  ;;  %vm2123_vm6 = vcmp.eq.s32.totalorder %v6916_v19, %v5530_v59 }
 0x35b   : >> { %v6980_v13 = vpop.permute.xlu1 %2373  ;;  %4435 = vmatpush.bf16.msk.msra.mxu3 %vm4434_vm1, %v5222_v24  ;;  %vm4388_vm14 = vmpackc.low %vm2133_vm9, %vm2129_vm12  ;;  %vm2122_vm1 = vcmp.eq.s32.totalorder %v6916_v19, %v5528_v58  ;;  %vm2125_vm9 = vcmp.eq.s32.totalorder %v6761_v7, %v5526_v57 }
 0x35c   : >> { %4389 = vmatpush.bf16.msk.msra.mxu0 %vm4388_vm14, %v5222_v24  ;;  %vm4404_vm3 = vmpackc.low %vm2134_vm4, %vm2130_vm10  ;;  %3044 = vperm.xlu2 %5005, %v5569_v6   ;;  %vm2126_vm4 = vcmp.eq.s32.totalorder %v6761_v7, %v5528_v58  ;;  %vm2127_vm14 = vcmp.eq.s32.totalorder %v6761_v7, %v5530_v59  ;;  %v7025_v6 = vpop.permute.xlu0 %2412 }
 0x35d   : >> { %vm4420_vm0 = vmpackc.low %vm2135_vm11, %vm2131_vm2  ;;  %4405 = vmatpush.bf16.msk.msra.mxu1 %vm4404_vm3, %v5222_v24  ;;  %vm2124_vm2 = vcmp.eq.s32.totalorder %v6916_v19, %v5532_v60 }
 0x35e   : >> { %4421 = vmatpush.bf16.msk.msra.mxu2 %vm4420_vm0, %v5222_v24  ;;  %vm4436_vm12 = vmpackc.low %vm2136_vm7, %vm2132_vm5  ;;  %vm2113_vm5 = vcmp.eq.s32.totalorder %v6653_v20, %v5526_v57  ;;  %vm2117_vm7 = vcmp.eq.s32.totalorder %v6859_v9, %v5526_v57  ;;  %vm2114_vm0 = vcmp.eq.s32.totalorder %v6653_v20, %v5528_v58 }
 0x35f   : >> { %4437 = vmatpush.bf16.msk.msra.mxu3 %vm4436_vm12, %v5222_v24  ;;  %5007 = vset.pattern.permute.xlu1 %v5225_v29  ;;  %vm4390_vm10 = vmpackc.low %vm2125_vm9, %vm2121_vm13  ;;  %vm2128_vm13 = vcmp.eq.s32.totalorder %v6761_v7, %v5532_v60  ;;  %vm2118_vm12 = vcmp.eq.s32.totalorder %v6859_v9, %v5528_v58  ;;  %vm2115_vm9 = vcmp.eq.s32.totalorder %v6653_v20, %v5530_v59 }
 0x360   : >> { %3053 = vperm.xlu1 %5007, %v5584_v12   ;;  %4391 = vmatpush.bf16.msk.msra.mxu0 %vm4390_vm10, %v5222_v24  ;;  %vm4406_vm11 = vmpackc.low %vm2126_vm4, %vm2122_vm1  ;;  %vm2116_vm4 = vcmp.eq.s32.totalorder %v6653_v20, %v5532_v60 }
 0x361   : >> { %vm4422_vm3 = vmpackc.low %vm2127_vm14, %vm2123_vm6  ;;  %4407 = vmatpush.bf16.msk.msra.mxu1 %vm4406_vm11, %v5222_v24  ;;  %vm2119_vm6 = vcmp.eq.s32.totalorder %v6859_v9, %v5530_v59  ;;  %vm2120_vm11 = vcmp.eq.s32.totalorder %v6859_v9, %v5532_v60  ;;  %vm2109_vm14 = vcmp.eq.s32.totalorder %v6891_v26, %v5526_v57 }
 0x362   : >> { %4423 = vmatpush.bf16.msk.msra.mxu2 %vm4422_vm3, %v5222_v24  ;;  %vm4438_vm1 = vmpackc.low %vm2128_vm13, %vm2124_vm2  ;;  %vm2110_vm13 = vcmp.eq.s32.totalorder %v6891_v26, %v5528_v58  ;;  %v7052_v29 = vpop.permute.xlu2 %2403 }
 0x363   : >> { %v7029_v12 = vpop.permute.xlu1 %2379  ;;  %4439 = vmatpush.bf16.msk.msra.mxu3 %vm4438_vm1, %v5222_v24  ;;  %vm4392_vm10 = vmpackc.low %vm2117_vm7, %vm2113_vm5  ;;  %vm2105_vm7 = vcmp.eq.s32.totalorder %v6630_v50, %v5526_v57  ;;  %vm2106_vm1 = vcmp.eq.s32.totalorder %v6630_v50, %v5528_v58 }
 0x364   : >> { %4393 = vmatpush.bf16.msk.msra.mxu0 %vm4392_vm10, %v5222_v24  ;;  %vm4408_vm2 = vmpackc.low %vm2118_vm12, %vm2114_vm0  ;;  %3041 = vperm.xlu2 %5005, %v5560_v2   ;;  %vm2111_vm0 = vcmp.eq.s32.totalorder %v6891_v26, %v5530_v59  ;;  %vm2107_vm10 = vcmp.eq.s32.totalorder %v6630_v50, %v5530_v59  ;;  %v2410_v2 = vpop.permute.xlu0 %2409 }
 0x365   : >> { %vm4424_vm3 = vmpackc.low %vm2119_vm6, %vm2115_vm9  ;;  %4409 = vmatpush.bf16.msk.msra.mxu1 %vm4408_vm2, %v5222_v24  ;;  %vm2112_vm9 = vcmp.eq.s32.totalorder %v6891_v26, %v5532_v60 }
 0x366   : >> { %4425 = vmatpush.bf16.msk.msra.mxu2 %vm4424_vm3, %v5222_v24  ;;  %vm4440_vm5 = vmpackc.low %vm2120_vm11, %vm2116_vm4  ;;  %vm2097_vm4 = vcmp.eq.s32.totalorder %v6744_v3, %v5526_v57  ;;  %vm2101_vm11 = vcmp.eq.s32.totalorder %v6848_v15, %v5526_v57  ;;  %vm2098_vm3 = vcmp.eq.s32.totalorder %v6744_v3, %v5528_v58 }
 0x367   : >> { %4441 = vmatpush.bf16.msk.msra.mxu3 %vm4440_vm5, %v5222_v24  ;;  %vm4394_vm12 = vmpackc.low %vm2109_vm14, %vm2105_vm7  ;;  %vm2108_vm14 = vcmp.eq.s32.totalorder %v6630_v50, %v5532_v60  ;;  %vm2102_vm5 = vcmp.eq.s32.totalorder %v6848_v15, %v5528_v58  ;;  %vm2099_vm7 = vcmp.eq.s32.totalorder %v6744_v3, %v5530_v59 }
 0x368   : >> { %3038 = vperm.xlu1 %5007, %v5557_v1   ;;  %4395 = vmatpush.bf16.msk.msra.mxu0 %vm4394_vm12, %v5222_v24  ;;  %vm4410_vm6 = vmpackc.low %vm2110_vm13, %vm2106_vm1  ;;  %vm2100_vm1 = vcmp.eq.s32.totalorder %v6744_v3, %v5532_v60  ;;  %v1351_v45 = vpop.f32.mrf.mxu1 }
 0x369   : >> { %vm4426_vm2 = vmpackc.low %vm2111_vm0, %vm2107_vm10  ;;  %4411 = vmatpush.bf16.msk.msra.mxu1 %vm4410_vm6, %v5222_v24  ;;  %vm2103_vm0 = vcmp.eq.s32.totalorder %v6848_v15, %v5530_v59  ;;  %vm2104_vm6 = vcmp.eq.s32.totalorder %v6848_v15, %v5532_v60  ;;  %v7204_v44 = vadd.f32 %v1351_v45, %v7097_v32  ;;  %v3368_v49 = vrot.slane %v1351_v45, 7 }
 0x36a   : >> { %4427 = vmatpush.bf16.msk.msra.mxu2 %vm4426_vm2, %v5222_v24  ;;  %vm4442_vm13 = vmpackc.low %vm2112_vm9, %vm2108_vm14  ;;  %vm8113_vm14 = vnez %v8106_v17 }
 0x36b   : >> { %v7075_v1 = vpop.permute.xlu1 %2388  ;;  %4443 = vmatpush.bf16.msk.msra.mxu3 %vm4442_vm13, %v5222_v24  ;;  %vm4396_vm12 = vmpackc.low %vm2101_vm11, %vm2097_vm4  ;;  %v7091_v31 = vpop.permute.xlu2 %2740  ;;  %vm2473_vm4 = vcmp.eq.s32.totalorder %v7025_v6, %v5526_v57  ;;  %vm2474_vm11 = vcmp.eq.s32.totalorder %v7025_v6, %v5528_v58 }
 0x36c   : >> { %4397 = vmatpush.bf16.msk.msra.mxu0 %vm4396_vm12, %v5222_v24  ;;  %vm4412_vm9 = vmpackc.low %vm2102_vm5, %vm2098_vm3  ;;  %3035 = vperm.xlu2 %5005, %v5554_v0   ;;  %vm8114_vm3 = vnez %v8108_v18  ;;  %v7131_v0 = vpop.f32.mrf.mxu0  ;;  %v7135_v35 = vpop.permute.xlu0 %2394 }
 0x36d   : >> { %vm4428_vm10 = vmpackc.low %vm2103_vm0, %vm2099_vm7  ;;  %4413 = vmatpush.bf16.msk.msra.mxu1 %vm4412_vm9, %v5222_v24  ;;  %vm2469_vm9 = vcmp.eq.s32.totalorder %v2410_v2, %v5526_v57 }
 0x36e   : >> { %4429 = vmatpush.bf16.msk.msra.mxu2 %vm4428_vm10, %v5222_v24  ;;  %vm4444_vm2 = vmpackc.low %vm2104_vm6, %vm2100_vm1  ;;  %vm2465_vm6 = vcmp.eq.s32.totalorder %v6994_v14, %v5526_v57 }
 0x36f   : >> { %4445 = vmatpush.bf16.msk.msra.mxu3 %vm4444_vm2, %v5222_v24  ;;  %vm2466_vm2 = vcmp.eq.s32.totalorder %v6994_v14, %v5528_v58  ;;  %v1364_v3 = vpop.f32.mrf.mxu2 }
 0x370   : >> { %3032 = vperm.xlu1 %5007, %v5551_v63   ;;  %4399 = vmatpush.bf16.msk.msra.mxu0 %vm6795_vm15, %v5222_v24  ;;  %vm2475_vm15 = vcmp.eq.s32.totalorder %v7025_v6, %v5530_v59  ;;  %v1377_v48 = vpop.f32.mrf.mxu3  ;;  %v7273_v10 = vadd.f32 %v1364_v3, %v7133_v34  ;;  %v3369_v11 = vrot.slane %v1364_v3, 7  ;;  %v1353_v18 = vpop.f32.mrf.mxu1 }
 0x371   : >> { %4415 = vmatpush.bf16.msk.msra.mxu1 %vm6812_vm8, %v5222_v24  ;;  %vm2476_vm8 = vcmp.eq.s32.totalorder %v7025_v6, %v5532_v60  ;;  %v7207_v40 = vadd.f32 %v1377_v48, %v7099_v33  ;;  %v3370_v50 = vrot.slane %v1377_v48, 7 }
 0x372   : >> { %4431 = vmatpush.bf16.msk.msra.mxu2 %vm8113_vm14, %v5222_v24  ;;  %vm2467_vm14 = vcmp.eq.s32.totalorder %v6994_v14, %v5530_v59 }
 0x373   : >> { %v2416_v63 = vpop.permute.xlu1 %2415  ;;  %4447 = vmatpush.bf16.msk.msra.mxu3 %vm8114_vm3, %v5222_v24  ;;  %2321 = vmatmul.bf16.vlgmr.msra.gmra.mxu0 %v5524_v52  ;;  %vm4514_vm3 = vmpackc.low %vm2469_vm9, %vm2465_vm6  ;;  %v7167_v38 = vpop.permute.xlu2 %2737 }
 0x374   : >> { %vm2477_vm5 = vcmp.eq.s32.totalorder %v2416_v63, %v5526_v57  ;;  %vm2478_vm13 = vcmp.eq.s32.totalorder %v2416_v63, %v5528_v58  ;;  %vm2479_vm7 = vcmp.eq.s32.totalorder %v2416_v63, %v5530_v59  ;;  %vm2480_vm0 = vcmp.eq.s32.totalorder %v2416_v63, %v5532_v60  ;;  %2334 = vmatmul.bf16.vlgmr.msra.gmra.mxu1 %v5524_v52  ;;  %v1012_v39 = vpop.f32.mrf.mxu0  ;;  %v7188_v42 = vpop.permute.xlu0 %3065 }
 0x375   : >> { %vm4512_vm12 = vmpackc.low %vm2477_vm5, %vm2473_vm4  ;;  %2347 = vmatmul.bf16.vlgmr.msra.gmra.mxu2 %v5524_v52  ;;  %vm2470_vm4 = vcmp.eq.s32.totalorder %v2410_v2, %v5528_v58  ;;  %vm2468_vm5 = vcmp.eq.s32.totalorder %v6994_v14, %v5532_v60 }
 0x376   : >> { %vm4528_vm1 = vmpackc.low %vm2478_vm13, %vm2474_vm11  ;;  %2360 = vmatmul.bf16.vlgmr.msra.gmra.mxu3 %v5524_v52  ;;  %4513 = vmatpush.bf16.msk.msrb.mxu0 %vm4512_vm12, %v5222_v24  ;;  %vm2472_vm13 = vcmp.eq.s32.totalorder %v2410_v2, %v5532_v60 }
 0x377   : >> { %vm4544_vm10 = vmpackc.low %vm2479_vm7, %vm2475_vm15  ;;  %4529 = vmatpush.bf16.msk.msrb.mxu1 %vm4528_vm1, %v5222_v24  ;;  %vm2471_vm15 = vcmp.eq.s32.totalorder %v2410_v2, %v5530_v59  ;;  %v1366_v23 = vpop.f32.mrf.mxu2 }
 0x378   : >> { %4545 = vmatpush.bf16.msk.msrb.mxu2 %vm4544_vm10, %v5222_v24  ;;  %vm4560_vm11 = vmpackc.low %vm2480_vm0, %vm2476_vm8  ;;  %3029 = vperm.xlu1 %5007, %v5548_v62   ;;  %vm2461_vm0 = vcmp.eq.s32.totalorder %v7052_v29, %v5526_v57  ;;  %v1379_v61 = vpop.f32.mrf.mxu3 }
 0x379   : >> { %4561 = vmatpush.bf16.msk.msrb.mxu3 %vm4560_vm11, %v5222_v24  ;;  %vm4530_vm7 = vmpackc.low %vm2470_vm4, %vm2466_vm2  ;;  %vm2462_vm2 = vcmp.eq.s32.totalorder %v7052_v29, %v5528_v58 }
 0x37a   : >> { %4515 = vmatpush.bf16.msk.msrb.mxu0 %vm4514_vm3, %v5222_v24  ;;  %vm4546_vm8 = vmpackc.low %vm2471_vm15, %vm2467_vm14  ;;  %vm2463_vm14 = vcmp.eq.s32.totalorder %v7052_v29, %v5530_v59  ;;  %vm2464_vm3 = vcmp.eq.s32.totalorder %v7052_v29, %v5532_v60 }
 0x37b   : >> { %v2401_v62 = vpop.permute.xlu1 %2400  ;;  %4531 = vmatpush.bf16.msk.msrb.mxu1 %vm4530_vm7, %v5222_v24  ;;  %vm4562_vm12 = vmpackc.low %vm2472_vm13, %vm2468_vm5  ;;  %vm2433_vm13 = vcmp.eq.s32.totalorder %v6925_v47, %v5526_v57  ;;  %vm2437_vm7 = vcmp.eq.s32.totalorder %v6967_v8, %v5526_v57  ;;  %v7214_v51 = vpop.permute.xlu2 %2731 }
 0x37c   : >> { %4547 = vmatpush.bf16.msk.msrb.mxu2 %vm4546_vm8, %v5222_v24  ;;  %vm2457_vm1 = vcmp.eq.s32.totalorder %v2401_v62, %v5526_v57  ;;  %vm2458_vm6 = vcmp.eq.s32.totalorder %v2401_v62, %v5528_v58  ;;  %vm2459_vm9 = vcmp.eq.s32.totalorder %v2401_v62, %v5530_v59  ;;  %vm2460_vm4 = vcmp.eq.s32.totalorder %v2401_v62, %v5532_v60  ;;  %v1338_v56 = vpop.f32.mrf.mxu0  ;;  %v2744_v15 = vpop.permute.xlu0 %2743 }
 0x37d   : >> { %4563 = vmatpush.bf16.msk.msrb.mxu3 %vm4562_vm12, %v5222_v24  ;;  %vm4516_vm10 = vmpackc.low %vm2461_vm0, %vm2457_vm1  ;;  %vm2434_vm8 = vcmp.eq.s32.totalorder %v6925_v47, %v5528_v58  ;;  %vm2438_vm0 = vcmp.eq.s32.totalorder %v6967_v8, %v5528_v58  ;;  %vm2435_vm12 = vcmp.eq.s32.totalorder %v6925_v47, %v5530_v59  ;;  %vm2439_vm1 = vcmp.eq.s32.totalorder %v6967_v8, %v5530_v59 }
 0x37e   : >> { %vm4532_vm11 = vmpackc.low %vm2462_vm2, %vm2458_vm6  ;;  %4517 = vmatpush.bf16.msk.msrb.mxu0 %vm4516_vm10, %v5222_v24  ;;  %vm3447_vm6 = vcmask 1040384   ;;  %v7270_v4 = vadd.f32 %v1338_v56, %v7131_v0  ;;  %v3367_v5 = vrot.slane %v1338_v56, 7 }
 0x37f   : >> { %vm4548_vm15 = vmpackc.low %vm2463_vm14, %vm2459_vm9  ;;  %4533 = vmatpush.bf16.msk.msrb.mxu1 %vm4532_vm11, %v5222_v24  ;;  %vm2449_vm9 = vcmp.eq.s32.totalorder %v7135_v35, %v5526_v57  ;;  %vm2450_vm14 = vcmp.eq.s32.totalorder %v7135_v35, %v5528_v58  ;;  %v7231_v53 = vsel %vm3447_vm6, %v7097_v32, %v3368_v49  ;;  %v7235_v54 = vsel %vm3447_vm6, %v7099_v33, %v3370_v50 }
 0x380   : >> { %4549 = vmatpush.bf16.msk.msrb.mxu2 %vm4548_vm15, %v5222_v24  ;;  %vm4564_vm5 = vmpackc.low %vm2464_vm3, %vm2460_vm4  ;;  %v7292_v16 = vsel %vm3447_vm6, %v7131_v0, %v3367_v5  ;;  %v7296_v17 = vsel %vm3447_vm6, %v7133_v34, %v3369_v11 }
 0x381   : >> { %4565 = vmatpush.bf16.msk.msrb.mxu3 %vm4564_vm5, %v5222_v24  ;;  %vm7225_vm3 = vmpackc.low %vm2437_vm7, %vm2433_vm13  ;;  %vm2452_vm13 = vcmp.eq.s32.totalorder %v7135_v35, %v5532_v60  ;;  %vm2441_vm7 = vcmp.eq.s32.totalorder %v7075_v1, %v5526_v57 }
 0x383   : >> { %v2398_v46 = vpop.permute.xlu1 %2397  ;;  %v7352_v19 = vpop.permute.xlu2 %2716 }
 0x384   : >> { %vm2453_vm10 = vcmp.eq.s32.totalorder %v2398_v46, %v5526_v57  ;;  %vm2454_vm2 = vcmp.eq.s32.totalorder %v2398_v46, %v5528_v58  ;;  %vm2455_vm4 = vcmp.eq.s32.totalorder %v2398_v46, %v5530_v59  ;;  %vm2456_vm15 = vcmp.eq.s32.totalorder %v2398_v46, %v5532_v60  ;;  %v1340_v21 = vpop.f32.mrf.mxu0 }
 0x385   : >> { %vm4518_vm11 = vmpackc.low %vm2453_vm10, %vm2449_vm9  ;;  %vm2451_vm9 = vcmp.eq.s32.totalorder %v7135_v35, %v5530_v59  ;;  %vm2442_vm10 = vcmp.eq.s32.totalorder %v7075_v1, %v5528_v58 }
 0x386   : >> { %4519 = vmatpush.bf16.msk.msrb.mxu0 %vm4518_vm11, %v5222_v24  ;;  %vm4534_vm5 = vmpackc.low %vm2454_vm2, %vm2450_vm14 }
 0x387   : >> { %vm7252_vm11 = vmpackc.low %vm2438_vm0, %vm2434_vm8  ;;  %4535 = vmatpush.bf16.msk.msrb.mxu1 %vm4534_vm5, %v5222_v24  ;;  %vm2445_vm0 = vcmp.eq.s32.totalorder %v6939_v30, %v5526_v57  ;;  %vm2444_vm5 = vcmp.eq.s32.totalorder %v7075_v1, %v5532_v60 }
 0x388   : >> { %vm4550_vm2 = vmpackc.low %vm2455_vm4, %vm2451_vm9  ;;  %vm2446_vm4 = vcmp.eq.s32.totalorder %v6939_v30, %v5528_v58  ;;  %vm2447_vm9 = vcmp.eq.s32.totalorder %v6939_v30, %v5530_v59 }
 0x389   : >> { %vm7265_vm14 = vmpackc.low %vm2439_vm1, %vm2435_vm12  ;;  %4551 = vmatpush.bf16.msk.msrb.mxu2 %vm4550_vm2, %v5222_v24  ;;  %vm2443_vm12 = vcmp.eq.s32.totalorder %v7075_v1, %v5530_v59  ;;  %vm2417_vm2 = vcmp.eq.s32.totalorder %v6931_v27, %v5526_v57 }
 0x38a   : >> { %vm4566_vm8 = vmpackc.low %vm2456_vm15, %vm2452_vm13  ;;  %vm2436_vm13 = vcmp.eq.s32.totalorder %v6925_v47, %v5532_v60 }
 0x38b   : >> { %4567 = vmatpush.bf16.msk.msrb.mxu3 %vm4566_vm8, %v5222_v24  ;;  %vm4520_vm1 = vmpackc.low %vm2445_vm0, %vm2441_vm7  ;;  %vm2440_vm7 = vcmp.eq.s32.totalorder %v6967_v8, %v5532_v60  ;;  %vm2421_vm8 = vcmp.eq.s32.totalorder %v6980_v13, %v5526_v57 }
 0x38c   : >> { %4521 = vmatpush.bf16.msk.msrb.mxu0 %vm4520_vm1, %v5222_v24  ;;  %vm4536_vm15 = vmpackc.low %vm2446_vm4, %vm2442_vm10  ;;  %vm2448_vm10 = vcmp.eq.s32.totalorder %v6939_v30, %v5532_v60  ;;  %vm2418_vm1 = vcmp.eq.s32.totalorder %v6931_v27, %v5528_v58 }
 0x38d   : >> { %4537 = vmatpush.bf16.msk.msrb.mxu1 %vm4536_vm15, %v5222_v24  ;;  %vm4552_vm6 = vmpackc.low %vm2447_vm9, %vm2443_vm12  ;;  %vm2422_vm12 = vcmp.eq.s32.totalorder %v6980_v13, %v5528_v58  ;;  %v7327_v9 = vpop.permute.xlu1 %2734  ;;  %vm2423_vm15 = vcmp.eq.s32.totalorder %v6980_v13, %v5530_v59  ;;  %vm2429_vm9 = vcmp.eq.s32.totalorder %v7029_v12, %v5526_v57 }
 0x38e   : >> { %4553 = vmatpush.bf16.msk.msrb.mxu2 %vm4552_vm6, %v5222_v24  ;;  %vm4568_vm0 = vmpackc.low %vm2448_vm10, %vm2444_vm5  ;;  %vm2419_vm5 = vcmp.eq.s32.totalorder %v6931_v27, %v5530_v59  ;;  %vm2431_vm10 = vcmp.eq.s32.totalorder %v7029_v12, %v5530_v59 }
 0x38f   : >> { %4569 = vmatpush.bf16.msk.msrb.mxu3 %vm4568_vm0, %v5222_v24  ;;  %vm7335_vm4 = vmpackc.low %vm2440_vm7, %vm2436_vm13  ;;  %vm2430_vm13 = vcmp.eq.s32.totalorder %v7029_v12, %v5528_v58 }
 0x390   : >> { %4523 = vmatpush.bf16.msk.msrb.mxu0 %vm7225_vm3, %v5222_v24  ;;  %vm7348_vm6 = vmpackc.low %vm2421_vm8, %vm2417_vm2  ;;  %vm2425_vm3 = vcmp.eq.s32.totalorder %v6918_v22, %v5526_v57  ;;  %vm2426_vm8 = vcmp.eq.s32.totalorder %v6918_v22, %v5528_v58 }
 0x391   : >> { %4539 = vmatpush.bf16.msk.msrb.mxu1 %vm7252_vm11, %v5222_v24  ;;  %vm7359_vm7 = vmpackc.low %vm2422_vm12, %vm2418_vm1  ;;  %vm2427_vm1 = vcmp.eq.s32.totalorder %v6918_v22, %v5530_v59  ;;  %vm2803_vm12 = vcmp.eq.s32.totalorder %v7091_v31, %v5530_v59 }
 0x392   : >> { %4555 = vmatpush.bf16.msk.msrb.mxu2 %vm7265_vm14, %v5222_v24  ;;  %vm7370_vm2 = vmpackc.low %vm2423_vm15, %vm2419_vm5  ;;  %vm2432_vm14 = vcmp.eq.s32.totalorder %v7029_v12, %v5532_v60  ;;  %vm2424_vm5 = vcmp.eq.s32.totalorder %v6980_v13, %v5532_v60  ;;  %vm2805_vm15 = vcmp.eq.s32.totalorder %v2744_v15, %v5526_v57 }
 0x393   : >> { %4571 = vmatpush.bf16.msk.msrb.mxu3 %vm7335_vm4, %v5222_v24  ;;  %vm4524_vm11 = vmpackc.low %vm2429_vm9, %vm2425_vm3  ;;  %vm2802_vm3 = vcmp.eq.s32.totalorder %v7091_v31, %v5528_v58  ;;  %vm2807_vm4 = vcmp.eq.s32.totalorder %v2744_v15, %v5530_v59 }
 0x394   : >> { %4525 = vmatpush.bf16.msk.msrb.mxu0 %vm4524_vm11, %v5222_v24  ;;  %vm4540_vm0 = vmpackc.low %vm2430_vm13, %vm2426_vm8  ;;  %vm2428_vm13 = vcmp.eq.s32.totalorder %v6918_v22, %v5532_v60  ;;  %vm2808_vm11 = vcmp.eq.s32.totalorder %v2744_v15, %v5532_v60  ;;  %v7410_v22 = vpop.permute.xlu0 %2722  ;;  %v1666_v8 = vpop.f32.mrf.mxu0 }
 0x395   : >> { %4541 = vmatpush.bf16.msk.msrb.mxu1 %vm4540_vm0, %v5222_v24  ;;  %vm4556_vm9 = vmpackc.low %vm2431_vm10, %vm2427_vm1  ;;  %v7402_v28 = vpop.permute.xlu1 %2728  ;;  %vm8129_vm10 = vcmp.eq.s32.totalorder %v6931_v27, %v5532_v60  ;;  %vm2804_vm1 = vcmp.eq.s32.totalorder %v7091_v31, %v5532_v60  ;;  %v7442_v27 = vpop.permute.xlu2 %3071  ;;  %v7474_v6 = vadd.f32 %v1666_v8, %v7270_v4  ;;  %v3379_v12 = vrot.slane %v1666_v8, 6 }
 0x396   : >> { %4557 = vmatpush.bf16.msk.msrb.mxu2 %vm4556_vm9, %v5222_v24  ;;  %vm4572_vm8 = vmpackc.low %vm2432_vm14, %vm2428_vm13  ;;  %vm8130_vm14 = vcmp.eq.s32.totalorder %v7091_v31, %v5526_v57 }
 0x397   : >> { %4573 = vmatpush.bf16.msk.msrb.mxu3 %vm4572_vm8, %v5222_v24  ;;  %vm4574_vm0 = vmpackc.low %vm2424_vm5, %vm8129_vm10  ;;  %vm8131_vm5 = vcmp.eq.s32.totalorder %v2744_v15, %v5528_v58  ;;  %vm2799_vm10 = vcmp.eq.s32.totalorder %v7167_v38, %v5530_v59 }
 0x398   : >> { %4527 = vmatpush.bf16.msk.msrb.mxu0 %vm7348_vm6, %v5222_v24  ;;  %vm4640_vm9 = vmpackc.low %vm2805_vm15, %vm8130_vm14  ;;  %vm2793_vm6 = vcmp.eq.s32.totalorder %v7327_v9, %v5526_v57  ;;  %vm2794_vm15 = vcmp.eq.s32.totalorder %v7327_v9, %v5528_v58 }
 0x399   : >> { %4543 = vmatpush.bf16.msk.msrb.mxu1 %vm7359_vm7, %v5222_v24  ;;  %vm4656_vm13 = vmpackc.low %vm8131_vm5, %vm2802_vm3  ;;  %vm2797_vm3 = vcmp.eq.s32.totalorder %v7167_v38, %v5526_v57  ;;  %vm2800_vm5 = vcmp.eq.s32.totalorder %v7167_v38, %v5532_v60 }
 0x39a   : >> { %4559 = vmatpush.bf16.msk.msrb.mxu2 %vm7370_vm2, %v5222_v24  ;;  %vm4672_vm7 = vmpackc.low %vm2807_vm4, %vm2803_vm12  ;;  %vm2798_vm12 = vcmp.eq.s32.totalorder %v7167_v38, %v5528_v58  ;;  %vm2795_vm4 = vcmp.eq.s32.totalorder %v7327_v9, %v5530_v59  ;;  %v1679_v30 = vpop.f32.mrf.mxu1 }
 0x39b   : >> { %4575 = vmatpush.bf16.msk.msrb.mxu3 %vm4574_vm0, %v5222_v24  ;;  %vm4688_vm2 = vmpackc.low %vm2808_vm11, %vm2804_vm1  ;;  %2649 = vmatmul.bf16.vlgmr.msrb.gmra.mxu0 %v5524_v52  ;;  %vm2796_vm11 = vcmp.eq.s32.totalorder %v7327_v9, %v5532_v60  ;;  %vm2785_vm0 = vcmp.eq.s32.totalorder %v7402_v28, %v5526_v57  ;;  %vm3452_vm1 = vcmask 1041408   ;;  %v7471_v13 = vadd.f32 %v1679_v30, %v7204_v44 }
 0x39c   : >> { %4641 = vmatpush.bf16.msk.msra.mxu0 %vm4640_vm9, %v5222_v24  ;;  %vm4642_vm8 = vmpackc.low %vm2797_vm3, %vm2793_vm6  ;;  %2662 = vmatmul.bf16.vlgmr.msrb.gmra.mxu1 %v5524_v52  ;;  %v3380_v14 = vrot.slane %v1679_v30, 6  ;;  %vm2786_vm6 = vcmp.eq.s32.totalorder %v7402_v28, %v5528_v58  ;;  %v7503_v2 = vsel %vm3452_vm1, %v7292_v16, %v3379_v12  ;;  %vm2790_vm3 = vcmp.eq.s32.totalorder %v7214_v51, %v5528_v58  ;;  %v2720_v32 = vpop.permute.xlu0 %2719  ;;  %v1668_v38 = vpop.f32.mrf.mxu0 }
 0x39d   : >> { %4657 = vmatpush.bf16.msk.msra.mxu1 %vm4656_vm13, %v5222_v24  ;;  %2675 = vmatmul.bf16.vlgmr.msrb.gmra.mxu2 %v5524_v52  ;;  %vm4658_vm14 = vmpackc.low %vm2798_vm12, %vm2794_vm15  ;;  %vm2789_vm13 = vcmp.eq.s32.totalorder %v7214_v51, %v5526_v57  ;;  %v2726_v29 = vpop.permute.xlu1 %2725  ;;  %vm2787_vm15 = vcmp.eq.s32.totalorder %v7402_v28, %v5530_v59  ;;  %vm2788_vm12 = vcmp.eq.s32.totalorder %v7402_v28, %v5532_v60  ;;  %v7566_v39 = vpop.permute.xlu2 %3062 }
 0x39e   : >> { %4673 = vmatpush.bf16.msk.msra.mxu2 %vm4672_vm7, %v5222_v24  ;;  %2688 = vmatmul.bf16.vlgmr.msrb.gmra.mxu3 %v5524_v52  ;;  %vm4674_vm9 = vmpackc.low %vm2799_vm10, %vm2795_vm4  ;;  %v7499_v1 = vsel %vm3452_vm1, %v7231_v53, %v3380_v14  ;;  %vm2792_vm10 = vcmp.eq.s32.totalorder %v7214_v51, %v5532_v60 }
 0x39f   : >> { %4689 = vmatpush.bf16.msk.msra.mxu3 %vm4688_vm2, %v5222_v24  ;;  %vm4690_vm7 = vmpackc.low %vm2800_vm5, %vm2796_vm11  ;;  %vm2777_vm11 = vcmp.eq.s32.totalorder %v7410_v22, %v5526_v57  ;;  %v1705_v31 = vpop.f32.mrf.mxu3  ;;  %vm2782_vm5 = vcmp.eq.s32.totalorder %v2726_v29, %v5528_v58  ;;  %v1692_v0 = vpop.f32.mrf.mxu2 }
 0x3a0   : >> { %4643 = vmatpush.bf16.msk.msra.mxu0 %vm4642_vm8, %v5222_v24  ;;  %vm4644_vm2 = vmpackc.low %vm2789_vm13, %vm2785_vm0  ;;  %vm2791_vm8 = vcmp.eq.s32.totalorder %v7214_v51, %v5530_v59  ;;  %v7528_v33 = vadd.f32 %v1705_v31, %v7207_v40  ;;  %v3382_v63 = vrot.slane %v1705_v31, 6  ;;  %v7539_v34 = vadd.f32 %v1692_v0, %v7273_v10 }
 0x3a1   : >> { %4659 = vmatpush.bf16.msk.msra.mxu1 %vm4658_vm14, %v5222_v24  ;;  %vm4660_vm4 = vmpackc.low %vm2790_vm3, %vm2786_vm6  ;;  %vm2781_vm14 = vcmp.eq.s32.totalorder %v2726_v29, %v5526_v57  ;;  %vm2779_vm6 = vcmp.eq.s32.totalorder %v7410_v22, %v5530_v59  ;;  %v3381_v35 = vrot.slane %v1692_v0, 6  ;;  %vm2784_vm3 = vcmp.eq.s32.totalorder %v2726_v29, %v5532_v60 }
 0x3a2   : >> { %4675 = vmatpush.bf16.msk.msra.mxu2 %vm4674_vm9, %v5222_v24  ;;  %vm4676_vm0 = vmpackc.low %vm2791_vm8, %vm2787_vm15  ;;  %vm2778_vm9 = vcmp.eq.s32.totalorder %v7410_v22, %v5528_v58  ;;  %v7552_v36 = vsel %vm3452_vm1, %v7235_v54, %v3382_v63  ;;  %v1681_v37 = vpop.f32.mrf.mxu1  ;;  %vm2773_vm8 = vcmp.eq.s32.totalorder %v2720_v32, %v5526_v57 }
 0x3a3   : >> { %4691 = vmatpush.bf16.msk.msra.mxu3 %vm4690_vm7, %v5222_v24  ;;  %vm4692_vm13 = vmpackc.low %vm2792_vm10, %vm2788_vm12  ;;  %vm2783_vm7 = vcmp.eq.s32.totalorder %v2726_v29, %v5530_v59  ;;  %v7564_v62 = vsel %vm3452_vm1, %v7296_v17, %v3381_v35 }
 0x3a4   : >> { %4645 = vmatpush.bf16.msk.msra.mxu0 %vm4644_vm2, %v5222_v24  ;;  %vm4646_vm15 = vmpackc.low %vm2781_vm14, %vm2777_vm11  ;;  %vm2780_vm2 = vcmp.eq.s32.totalorder %v7410_v22, %v5532_v60  ;;  %vm2770_vm11 = vcmp.eq.s32.totalorder %v7352_v19, %v5528_v58  ;;  %vm2774_vm14 = vcmp.eq.s32.totalorder %v2720_v32, %v5528_v58  ;;  %v2711_v44 = vpop.permute.xlu0 %2710 }
 0x3a5   : >> { %4661 = vmatpush.bf16.msk.msra.mxu1 %vm4660_vm4, %v5222_v24  ;;  %vm4662_vm12 = vmpackc.low %vm2782_vm5, %vm2778_vm9  ;;  %vm2769_vm4 = vcmp.eq.s32.totalorder %v7352_v19, %v5526_v57  ;;  %vm2775_vm9 = vcmp.eq.s32.totalorder %v2720_v32, %v5530_v59  ;;  %v2708_v46 = vpop.permute.xlu2 %2707 }
 0x3a6   : >> { %4677 = vmatpush.bf16.msk.msra.mxu2 %vm4676_vm0, %v5222_v24  ;;  %vm4678_vm10 = vmpackc.low %vm2783_vm7, %vm2779_vm6  ;;  %vm2771_vm0 = vcmp.eq.s32.totalorder %v7352_v19, %v5530_v59  ;;  %v7588_v41 = vpop.permute.xlu1 %3068  ;;  %vm2776_vm6 = vcmp.eq.s32.totalorder %v2720_v32, %v5532_v60 }
 0x3a7   : >> { %4693 = vmatpush.bf16.msk.msra.mxu3 %vm4692_vm13, %v5222_v24  ;;  %vm4694_vm1 = vmpackc.low %vm2784_vm3, %vm2780_vm2  ;;  %vm2772_vm13 = vcmp.eq.s32.totalorder %v7352_v19, %v5532_v60  ;;  %v1707_v45 = vpop.f32.mrf.mxu3  ;;  %v1694_v48 = vpop.f32.mrf.mxu2  ;;  %vm2761_vm3 = vcmp.eq.s32.totalorder %v2711_v44, %v5526_v57 }
 0x3a8   : >> { %4647 = vmatpush.bf16.msk.msra.mxu0 %vm4646_vm15, %v5222_v24  ;;  %vm4648_vm5 = vmpackc.low %vm2773_vm8, %vm2769_vm4 }
 0x3a9   : >> { %4663 = vmatpush.bf16.msk.msra.mxu1 %vm4662_vm12, %v5222_v24  ;;  %vm4664_vm7 = vmpackc.low %vm2774_vm14, %vm2770_vm11  ;;  %vm2762_vm11 = vcmp.eq.s32.totalorder %v2711_v44, %v5528_v58 }
 0x3aa   : >> { %4679 = vmatpush.bf16.msk.msra.mxu2 %vm4678_vm10, %v5222_v24  ;;  %vm4680_vm15 = vmpackc.low %vm2775_vm9, %vm2771_vm0  ;;  %vm2763_vm0 = vcmp.eq.s32.totalorder %v2711_v44, %v5530_v59 }
 0x3ab   : >> { %4695 = vmatpush.bf16.msk.msra.mxu3 %vm4694_vm1, %v5222_v24  ;;  %vm4696_vm2 = vmpackc.low %vm2776_vm6, %vm2772_vm13  ;;  %vm2757_vm6 = vcmp.eq.s32.totalorder %v2708_v46, %v5526_v57 }
 0x3ac   : >> { %4649 = vmatpush.bf16.msk.msra.mxu0 %vm4648_vm5, %v5222_v24  ;;  %vm2764_vm5 = vcmp.eq.s32.totalorder %v2711_v44, %v5532_v60  ;;  %v2699_v26 = vpop.permute.xlu0 %2698 }
 0x3ad   : >> { %4665 = vmatpush.bf16.msk.msra.mxu1 %vm4664_vm7, %v5222_v24  ;;  %vm2758_vm7 = vcmp.eq.s32.totalorder %v2708_v46, %v5528_v58  ;;  %v7614_v50 = vpop.permute.xlu2 %3059 }
 0x3ae   : >> { %4681 = vmatpush.bf16.msk.msra.mxu2 %vm4680_vm15, %v5222_v24 }
 0x3af   : >> { %4697 = vmatpush.bf16.msk.msra.mxu3 %vm4696_vm2, %v5222_v24  ;;  %v2714_v49 = vpop.permute.xlu1 %2713 }
 0x3b0   : >> { %vm2765_vm12 = vcmp.eq.s32.totalorder %v2714_v49, %v5526_v57  ;;  %vm2766_vm4 = vcmp.eq.s32.totalorder %v2714_v49, %v5528_v58  ;;  %vm2767_vm8 = vcmp.eq.s32.totalorder %v2714_v49, %v5530_v59  ;;  %vm2768_vm14 = vcmp.eq.s32.totalorder %v2714_v49, %v5532_v60 }
 0x3b1   : >> { %vm4650_vm10 = vmpackc.low %vm2765_vm12, %vm2761_vm3  ;;  %vm2759_vm12 = vcmp.eq.s32.totalorder %v2708_v46, %v5530_v59 }
 0x3b2   : >> { %4651 = vmatpush.bf16.msk.msra.mxu0 %vm4650_vm10, %v5222_v24  ;;  %vm4666_vm1 = vmpackc.low %vm2766_vm4, %vm2762_vm11  ;;  %vm2760_vm10 = vcmp.eq.s32.totalorder %v2708_v46, %v5532_v60 }
 0x3b3   : >> { %4667 = vmatpush.bf16.msk.msra.mxu1 %vm4666_vm1, %v5222_v24  ;;  %vm4682_vm9 = vmpackc.low %vm2767_vm8, %vm2763_vm0  ;;  %vm3457_vm0 = vcmask 1042432  }
 0x3b4   : >> { %4683 = vmatpush.bf16.msk.msra.mxu2 %vm4682_vm9, %v5222_v24  ;;  %vm4698_vm13 = vmpackc.low %vm2768_vm14, %vm2764_vm5  ;;  %vm3133_vm9 = vcmp.eq.s32.totalorder %v7442_v27, %v5526_v57  ;;  %vm3129_vm5 = vcmp.eq.s32.totalorder %v7588_v41, %v5526_v57  ;;  %v3048_v8 = vpop.permute.xlu0 %3047 }
 0x3b5   : >> { %4699 = vmatpush.bf16.msk.msra.mxu3 %vm4698_vm13, %v5222_v24  ;;  %v7642_v5 = vpop.permute.xlu2 %3050  ;;  %vm3134_vm13 = vcmp.eq.s32.totalorder %v7442_v27, %v5528_v58 }
 0x3b7   : >> { %v2705_v40 = vpop.permute.xlu1 %2704 }
 0x3b8   : >> { %vm2753_vm15 = vcmp.eq.s32.totalorder %v2705_v40, %v5526_v57  ;;  %vm2754_vm2 = vcmp.eq.s32.totalorder %v2705_v40, %v5528_v58  ;;  %vm2755_vm3 = vcmp.eq.s32.totalorder %v2705_v40, %v5530_v59  ;;  %vm2756_vm8 = vcmp.eq.s32.totalorder %v2705_v40, %v5532_v60 }
 0x3b9   : >> { %vm4652_vm4 = vmpackc.low %vm2757_vm6, %vm2753_vm15  ;;  %vm3130_vm6 = vcmp.eq.s32.totalorder %v7588_v41, %v5528_v58  ;;  %vm3131_vm15 = vcmp.eq.s32.totalorder %v7588_v41, %v5530_v59 }
 0x3ba   : >> { %4653 = vmatpush.bf16.msk.msra.mxu0 %vm4652_vm4, %v5222_v24  ;;  %vm4668_vm11 = vmpackc.low %vm2758_vm7, %vm2754_vm2  ;;  %vm3135_vm7 = vcmp.eq.s32.totalorder %v7442_v27, %v5530_v59 }
 0x3bb   : >> { %4669 = vmatpush.bf16.msk.msra.mxu1 %vm4668_vm11, %v5222_v24  ;;  %vm4684_vm14 = vmpackc.low %vm2759_vm12, %vm2755_vm3  ;;  %vm2745_vm12 = vcmp.eq.s32.totalorder %v2699_v26, %v5526_v57 }
 0x3bc   : >> { %4685 = vmatpush.bf16.msk.msra.mxu2 %vm4684_vm14, %v5222_v24  ;;  %vm4700_vm1 = vmpackc.low %vm2760_vm10, %vm2756_vm8  ;;  %v3027_v12 = vpop.permute.xlu0 %3026 }
 0x3bd   : >> { %4701 = vmatpush.bf16.msk.msra.mxu3 %vm4700_vm1, %v5222_v24  ;;  %v1994_v51 = vpop.f32.mrf.mxu0  ;;  %vm7670_vm2 = vmpackc.low %vm3133_vm9, %vm3129_vm5  ;;  %v7686_v28 = vpop.permute.xlu2 %3044  ;;  %vm2746_vm1 = vcmp.eq.s32.totalorder %v2699_v26, %v5528_v58  ;;  %vm3136_vm9 = vcmp.eq.s32.totalorder %v7442_v27, %v5532_v60  ;;  %vm3132_vm5 = vcmp.eq.s32.totalorder %v7588_v41, %v5532_v60 }
 0x3be   : >> { %v2007_v20 = vpop.f32.mrf.mxu1  ;;  %v7627_v53 = vadd.f32 %v1994_v51, %v7474_v6  ;;  %v3391_v54 = vrot.slane %v1994_v51, 5  ;;  %vm7674_vm3 = vmpackc.low %vm3134_vm13, %vm3130_vm6  ;;  %vm2747_vm6 = vcmp.eq.s32.totalorder %v2699_v26, %v5530_v59 }
 0x3bf   : >> { %v7630_v55 = vadd.f32 %v2007_v20, %v7471_v13  ;;  %v3392_v56 = vrot.slane %v2007_v20, 5  ;;  %vm7682_vm11 = vmpackc.low %vm3135_vm7, %vm3131_vm15  ;;  %vm2748_vm15 = vcmp.eq.s32.totalorder %v2699_v26, %v5532_v60 }
 0x3c0   : >> { %v7632_v3 = vpop.permute.xlu1 %3056  ;;  %v7636_v7 = vsel %vm3457_vm0, %v7503_v2, %v3391_v54 }
 0x3c1   : >> { %v7640_v4 = vsel %vm3457_vm0, %v7499_v1, %v3392_v56 }
 0x3c5   : >> { %v2020_v10 = vpop.f32.mrf.mxu2  ;;  %v1996_v18 = vpop.f32.mrf.mxu0 }
 0x3c6   : >> { %v2033_v11 = vpop.f32.mrf.mxu3  ;;  %v7645_v16 = vadd.f32 %v2020_v10, %v7539_v34  ;;  %v3393_v17 = vrot.slane %v2020_v10, 5  ;;  %v2009_v9 = vpop.f32.mrf.mxu1 }
 0x3c7   : >> { %v7652_v61 = vadd.f32 %v2033_v11, %v7528_v33  ;;  %v3394_v15 = vrot.slane %v2033_v11, 5 }
 0x3c8   : >> { %v7660_v25 = vsel %vm3457_vm0, %v7564_v62, %v3393_v17 }
 0x3c9   : >> { %v7668_v21 = vsel %vm3457_vm0, %v7552_v36, %v3394_v15  ;;  %v2702_v43 = vpop.permute.xlu1 %2701 }
 0x3ca   : >> { %vm2749_vm4 = vcmp.eq.s32.totalorder %v2702_v43, %v5526_v57  ;;  %vm2750_vm8 = vcmp.eq.s32.totalorder %v2702_v43, %v5528_v58  ;;  %vm2751_vm10 = vcmp.eq.s32.totalorder %v2702_v43, %v5530_v59  ;;  %vm2752_vm0 = vcmp.eq.s32.totalorder %v2702_v43, %v5532_v60 }
 0x3cb   : >> { %vm4654_vm14 = vmpackc.low %vm2749_vm4, %vm2745_vm12  ;;  %vm3121_vm12 = vcmp.eq.s32.totalorder %v7566_v39, %v5526_v57  ;;  %vm3125_vm4 = vcmp.eq.s32.totalorder %v7188_v42, %v5526_v57 }
 0x3cc   : >> { %4655 = vmatpush.bf16.msk.msra.mxu0 %vm4654_vm14, %v5222_v24  ;;  %vm4670_vm13 = vmpackc.low %vm2750_vm8, %vm2746_vm1  ;;  %vm3127_vm1 = vcmp.eq.s32.totalorder %v7188_v42, %v5530_v59 }
 0x3cd   : >> { %v2022_v22 = vpop.f32.mrf.mxu2  ;;  %4671 = vmatpush.bf16.msk.msra.mxu1 %vm4670_vm13, %v5222_v24  ;;  %vm4686_vm7 = vmpackc.low %vm2751_vm10, %vm2747_vm6  ;;  %vm3122_vm10 = vcmp.eq.s32.totalorder %v7566_v39, %v5528_v58  ;;  %vm3128_vm13 = vcmp.eq.s32.totalorder %v7188_v42, %v5532_v60  ;;  %vm3117_vm6 = vcmp.eq.s32.totalorder %v7614_v50, %v5526_v57 }
 0x3ce   : >> { %v2035_v30 = vpop.f32.mrf.mxu3  ;;  %4687 = vmatpush.bf16.msk.msra.mxu2 %vm4686_vm7, %v5222_v24  ;;  %vm4702_vm8 = vmpackc.low %vm2752_vm0, %vm2748_vm15  ;;  %vm3114_vm15 = vcmp.eq.s32.totalorder %v7632_v3, %v5528_v58 }
 0x3cf   : >> { %4703 = vmatpush.bf16.msk.msra.mxu3 %vm4702_vm8, %v5222_v24  ;;  %vm4816_vm14 = vmpackc.low %vm3136_vm9, %vm3132_vm5  ;;  %2977 = vmatmul.bf16.vlgmr.msra.gmra.mxu0 %v5524_v52  ;;  %vm3113_vm5 = vcmp.eq.s32.totalorder %v7632_v3, %v5526_v57  ;;  %vm3115_vm8 = vcmp.eq.s32.totalorder %v7632_v3, %v5530_v59 }
 0x3d0   : >> { %4769 = vmatpush.bf16.msk.msrb.mxu0 %vm7670_vm2, %v5222_v24  ;;  %vm3126_vm2 = vcmp.eq.s32.totalorder %v7188_v42, %v5528_v58  ;;  %vm4770_vm0 = vmpackc.low %vm3125_vm4, %vm3121_vm12  ;;  %2990 = vmatmul.bf16.vlgmr.msra.gmra.mxu1 %v5524_v52  ;;  %vm3118_vm12 = vcmp.eq.s32.totalorder %v7614_v50, %v5528_v58  ;;  %v3042_v42 = vpop.permute.xlu2 %3041 }
 0x3d1   : >> { %4785 = vmatpush.bf16.msk.msrb.mxu1 %vm7674_vm3, %v5222_v24  ;;  %vm3123_vm3 = vcmp.eq.s32.totalorder %v7566_v39, %v5530_v59  ;;  %3003 = vmatmul.bf16.vlgmr.msra.gmra.mxu2 %v5524_v52  ;;  %vm4786_vm9 = vmpackc.low %vm3126_vm2, %vm3122_vm10  ;;  %vm3119_vm10 = vcmp.eq.s32.totalorder %v7614_v50, %v5530_v59 }
 0x3d2   : >> { %4801 = vmatpush.bf16.msk.msrb.mxu2 %vm7682_vm11, %v5222_v24  ;;  %vm3124_vm11 = vcmp.eq.s32.totalorder %v7566_v39, %v5532_v60  ;;  %3016 = vmatmul.bf16.vlgmr.msra.gmra.mxu3 %v5524_v52  ;;  %vm4802_vm7 = vmpackc.low %vm3127_vm1, %vm3123_vm3  ;;  %v3054_v27 = vpop.permute.xlu1 %3053  ;;  %vm3120_vm3 = vcmp.eq.s32.totalorder %v7614_v50, %v5532_v60 }
 0x3d3   : >> { %4817 = vmatpush.bf16.msk.msrb.mxu3 %vm4816_vm14, %v5222_v24  ;;  %vm4818_vm4 = vmpackc.low %vm3128_vm13, %vm3124_vm11  ;;  %vm3116_vm14 = vcmp.eq.s32.totalorder %v7632_v3, %v5532_v60  ;;  %vm3110_vm13 = vcmp.eq.s32.totalorder %v3054_v27, %v5528_v58 }
 0x3d4   : >> { %4771 = vmatpush.bf16.msk.msrb.mxu0 %vm4770_vm0, %v5222_v24  ;;  %vm4772_vm2 = vmpackc.low %vm3117_vm6, %vm3113_vm5  ;;  %vm3109_vm0 = vcmp.eq.s32.totalorder %v3054_v27, %v5526_v57  ;;  %vm3105_vm5 = vcmp.eq.s32.totalorder %v7642_v5, %v5526_v57  ;;  %vm3111_vm6 = vcmp.eq.s32.totalorder %v3054_v27, %v5530_v59 }
 0x3d5   : >> { %4787 = vmatpush.bf16.msk.msrb.mxu1 %vm4786_vm9, %v5222_v24  ;;  %vm4788_vm1 = vmpackc.low %vm3118_vm12, %vm3114_vm15  ;;  %vm3106_vm15 = vcmp.eq.s32.totalorder %v7642_v5, %v5528_v58  ;;  %vm3112_vm12 = vcmp.eq.s32.totalorder %v3054_v27, %v5532_v60 }
 0x3d6   : >> { %4803 = vmatpush.bf16.msk.msrb.mxu2 %vm4802_vm7, %v5222_v24  ;;  %vm4804_vm11 = vmpackc.low %vm3119_vm10, %vm3115_vm8  ;;  %vm3107_vm8 = vcmp.eq.s32.totalorder %v7642_v5, %v5530_v59  ;;  %vm3097_vm10 = vcmp.eq.s32.totalorder %v7686_v28, %v5526_v57 }
 0x3d7   : >> { %4819 = vmatpush.bf16.msk.msrb.mxu3 %vm4818_vm4, %v5222_v24  ;;  %vm4820_vm9 = vmpackc.low %vm3120_vm3, %vm3116_vm14  ;;  %vm3108_vm3 = vcmp.eq.s32.totalorder %v7642_v5, %v5532_v60 }
 0x3d8   : >> { %4773 = vmatpush.bf16.msk.msrb.mxu0 %vm4772_vm2, %v5222_v24  ;;  %vm4774_vm7 = vmpackc.low %vm3109_vm0, %vm3105_vm5  ;;  %vm3101_vm2 = vcmp.eq.s32.totalorder %v3048_v8, %v5526_v57  ;;  %vm3102_vm0 = vcmp.eq.s32.totalorder %v3048_v8, %v5528_v58  ;;  %v3036_v14 = vpop.permute.xlu2 %3035 }
 0x3d9   : >> { %4789 = vmatpush.bf16.msk.msrb.mxu1 %vm4788_vm1, %v5222_v24  ;;  %vm4790_vm4 = vmpackc.low %vm3110_vm13, %vm3106_vm15  ;;  %vm3098_vm1 = vcmp.eq.s32.totalorder %v7686_v28, %v5528_v58  ;;  %vm3099_vm13 = vcmp.eq.s32.totalorder %v7686_v28, %v5530_v59 }
 0x3da   : >> { %4805 = vmatpush.bf16.msk.msrb.mxu2 %vm4804_vm11, %v5222_v24  ;;  %vm4806_vm14 = vmpackc.low %vm3111_vm6, %vm3107_vm8  ;;  %v3039_v13 = vpop.permute.xlu1 %3038  ;;  %vm3100_vm6 = vcmp.eq.s32.totalorder %v7686_v28, %v5532_v60 }
 0x3db   : >> { %4821 = vmatpush.bf16.msk.msrb.mxu3 %vm4820_vm9, %v5222_v24  ;;  %vm4822_vm11 = vmpackc.low %vm3112_vm12, %vm3108_vm3  ;;  %vm3103_vm9 = vcmp.eq.s32.totalorder %v3048_v8, %v5530_v59  ;;  %vm3089_vm8 = vcmp.eq.s32.totalorder %v3039_v13, %v5526_v57  ;;  %vm3090_vm12 = vcmp.eq.s32.totalorder %v3039_v13, %v5528_v58 }
 0x3dc   : >> { %4775 = vmatpush.bf16.msk.msrb.mxu0 %vm4774_vm7, %v5222_v24  ;;  %vm4776_vm5 = vmpackc.low %vm3101_vm2, %vm3097_vm10  ;;  %vm3104_vm7 = vcmp.eq.s32.totalorder %v3048_v8, %v5532_v60  ;;  %vm3093_vm10 = vcmp.eq.s32.totalorder %v3042_v42, %v5526_v57  ;;  %vm3091_vm2 = vcmp.eq.s32.totalorder %v3039_v13, %v5530_v59 }
 0x3dd   : >> { %4791 = vmatpush.bf16.msk.msrb.mxu1 %vm4790_vm4, %v5222_v24  ;;  %vm4792_vm15 = vmpackc.low %vm3102_vm0, %vm3098_vm1  ;;  %vm3094_vm1 = vcmp.eq.s32.totalorder %v3042_v42, %v5528_v58  ;;  %vm3092_vm0 = vcmp.eq.s32.totalorder %v3039_v13, %v5532_v60 }
 0x3de   : >> { %4807 = vmatpush.bf16.msk.msrb.mxu2 %vm4806_vm14, %v5222_v24  ;;  %vm4808_vm4 = vmpackc.low %vm3103_vm9, %vm3099_vm13  ;;  %vm3095_vm13 = vcmp.eq.s32.totalorder %v3042_v42, %v5530_v59  ;;  %vm3085_vm9 = vcmp.eq.s32.totalorder %v3036_v14, %v5526_v57 }
 0x3df   : >> { %4823 = vmatpush.bf16.msk.msrb.mxu3 %vm4822_vm11, %v5222_v24  ;;  %vm4824_vm14 = vmpackc.low %vm3104_vm7, %vm3100_vm6  ;;  %vm3096_vm6 = vcmp.eq.s32.totalorder %v3042_v42, %v5532_v60  ;;  %v3359_v42 = vld [vmem:[%s7855_s18] sm:$0xff] }
 0x3e0   : >> { %4777 = vmatpush.bf16.msk.msrb.mxu0 %vm4776_vm5, %v5222_v24  ;;  %vm4778_vm3 = vmpackc.low %vm3093_vm10, %vm3089_vm8 }
 0x3e1   : >> { %4793 = vmatpush.bf16.msk.msrb.mxu1 %vm4792_vm15, %v5222_v24  ;;  %vm4794_vm11 = vmpackc.low %vm3094_vm1, %vm3090_vm12  ;;  %vm3086_vm12 = vcmp.eq.s32.totalorder %v3036_v14, %v5528_v58  ;;  %vm3088_vm1 = vcmp.eq.s32.totalorder %v3036_v14, %v5532_v60 }
 0x3e2   : >> { %4809 = vmatpush.bf16.msk.msrb.mxu2 %vm4808_vm4, %v5222_v24  ;;  %vm4810_vm5 = vmpackc.low %vm3095_vm13, %vm3091_vm2  ;;  %v3033_v6 = vpop.permute.xlu1 %3032  ;;  %vm3087_vm2 = vcmp.eq.s32.totalorder %v3036_v14, %v5530_v59  ;;  %vm3073_vm13 = vcmp.eq.s32.totalorder %v3027_v12, %v5526_v57 }
 0x3e3   : >> { %4825 = vmatpush.bf16.msk.msrb.mxu3 %vm4824_vm14, %v5222_v24  ;;  %vm4826_vm7 = vmpackc.low %vm3096_vm6, %vm3092_vm0  ;;  %vm3081_vm15 = vcmp.eq.s32.totalorder %v3033_v6, %v5526_v57  ;;  %vm3082_vm8 = vcmp.eq.s32.totalorder %v3033_v6, %v5528_v58  ;;  %vm3083_vm4 = vcmp.eq.s32.totalorder %v3033_v6, %v5530_v59  ;;  %vm3084_vm10 = vcmp.eq.s32.totalorder %v3033_v6, %v5532_v60 }
 0x3e4   : >> { %4779 = vmatpush.bf16.msk.msrb.mxu0 %vm4778_vm3, %v5222_v24  ;;  %vm4780_vm14 = vmpackc.low %vm3085_vm9, %vm3081_vm15 }
 0x3e5   : >> { %4795 = vmatpush.bf16.msk.msrb.mxu1 %vm4794_vm11, %v5222_v24  ;;  %vm4796_vm3 = vmpackc.low %vm3086_vm12, %vm3082_vm8 }
 0x3e6   : >> { %4811 = vmatpush.bf16.msk.msrb.mxu2 %vm4810_vm5, %v5222_v24  ;;  %vm4812_vm0 = vmpackc.low %vm3087_vm2, %vm3083_vm4  ;;  %vm3075_vm4 = vcmp.eq.s32.totalorder %v3027_v12, %v5530_v59 }
 0x3e7   : >> { %4827 = vmatpush.bf16.msk.msrb.mxu3 %vm4826_vm7, %v5222_v24  ;;  %vm4828_vm11 = vmpackc.low %vm3088_vm1, %vm3084_vm10  ;;  %vm3074_vm7 = vcmp.eq.s32.totalorder %v3027_v12, %v5528_v58  ;;  %vm3467_vm1 = vcmask 1044480  }
 0x3e8   : >> { %4781 = vmatpush.bf16.msk.msrb.mxu0 %vm4780_vm14, %v5222_v24  ;;  %vm3076_vm14 = vcmp.eq.s32.totalorder %v3027_v12, %v5532_v60 }
 0x3e9   : >> { %4797 = vmatpush.bf16.msk.msrb.mxu1 %vm4796_vm3, %v5222_v24  ;;  %vm3462_vm3 = vcmask 1043456  }
 0x3ea   : >> { %4813 = vmatpush.bf16.msk.msrb.mxu2 %vm4812_vm0, %v5222_v24  ;;  %v3030_v29 = vpop.permute.xlu1 %3029  ;;  %vm3472_vm0 = vcmask 1045504  }
 0x3eb   : >> { %4829 = vmatpush.bf16.msk.msrb.mxu3 %vm4828_vm11, %v5222_v24  ;;  %vm3077_vm9 = vcmp.eq.s32.totalorder %v3030_v29, %v5526_v57  ;;  %vm3078_vm5 = vcmp.eq.s32.totalorder %v3030_v29, %v5528_v58  ;;  %vm3079_vm6 = vcmp.eq.s32.totalorder %v3030_v29, %v5530_v59  ;;  %vm3080_vm15 = vcmp.eq.s32.totalorder %v3030_v29, %v5532_v60  ;;  %v3360_v29 = vld [vmem:[%s7855_s18 + $0x8] sm:$0xff] }
 0x3ec   : >> { %vm4782_vm8 = vmpackc.low %vm3077_vm9, %vm3073_vm13  ;;  %vm3477_vm11 = vcmask 1046528  }
 0x3ed   : >> { %4783 = vmatpush.bf16.msk.msrb.mxu0 %vm4782_vm8, %v5222_v24  ;;  %vm4798_vm12 = vmpackc.low %vm3078_vm5, %vm3074_vm7 }
 0x3ee   : >> { %4799 = vmatpush.bf16.msk.msrb.mxu1 %vm4798_vm12, %v5222_v24  ;;  %vm4814_vm10 = vmpackc.low %vm3079_vm6, %vm3075_vm4 }
 0x3ef   : >> { %4815 = vmatpush.bf16.msk.msrb.mxu2 %vm4814_vm10, %v5222_v24  ;;  %vm4830_vm2 = vmpackc.low %vm3080_vm15, %vm3076_vm14 }
 0x3f0   : >> { %4831 = vmatpush.bf16.msk.msrb.mxu3 %vm4830_vm2, %v5222_v24  ;;  %3305 = vmatmul.bf16.vlgmr.msrb.gmra.mxu0 %v5524_v52  ;;  %v2322_v1 = vpop.f32.mrf.mxu0 }
 0x3f1   : >> { %3318 = vmatmul.bf16.vlgmr.msrb.gmra.mxu1 %v5524_v52  ;;  %v2365_v2 = vadd.f32 %v2322_v1, %v7627_v53  ;;  %v3403_v31 = vrot.slane %v2322_v1, 4  ;;  %v2335_v32 = vpop.f32.mrf.mxu1 }
 0x3f2   : >> { %3331 = vmatmul.bf16.vlgmr.msrb.gmra.mxu2 %v5524_v52  ;;  %v2366_v33 = vadd.f32 %v2335_v32, %v7630_v55  ;;  %v3404_v63 = vrot.slane %v2335_v32, 4 }
 0x3f3   : >> { %3344 = vmatmul.bf16.vlgmr.msrb.gmra.mxu3 %v5524_v52  ;;  %v3463_v24 = vsel %vm3462_vm3, %v7636_v7, %v3403_v31 }
 0x3f4   : >> { %v3464_v0 = vsel %vm3462_vm3, %v7640_v4, %v3404_v63 }
 0x3f8   : >> { %v2348_v34 = vpop.f32.mrf.mxu2  ;;  %v2324_v38 = vpop.f32.mrf.mxu0 }
 0x3f9   : >> { %v2367_v35 = vadd.f32 %v2348_v34, %v7645_v16  ;;  %v3405_v36 = vrot.slane %v2348_v34, 4  ;;  %v2361_v37 = vpop.f32.mrf.mxu3  ;;  %v2337_v41 = vpop.f32.mrf.mxu1 }
 0x3fa   : >> { %v2368_v62 = vadd.f32 %v2361_v37, %v7652_v61  ;;  %v3406_v39 = vrot.slane %v2361_v37, 4 }
 0x3fb   : >> { %v3465_v45 = vsel %vm3462_vm3, %v7660_v25, %v3405_v36 }
 0x3fc   : >> { %v3466_v48 = vsel %vm3462_vm3, %v7668_v21, %v3406_v39 }
 0x400   : >> { %v2350_v46 = vpop.f32.mrf.mxu2 }
 0x401   : >> { %v2363_v44 = vpop.f32.mrf.mxu3 }
 0x418   : >> { %v2650_v49 = vpop.f32.mrf.mxu0 }
 0x419   : >> { %v2693_v40 = vadd.f32 %v2650_v49, %v2365_v2  ;;  %v3415_v50 = vrot.slane %v2650_v49, 3  ;;  %v2663_v51 = vpop.f32.mrf.mxu1 }
 0x41a   : >> { %v2694_v20 = vadd.f32 %v2663_v51, %v2366_v33  ;;  %v3416_v53 = vrot.slane %v2663_v51, 3 }
 0x41b   : >> { %v3468_v54 = vsel %vm3467_vm1, %v3463_v24, %v3415_v50 }
 0x41c   : >> { %v3469_v55 = vsel %vm3467_vm1, %v3464_v0, %v3416_v53 }
 0x420   : >> { %v2676_v56 = vpop.f32.mrf.mxu2  ;;  %v2652_v5 = vpop.f32.mrf.mxu0 }
 0x421   : >> { %v2695_v3 = vadd.f32 %v2676_v56, %v2367_v35  ;;  %v3417_v7 = vrot.slane %v2676_v56, 3  ;;  %v2689_v4 = vpop.f32.mrf.mxu3  ;;  %v2665_v16 = vpop.f32.mrf.mxu1  ;;  %v3490_v35 = vld [vmem:[%s5496_s11] sm:$0x77] }
 0x422   : >> { %v2696_v10 = vadd.f32 %v2689_v4, %v2368_v62  ;;  %v3418_v11 = vrot.slane %v2689_v4, 3 }
 0x423   : >> { %v3470_v17 = vsel %vm3467_vm1, %v3465_v45, %v3417_v7 }
 0x424   : >> { %v3471_v18 = vsel %vm3467_vm1, %v3466_v48, %v3418_v11  ;;  %v3361_v48 = vld [vmem:[%s7855_s18 + $0x10] sm:$0xff] }
 0x428   : >> { %v2678_v61 = vpop.f32.mrf.mxu2 }
 0x429   : >> { %v2691_v15 = vpop.f32.mrf.mxu3 }
 0x44c   : >> { %v2978_v9 = vpop.f32.mrf.mxu0 }
 0x44d   : >> { %v2991_v25 = vpop.f32.mrf.mxu1  ;;  %v3427_v28 = vrot.slane %v2978_v9, 2  ;;  %v3021_v14 = vadd.f32 %v2978_v9, %v2693_v40 }
 0x44e   : >> { %v3428_v22 = vrot.slane %v2991_v25, 2  ;;  %v3022_v30 = vadd.f32 %v2991_v25, %v2694_v20  ;;  %v3362_v20 = vld [vmem:[%s7855_s18 + $0x18] sm:$0xff] }
 0x44f   : >> { %v3473_v6 = vsel %vm3472_vm0, %v3468_v54, %v3427_v28 }
 0x450   : >> { %v3474_v2 = vsel %vm3472_vm0, %v3469_v55, %v3428_v22 }
 0x454   : >> { %v3004_v26 = vpop.f32.mrf.mxu2  ;;  %v2980_v19 = vpop.f32.mrf.mxu0 }
 0x455   : >> { %v3017_v21 = vpop.f32.mrf.mxu3  ;;  %v2993_v43 = vpop.f32.mrf.mxu1  ;;  %v3429_v34 = vrot.slane %v3004_v26, 2  ;;  %v3023_v40 = vadd.f32 %v3004_v26, %v2695_v3  ;;  %v3491_v3 = vld [vmem:[%s5496_s11 + $0x8] sm:$0x77] }
 0x456   : >> { %v3430_v37 = vrot.slane %v3017_v21, 2  ;;  %v3024_v62 = vadd.f32 %v3017_v21, %v2696_v10 }
 0x457   : >> { %v3475_v50 = vsel %vm3472_vm0, %v3470_v17, %v3429_v34 }
 0x458   : >> { %v3476_v54 = vsel %vm3472_vm0, %v3471_v18, %v3430_v37 }
 0x45c   : >> { %v3006_v23 = vpop.f32.mrf.mxu2 }
 0x45d   : >> { %v3019_v47 = vpop.f32.mrf.mxu3 }
 0x46d   : >> { %v3306_v27 = vpop.f32.mrf.mxu0 }
 0x46e   : >> { %v3439_v8 = vrot.slane %v3306_v27, 1  ;;  %v3319_v13 = vpop.f32.mrf.mxu1  ;;  %v3349_v32 = vadd.f32 %v3306_v27, %v3021_v14 }
 0x46f   : >> { %v3350_v12 = vadd.f32 %v3319_v13, %v3022_v30  ;;  %v3440_v1 = vrot.slane %v3319_v13, 1 }
 0x470   : >> { %v3478_v31 = vsel %vm3477_vm11, %v3473_v6, %v3439_v8 }
 0x471   : >> { %v3482_v33 = vadd.f32 %v3478_v31, %v3359_v42  ;;  %v3479_v63 = vsel %vm3477_vm11, %v3474_v2, %v3440_v1  ;;  %v3496_v24 = vrot.slane %v3350_v12, 4 }
 0x472   : >> { %v3483_v0 = vadd.f32 %v3479_v63, %v3360_v29 }
 0x473   : >> { %3486 = vst [vmem:[%s7855_s18] sm:$0xff] %v3482_v33  ;;  %v3498_v36 = vsel %vm3462_vm3, %v3349_v32, %v3496_v24 }
 0x474   : >> { %3487 = vst [vmem:[%s7855_s18 + $0x8] sm:$0xff] %v3483_v0  ;;  %v4835_v38 = vrot.slane %v3498_v36, 9 }
 0x475   : >> { %v3332_v39 = vpop.f32.mrf.mxu2  ;;  %v3308_v41 = vpop.f32.mrf.mxu0 }
 0x476   : >> { %v3506_v45 = vadd.f32 %v4835_v38, %v3490_v35  ;;  %v3441_v46 = vrot.slane %v3332_v39, 1  ;;  %v3345_v44 = vpop.f32.mrf.mxu3  ;;  %v3321_v49 = vpop.f32.mrf.mxu1  ;;  %v3351_v56 = vadd.f32 %v3332_v39, %v3023_v40 }
 0x477   : >> { %v3352_v51 = vadd.f32 %v3345_v44, %v3024_v62  ;;  %v3442_v53 = vrot.slane %v3345_v44, 1 }
 0x478   : >> { %3508 = vst [vmem:[%s5496_s11] sm:$0x77] %v3506_v45  ;;  %v3480_v55 = vsel %vm3477_vm11, %v3475_v50, %v3441_v46 }
 0x479   : >> { %v3484_v7 = vadd.f32 %v3480_v55, %v3361_v48  ;;  %v3481_v4 = vsel %vm3477_vm11, %v3476_v54, %v3442_v53  ;;  %v3497_v5 = vrot.slane %v3352_v51, 4 }
 0x47a   : >> { %v3485_v10 = vadd.f32 %v3481_v4, %v3362_v20 }
 0x47b   : >> { %3488 = vst [vmem:[%s7855_s18 + $0x10] sm:$0xff] %v3484_v7  ;;  %v3499_v11 = vsel %vm3462_vm3, %v3351_v56, %v3497_v5 }
 0x47c   : >> { %3489 = vst [vmem:[%s7855_s18 + $0x18] sm:$0xff] %v3485_v10  ;;  %v4836_v16 = vrot.slane %v3499_v11, 9 }
 0x47d   : >> { %v3334_v17 = vpop.f32.mrf.mxu2 }
 0x47e   : >> { %v3507_v61 = vadd.f32 %v4836_v16, %v3491_v3  ;;  %v3347_v15 = vpop.f32.mrf.mxu3 }
 0x480   : >> { %3509 = vst [vmem:[%s5496_s11 + $0x8] sm:$0x77] %v3507_v61 }
 0x481 PF: >> { %s531_s17 = sadd.s32 1, %s5213_s17  }
 0x482   : >> { %p528_p13 = scmp.ge.s32.totalorder %s531_s17, 3  }
 0x484   : > { %530 = sbr.rel (!%p528_p13) target bundleno = 154 (0x9a), region = 166 }
 0x489 PF: > { %p4837_p0 = scmp.ne.s32.totalorder %s5193_s8, 1 }
 0x48b   : > { %3513 = sbr.rel (%p4837_p0) target bundleno = 1192 (0x4a8), region = 89 }
 0x490   : > { %v3514_v18 = vld [vmem:[%s5494_s15] sm:$0xff]  ;;  %v3515_v9 = vld [vmem:[%s5494_s15 + $0x8] sm:$0xff]  ;;  %v3516_v25 = vld [vmem:[%s5494_s15 + $0x10] sm:$0xff]  ;;  %v3572_v48 = vlaneseq  ;;  %vm3565_vm13 = vcmask 1040384   ;;  %vm3567_vm9 = vcmask 1042434   ;;  %vm3569_vm5 = vcmask 1041408  }
 0x491   : > { %v3517_v26 = vld [vmem:[%s5494_s15 + $0x18] sm:$0xff]  ;;  %v3518_v52 = vld [vmem:[%s5494_s15 + $0x20] sm:$0xff]  ;;  %v3519_v57 = vld [vmem:[%s5494_s15 + $0x28] sm:$0xff] }
 0x492   : > { %v3520_v58 = vld [vmem:[%s5494_s15 + $0x30] sm:$0xff]  ;;  %v3521_v59 = vld [vmem:[%s5494_s15 + $0x38] sm:$0xff]  ;;  %v3522_v60 = vld [vmem:[%s5494_s15 + $0x40] sm:$0xff]  ;;  %v3526_v21 = vadd.f32 %v3518_v52, %v3514_v18  ;;  %v3534_v19 = vadd.f32 %v3519_v57, %v3515_v9  ;;  %vm3574_vm6 = vcmp.lt.s32.totalorder %v3572_v48, 512 }
 0x493   : > { %v3523_v43 = vld [vmem:[%s5494_s15 + $0x48] sm:$0xff]  ;;  %v3524_v23 = vld [vmem:[%s5494_s15 + $0x50] sm:$0xff]  ;;  %v3525_v47 = vld [vmem:[%s5494_s15 + $0x58] sm:$0xff]  ;;  %v3542_v28 = vadd.f32 %v3520_v58, %v3516_v25  ;;  %v3550_v22 = vadd.f32 %v3521_v59, %v3517_v26 }
 0x494   : > { %v3527_v30 = vadd.f32 %v3526_v21, %v3522_v60  ;;  %v3535_v27 = vadd.f32 %v3534_v19, %v3523_v43 }
 0x495   : > { %v3543_v42 = vadd.f32 %v3542_v28, %v3524_v23  ;;  %v3551_v8 = vadd.f32 %v3550_v22, %v3525_v47 }
 0x496   : > { %v3528_v13 = vrot.slane %v3527_v30, 4  ;;  %v3536_v14 = vrot.slane %v3535_v27, 4 }
 0x497   : > { %v3544_v6 = vrot.slane %v3543_v42, 4  ;;  %v3552_v12 = vrot.slane %v3551_v8, 4 }
 0x498   : > { %v3529_v29 = vadd.f32 %v3528_v13, %v3527_v30  ;;  %v3537_v1 = vadd.f32 %v3536_v14, %v3535_v27 }
 0x499   : > { %v3545_v2 = vadd.f32 %v3544_v6, %v3543_v42  ;;  %v3553_v31 = vadd.f32 %v3552_v12, %v3551_v8 }
 0x49a   : > { %v3530_v32 = vrot.slane %v3529_v29, 2  ;;  %v3538_v33 = vrot.slane %v3537_v1, 2 }
 0x49b   : > { %v3546_v63 = vrot.slane %v3545_v2, 2  ;;  %v3554_v24 = vrot.slane %v3553_v31, 2 }
 0x49c   : > { %v3531_v0 = vadd.f32 %v3530_v32, %v3529_v29  ;;  %v3539_v34 = vadd.f32 %v3538_v33, %v3537_v1 }
 0x49d   : > { %v3547_v35 = vadd.f32 %v3546_v63, %v3545_v2  ;;  %v3555_v36 = vadd.f32 %v3554_v24, %v3553_v31 }
 0x49e   : > { %v3532_v37 = vrot.slane %v3531_v0, 1  ;;  %v3540_v38 = vrot.slane %v3539_v34, 1 }
 0x49f   : > { %v3548_v62 = vrot.slane %v3547_v35, 1  ;;  %v3556_v39 = vrot.slane %v3555_v36, 1 }
 0x4a0   : > { %v3533_v41 = vadd.f32 %v3532_v37, %v3531_v0  ;;  %v3541_v45 = vadd.f32 %v3540_v38, %v3539_v34 }
 0x4a1   : > { %v3549_v46 = vadd.f32 %v3548_v62, %v3547_v35  ;;  %v3557_v44 = vadd.f32 %v3556_v39, %v3555_v36 }
 0x4a2   : > { %v3562_v49 = vrot.slane %v3541_v45, 7 }
 0x4a3   : > { %v3563_v40 = vrot.slane %v3549_v46, 6  ;;  %v3564_v50 = vrot.slane %v3557_v44, 5 }
 0x4a4   : > { %v3566_v51 = vsel %vm3565_vm13, %v3533_v41, %v3562_v49 }
 0x4a5   : > { %v3568_v20 = vsel %vm3567_vm9, %v3563_v40, %v3564_v50 }
 0x4a6   : > { %v3570_v53 = vsel %vm3569_vm5, %v3566_v51, %v3568_v20 }
 0x4a7   : > { %3576 = vst.msk [vmem:[%s5492_s16] sm:$0xf] %vm3574_vm6, %v3570_v53 }
 0x4a8 PF: > { %s8138_s8 = sadd.s32 4294967295, %s5209_s12   ;;  %s4849_s1 = sshll.u32 %s5197_s9, 5 }
 0x4a9   : > { %s7898_s27 = sand.u32 1, %s8138_s8   ;;  %s8139_s5 = sld [smem:[#allocation24_spill]] }
 0x4aa   : > { %s3614_s20 = sshll.u32 %s5494_s15, 4  ;;  %s3583_s13 = scalar_lea.sflag [#allocation9], %s7898_s27  ;;  %s3615_s20 = int_to_ptr.vmem [resolvable:$true] %s3614_s20 }
 0x4af   : > { %s3613_s17 = scalar_lea.hbm %s8139_s5, %s4849_s1  ;;  %s5053_s3 = scalar_lea.hbm %s8139_s5, 192 }
 0x4b0   : > { %s3616_s19 = sshll.u32 %s3613_s17, 4  ;;  %s3617_s19 = int_to_ptr.hbm [resolvable:$true] %s3616_s19 }
 0x4b1   : > { %s5047_s22 = sshra.s32 %s3617_s19, 4  ;;  %s5048_s22 = int_to_ptr.hbm [resolvable:$true] %s5047_s22 }
 0x4b2   : > { %s5049_s2 = scalar_lea.hbm %s5048_s22, 96  ;;  %p5054_p4 = scmp.lt.s32.totalorder %s5048_s22, %s8139_s5 }
 0x4b3   : > { %p5050_p1 = scmp.ne.s32.totalorder %s5048_s22, %s5049_s2  ;;  %p5055_p5 = scmp.lt.s32.totalorder %s5053_s3, %s5049_s2 }
 0x4b5   : > { %p5051_p2 = pnand %p5050_p1, %p5352_p10  ;;  %p5056_p6 = por %p5055_p5, %p5054_p4 }
 0x4b7   : > { %p5052_p3 = pneg %p5051_p2 }
 0x4b9   : > { %p5057_p7 = pnand %p5056_p6, %p5052_p3 }
 0x4bb   : > { %5060 = shalt.err (!%p5057_p7)
}
 0x4bc   : > { %s5227_s15 = smov 512   ;;  %s5228_s1 = smov 1024  }
 0x4bd   : > { %s5229_s14 = smov 32   ;;  %s4840_s28 = sshll.u32 %s5197_s9, 2 }
 0x4be   : > { %4859 = dma.vmem_to_hbm [thread:$0]  (%p5352_p10), %s3615_s20, 1536, %s3617_s19, %s3583_s13, %s5227_s15, %s5228_s1, %s5229_s14  }
 0x4bf   : > { %s3600_s10 = sshll.u32 %s5492_s16, 4  ;;  %s3598_s17 = scalar_lea.hbm %s7990_s4, %s4840_s28  ;;  %s3601_s10 = int_to_ptr.vmem [resolvable:$true] %s3600_s10 }
 0x4c0   : > { %s3602_s22 = sshll.u32 %s3598_s17, 4  ;;  %s4850_s2 = sshll.u32 %s5197_s9, 4  ;;  %s3603_s22 = int_to_ptr.hbm [resolvable:$true] %s3602_s22 }
 0x4c1   : > { %s3630_s5 = scalar_lea.hbm %s7992_s6, %s4850_s2  ;;  %s3578_s7 = scalar_lea.sflag [#allocation7], %s5477_s26 }
 0x4c2   : > { %s5075_s24 = sshra.s32 %s3603_s22, 4  ;;  %s5081_s19 = scalar_lea.hbm %s7990_s4, 8  ;;  %s5076_s24 = int_to_ptr.hbm [resolvable:$true] %s5075_s24 }
 0x4c3   : > { %s5077_s30 = scalar_lea.hbm %s5076_s24, 4  ;;  %p5082_p13 = scmp.lt.s32.totalorder %s5076_s24, %s7990_s4 }
 0x4c4   : > { %p5078_p8 = scmp.ne.s32.totalorder %s5076_s24, %s5077_s30  ;;  %p5083_p0 = scmp.lt.s32.totalorder %s5081_s19, %s5077_s30 }
 0x4c6   : > { %p5079_p9 = pnand %p5078_p8, %p5352_p10  ;;  %p5084_p1 = por %p5083_p0, %p5082_p13 }
 0x4c8   : > { %p5080_p11 = pneg %p5079_p9 }
 0x4ca   : > { %p5085_p2 = pnand %p5084_p1, %p5080_p11 }
 0x4cc   : > { %5088 = shalt.err (!%p5085_p2)
}
 0x4cd   : > { %4858 = dma.vmem_to_hbm [thread:$0]  (%p5352_p10), %s3601_s10, 64, %s3603_s22, %s3578_s7  }
 0x4ce   : > { %s3632_s9 = sshll.u32 %s5496_s11, 4  ;;  %s3634_s26 = sshll.u32 %s3630_s5, 4  ;;  %s3633_s9 = int_to_ptr.vmem [resolvable:$true] %s3632_s9  ;;  %s3635_s26 = int_to_ptr.hbm [resolvable:$true] %s3634_s26 }
 0x4cf   : > { %s5103_s14 = sshra.s32 %s3635_s26, 4  ;;  %s5109_s21 = scalar_lea.hbm %s7992_s6, 32  ;;  %s5104_s14 = int_to_ptr.hbm [resolvable:$true] %s5103_s14 }
 0x4d0   : > { %s5105_s28 = scalar_lea.hbm %s5104_s14, 16  ;;  %p5110_p6 = scmp.lt.s32.totalorder %s5104_s14, %s7992_s6 }
 0x4d1   : > { %p5106_p3 = scmp.ne.s32.totalorder %s5104_s14, %s5105_s28  ;;  %p5111_p7 = scmp.lt.s32.totalorder %s5109_s21, %s5105_s28 }
 0x4d3   : > { %p5107_p4 = pnand %p5106_p3, %p5352_p10  ;;  %p5112_p8 = por %p5111_p7, %p5110_p6 }
 0x4d5   : > { %p5108_p5 = pneg %p5107_p4 }
 0x4d7   : > { %p5113_p9 = pnand %p5112_p8, %p5108_p5 }
 0x4d9   : > { %5116 = shalt.err (!%p5113_p9)
}
 0x4da   : > { %4860 = dma.vmem_to_hbm [thread:$0]  (%p5352_p10), %s3633_s9, 256, %s3635_s26, %s3583_s13  }
 0x4db PF: > { %p4874_p11 = scmp.ge.s32.totalorder %s5209_s12, 2  ;;  %s3646_s5 = sand.u32 1, %s5173_s29  }
 0x4dc   : > { %s3647_s7 = scalar_lea.sflag [#allocation7], %s3646_s5 }
 0x4dd   : > { %p4865_p13 = pnand %p4874_p11, %p5361_p12 }
 0x4df   : > { %p4866_p0 = pneg %p4865_p13 }
 0x4e1   : > { %5164 = dma.done.wait (%p4866_p0), %s3647_s7, 64  }
 0x4e2   : > { %5166 = vsyncadd (%p4866_p0), %s3647_s7, 4294967232  ;;  %s8140_s11 = sadd.s32 4294967294, %s5209_s12  }
 0x4e3   : > { %s3656_s10 = sand.u32 1, %s8140_s11  }
 0x4e4   : > { %s3657_s22 = scalar_lea.sflag [#allocation9], %s3656_s10 }
 0x4e5   : > { %5168 = dma.done.wait (%p4866_p0), %s3657_s22, 1792  }
 0x4e6   : > { %5170 = vsyncadd (%p4866_p0), %s3657_s22, 4294965504  ;;  %s36_s12 = sadd.s32 1, %s5209_s12   ;;  %s8141_s23 = sld [smem:[#allocation14_spill]] }
 0x4e7   : > { %p33_p10 = scmp.ge.s32.totalorder %s36_s12, 6   ;;  %s8142_s30 = sld [smem:[#allocation21_spill]] }
 0x4e8   : > { %s8143_s1 = sld [smem:[#allocation15_spill]]  ;;  %s8149_s29 = smov %s5177_s0 }
 0x4e9   : > { %s8144_s7 = sld [smem:[#allocation20_spill]]  ;;  %35 = sbr.rel (!%p33_p10) target bundleno = 17 (0x11), region = 177 }
 0x4ea   : > { %s8145_s8 = sld [smem:[#allocation16_spill]] }
 0x4eb   : > { %s8146_s9 = sld [smem:[#allocation17_spill]] }
 0x4ec   : > { %s8147_s10 = sld [smem:[#allocation18_spill]]  ;;  %s8150_s0 = smov %s8141_s23 }
 0x4ed   : > { %s8148_s11 = sld [smem:[#allocation19_spill]] }
 0x4ee   :  { %3673 = vsyncpa [#allocation7], 1 }
 0x4ef   :  { %3675 = vsyncpa [#allocation7 + $0x1], 1 }
 0x4f0   :  { %3676 = vsyncpa [#allocation9], 1 }
 0x4f1   :  { %3678 = vsyncpa [#allocation9 + $0x1], 1 }

</bundles_post_ra>
